<compile_context>
chip_gen: v7x
topology: tpu7x:2x2x1
jax: 0.10.0
libtpu: 0.0.40
codegen_flags: <defaults>
</compile_context>

<pallas_src>
import jax
import jax.numpy as jnp
from jax.experimental import pallas as pl
from jax.experimental.pallas import tpu as pltpu

INPUT_DIM = 21
HIDDEN_DIM = 100        # logical (PyTorch) hidden size
HP = 128                # lane-aligned padded hidden size
G = 4 * HP              # padded gate width: [i, f, g, o], each HP wide
FC1_DIM = 200
FC1P = 256              # lane-aligned padded fc1 width
FC2_DIM = 300
FC2P = 384              # lane-aligned padded fc2 width (3 * 128)


# ---------------------------------------------------------------------------
# Fused encoder kernel (one grid step == one batch block, time-major layout).
# ---------------------------------------------------------------------------
def _encoder_kernel(x_ref, wih0_ref, whh0_ref, b0_ref,
                    wih1_ref, whh1_ref, b1_ref,
                    w1_ref, bf1_ref, w2_ref, bf2_ref,
                    out_ref, xp_scr, h1_scr, h2_scr):
    T, Bb, Din = x_ref.shape   # static at trace time

    def sigmoid(v):
        # sigmoid(x) = 0.5*(tanh(0.5*x)+1): one EUP op instead of exp + divide.
        return 0.5 * jnp.tanh(0.5 * v) + 0.5

    def run_layer(whh_ref, h_out_scr):
        h = jnp.zeros((Bb, HP), jnp.float32)
        c = jnp.zeros((Bb, HP), jnp.float32)
        # Statically unrolled time loop (T is small): all slice offsets are
        # compile-time constants -> lane-aligned vreg selects.
        for t in range(T):
            gates = xp_scr[t] + jnp.dot(
                h, whh_ref[...], preferred_element_type=jnp.float32)   # (Bb, G)
            i_g = sigmoid(gates[:, 0 * HP:1 * HP])
            f_g = sigmoid(gates[:, 1 * HP:2 * HP])
            g_g = jnp.tanh(gates[:, 2 * HP:3 * HP])
            o_g = sigmoid(gates[:, 3 * HP:4 * HP])
            c = f_g * c + i_g * g_g
            h = o_g * jnp.tanh(c)
            h_out_scr[t] = h

    # ---- layer 0: input projection hoisted over all timesteps (one matmul) ----
    x2d = x_ref[...].reshape(T * Bb, Din)                               # (T*Bb, Din)
    xp0 = jnp.dot(x2d, wih0_ref[...],
                  preferred_element_type=jnp.float32) + b0_ref[...]     # (T*Bb, G)
    xp_scr[...] = xp0.reshape(T, Bb, G)
    run_layer(whh0_ref, h1_scr)

    # ---- layer 1: its input projection is also hoisted (batched over T*Bb) ----
    h1 = h1_scr[...].reshape(T * Bb, HP)
    xp1 = jnp.dot(h1, wih1_ref[...],
                  preferred_element_type=jnp.float32) + b1_ref[...]     # (T*Bb, G)
    xp_scr[...] = xp1.reshape(T, Bb, G)
    run_layer(whh1_ref, h2_scr)

    # TODO(synk): nn.Dropout(p=0.2) implemented as identity (eval-mode semantics).

    # ---- fused MLP head on the flattened (T*Bb, HP) activation (full MXU rows) ----
    h2 = h2_scr[...].reshape(T * Bb, HP)
    fc1 = jnp.dot(h2, w1_ref[...],
                  preferred_element_type=jnp.float32) + bf1_ref[...]    # (T*Bb, FC1P)
    out = jnp.dot(fc1, w2_ref[...],
                  preferred_element_type=jnp.float32) + bf2_ref[...]    # (T*Bb, FC2P)
    out_ref[...] = out.reshape(T, Bb, FC2P).astype(out_ref.dtype)


def _round_up(x, m):
    return ((x + m - 1) // m) * m


def _choose_block_b(batch_pad8, max_block_b):
    """Batch block: multiple of 8 (full sublanes), capped, >=2 grid steps when possible."""
    if batch_pad8 <= 8:
        return batch_pad8
    if batch_pad8 > max_block_b:
        return max_block_b
    # split into (at least) two grid steps so dual-TC chips (v7x) get parallel work
    return max(8, _round_up((batch_pad8 + 1) // 2, 8))


def encoder_forward(kp, x_btd, *, max_block_b=128):
    """x_btd: (B, T, 21) batch-first (PyTorch batch_first=True). Returns (B, T, 300)."""
    B, T, D = x_btd.shape
    b8 = _round_up(B, 8)
    bblk = _choose_block_b(b8, max_block_b)
    n_blocks = -(-b8 // bblk)
    b_pad = n_blocks * bblk

    # time-major layout for the kernel; zero-pad batch to a multiple of bblk.
    x_tbd = jnp.transpose(x_btd, (1, 0, 2))
    if b_pad != B:
        x_tbd = jnp.pad(x_tbd, ((0, 0), (0, b_pad - B), (0, 0)))

    out_tbf = pl.pallas_call(
        _encoder_kernel,
        out_shape=jax.ShapeDtypeStruct((T, b_pad, FC2P), jnp.float32),
        grid=(n_blocks,),
        in_specs=[
            pl.BlockSpec((T, bblk, D), lambda b: (0, b, 0)),       # x (one batch block)
            pl.BlockSpec((INPUT_DIM, G), lambda b: (0, 0)),        # w_ih layer0
            pl.BlockSpec((HP, G), lambda b: (0, 0)),               # w_hh layer0
            pl.BlockSpec((1, G), lambda b: (0, 0)),                # bias layer0
            pl.BlockSpec((HP, G), lambda b: (0, 0)),               # w_ih layer1
            pl.BlockSpec((HP, G), lambda b: (0, 0)),               # w_hh layer1
            pl.BlockSpec((1, G), lambda b: (0, 0)),                # bias layer1
            pl.BlockSpec((HP, FC1P), lambda b: (0, 0)),            # fc1 w
            pl.BlockSpec((1, FC1P), lambda b: (0, 0)),             # fc1 b
            pl.BlockSpec((FC1P, FC2P), lambda b: (0, 0)),          # fc2 w (384-lane padded)
            pl.BlockSpec((1, FC2P), lambda b: (0, 0)),             # fc2 b
        ],
        out_specs=pl.BlockSpec((T, bblk, FC2P), lambda b: (0, b, 0)),
        scratch_shapes=[
            pltpu.VMEM((T, bblk, G), jnp.float32),    # staged input projections
            pltpu.VMEM((T, bblk, HP), jnp.float32),   # layer-0 hidden states (all t)
            pltpu.VMEM((T, bblk, HP), jnp.float32),   # layer-1 hidden states (all t)
        ],
        compiler_params=pltpu.CompilerParams(
            dimension_semantics=("parallel",),
            vmem_limit_bytes=32 * 1024 * 1024,
        ),
    )(x_tbd, kp["wih0"], kp["whh0"], kp["b0"],
      kp["wih1"], kp["whh1"], kp["b1"],
      kp["fc1_w"], kp["fc1_b"], kp["fc2_w"], kp["fc2_b"])

    # back to batch-first, drop batch padding and the 300->384 lane padding.
    return jnp.transpose(out_tbf, (1, 0, 2))[:B, :, :FC2_DIM]


# ---------------------------------------------------------------------------
# Parameters: logical (PyTorch-shaped) init + zero-padding to lane-aligned layout.
# ---------------------------------------------------------------------------
def init_params(key):
    ks = jax.random.split(key, 12)
    k_lstm = 1.0 / jnp.sqrt(HIDDEN_DIM)
    k_fc1 = 1.0 / jnp.sqrt(HIDDEN_DIM)
    k_fc2 = 1.0 / jnp.sqrt(FC1_DIM)

    def u(k, shape, bound):
        return jax.random.uniform(k, shape, jnp.float32, -bound, bound)

    return {
        # layer 0: input_dim -> hidden   (gate order [i, f, g, o], bias = b_ih + b_hh)
        "l0_w_ih": u(ks[0], (INPUT_DIM, 4 * HIDDEN_DIM), k_lstm),
        "l0_w_hh": u(ks[1], (HIDDEN_DIM, 4 * HIDDEN_DIM), k_lstm),
        "l0_b": u(ks[2], (4 * HIDDEN_DIM,), k_lstm) + u(ks[3], (4 * HIDDEN_DIM,), k_lstm),
        # layer 1: hidden -> hidden
        "l1_w_ih": u(ks[4], (HIDDEN_DIM, 4 * HIDDEN_DIM), k_lstm),
        "l1_w_hh": u(ks[5], (HIDDEN_DIM, 4 * HIDDEN_DIM), k_lstm),
        "l1_b": u(ks[6], (4 * HIDDEN_DIM,), k_lstm) + u(ks[7], (4 * HIDDEN_DIM,), k_lstm),
        # fc heads
        "fc1_w": u(ks[8], (HIDDEN_DIM, FC1_DIM), k_fc1),
        "fc1_b": u(ks[9], (FC1_DIM,), k_fc1),
        "fc2_w": u(ks[10], (FC1_DIM, FC2_DIM), k_fc2),
        "fc2_b": u(ks[11], (FC2_DIM,), k_fc2),
    }


def _pad_gate_cols(w):
    """(..., 4H) -> (..., 4*HP): zero-pad each H-wide gate chunk to HP (lane-aligned)."""
    lead = w.shape[:-1]
    w4 = w.reshape(lead + (4, HIDDEN_DIM))
    w4 = jnp.pad(w4, [(0, 0)] * len(lead) + [(0, 0), (0, HP - HIDDEN_DIM)])
    return w4.reshape(lead + (4 * HP,))


def _pad_rows(w, to_rows):
    return jnp.pad(w, ((0, to_rows - w.shape[0]), (0, 0)))


def prepare_kernel_params(p):
    """Zero-pad logical params into the lane-aligned kernel layout."""
    return {
        "wih0": _pad_gate_cols(p["l0_w_ih"]),                                   # (D, G)
        "whh0": _pad_rows(_pad_gate_cols(p["l0_w_hh"]), HP),                    # (HP, G)
        "b0": _pad_gate_cols(p["l0_b"]).reshape(1, G),                          # (1, G)
        "wih1": _pad_rows(_pad_gate_cols(p["l1_w_ih"]), HP),                    # (HP, G)
        "whh1": _pad_rows(_pad_gate_cols(p["l1_w_hh"]), HP),                    # (HP, G)
        "b1": _pad_gate_cols(p["l1_b"]).reshape(1, G),                          # (1, G)
        "fc1_w": jnp.pad(p["fc1_w"], ((0, HP - HIDDEN_DIM), (0, FC1P - FC1_DIM))),
        "fc1_b": jnp.pad(p["fc1_b"], (0, FC1P - FC1_DIM)).reshape(1, FC1P),
        "fc2_w": jnp.pad(p["fc2_w"], ((0, FC1P - FC1_DIM), (0, FC2P - FC2_DIM))),
        "fc2_b": jnp.pad(p["fc2_b"], (0, FC2P - FC2_DIM)).reshape(1, FC2P),
    }


# ---------------------------------------------------------------------------
# Pure-JAX reference (lax.scan, unpadded params) for the correctness check.
# ---------------------------------------------------------------------------
def _lstm_layer_ref(x_tbd, w_ih, w_hh, b):
    T, B, _ = x_tbd.shape
    H = w_hh.shape[0]

    def step(carry, x_t):
        h, c = carry
        gates = x_t @ w_ih + h @ w_hh + b
        i_g = jax.nn.sigmoid(gates[:, 0 * H:1 * H])
        f_g = jax.nn.sigmoid(gates[:, 1 * H:2 * H])
        g_g = jnp.tanh(gates[:, 2 * H:3 * H])
        o_g = jax.nn.sigmoid(gates[:, 3 * H:4 * H])
        c_new = f_g * c + i_g * g_g
        h_new = o_g * jnp.tanh(c_new)
        return (h_new, c_new), h_new

    init = (jnp.zeros((B, H), jnp.float32), jnp.zeros((B, H), jnp.float32))
    _, hs = jax.lax.scan(step, init, x_tbd)
    return hs


def encoder_forward_ref(params, x_btd):
    x_tbd = jnp.transpose(x_btd, (1, 0, 2))
    h1 = _lstm_layer_ref(x_tbd, params["l0_w_ih"], params["l0_w_hh"], params["l0_b"])
    h2 = _lstm_layer_ref(h1, params["l1_w_ih"], params["l1_w_hh"], params["l1_b"])
    h2_btd = jnp.transpose(h2, (1, 0, 2))
    fc1 = h2_btd @ params["fc1_w"] + params["fc1_b"]
    return fc1 @ params["fc2_w"] + params["fc2_b"]


if __name__ == "__main__":
    key = jax.random.PRNGKey(0)
    k_param, k_x1, k_x2 = jax.random.split(key, 3)

    params = init_params(k_param)
    kparams = prepare_kernel_params(params)

    # Case 1: small shapes (single batch block).
    B, T = 2, 8
    x = jax.random.normal(k_x1, (B, T, INPUT_DIM), jnp.float32)
    out = jax.block_until_ready(encoder_forward(kparams, x))
    ref = jax.block_until_ready(encoder_forward_ref(params, x))
    assert out.shape == (B, T, FC2_DIM), out.shape
    assert jnp.allclose(out, ref, atol=1e-3, rtol=1e-3), float(jnp.max(jnp.abs(out - ref)))

    # Case 2: exercises multi-block grid + batch padding/slice path.
    B2, T2 = 20, 8
    x2 = jax.random.normal(k_x2, (B2, T2, INPUT_DIM), jnp.float32)
    out2 = jax.block_until_ready(encoder_forward(kparams, x2))
    ref2 = jax.block_until_ready(encoder_forward_ref(params, x2))
    assert out2.shape == (B2, T2, FC2_DIM), out2.shape
    assert jnp.allclose(out2, ref2, atol=1e-3, rtol=1e-3), float(jnp.max(jnp.abs(out2 - ref2)))

    print("KERNEL_OK")
</pallas_src>

<mosaic_0001>
module attributes {stable_mosaic.version = 11 : i64} {
  func.func @_encoder_kernel(%arg0: i32, %arg1: memref<8x8x21xf32, #tpu.memory_space<vmem>>, %arg2: memref<21x512xf32, #tpu.memory_space<vmem>>, %arg3: memref<128x512xf32, #tpu.memory_space<vmem>>, %arg4: memref<1x512xf32, #tpu.memory_space<vmem>>, %arg5: memref<128x512xf32, #tpu.memory_space<vmem>>, %arg6: memref<128x512xf32, #tpu.memory_space<vmem>>, %arg7: memref<1x512xf32, #tpu.memory_space<vmem>>, %arg8: memref<128x256xf32, #tpu.memory_space<vmem>>, %arg9: memref<1x256xf32, #tpu.memory_space<vmem>>, %arg10: memref<256x384xf32, #tpu.memory_space<vmem>>, %arg11: memref<1x384xf32, #tpu.memory_space<vmem>>, %arg12: memref<8x8x384xf32, #tpu.memory_space<vmem>>, %arg13: memref<8x8x512xf32, #tpu.memory_space<vmem>>, %arg14: memref<8x8x128xf32, #tpu.memory_space<vmem>>, %arg15: memref<8x8x128xf32, #tpu.memory_space<vmem>>) attributes {dimension_semantics = [#tpu.dimension_semantics<parallel>], iteration_bounds = array<i64: 1>, scalar_prefetch = 0 : i64, scratch_operands = 3 : i64, tpu.core_type = #tpu.core_type<tc>, window_params = [{transform_indices = @transform_0, window_bounds = array<i64: 8, 8, 21>}, {pipeline_mode = #tpu.pipeline_mode<synchronous>, transform_indices = @transform_1, window_bounds = array<i64: 21, 512>}, {pipeline_mode = #tpu.pipeline_mode<synchronous>, transform_indices = @transform_2, window_bounds = array<i64: 128, 512>}, {pipeline_mode = #tpu.pipeline_mode<synchronous>, transform_indices = @transform_3, window_bounds = array<i64: 1, 512>}, {pipeline_mode = #tpu.pipeline_mode<synchronous>, transform_indices = @transform_4, window_bounds = array<i64: 128, 512>}, {pipeline_mode = #tpu.pipeline_mode<synchronous>, transform_indices = @transform_5, window_bounds = array<i64: 128, 512>}, {pipeline_mode = #tpu.pipeline_mode<synchronous>, transform_indices = @transform_6, window_bounds = array<i64: 1, 512>}, {pipeline_mode = #tpu.pipeline_mode<synchronous>, transform_indices = @transform_7, window_bounds = array<i64: 128, 256>}, {pipeline_mode = #tpu.pipeline_mode<synchronous>, transform_indices = @transform_8, window_bounds = array<i64: 1, 256>}, {pipeline_mode = #tpu.pipeline_mode<synchronous>, transform_indices = @transform_9, window_bounds = array<i64: 256, 384>}, {pipeline_mode = #tpu.pipeline_mode<synchronous>, transform_indices = @transform_10, window_bounds = array<i64: 1, 384>}, {transform_indices = @transform_11, window_bounds = array<i64: 8, 8, 384>}]} {
    %c0 = arith.constant 0 : index
    %c0_0 = arith.constant 0 : index
    %c0_1 = arith.constant 0 : index
    %0 = vector.load %arg1[%c0, %c0_0, %c0_1] : memref<8x8x21xf32, #tpu.memory_space<vmem>>, vector<8x8x21xf32>
    %1 = vector.shape_cast %0 : vector<8x8x21xf32> to vector<64x21xf32>
    %c0_2 = arith.constant 0 : index
    %c0_3 = arith.constant 0 : index
    %2 = vector.load %arg2[%c0_2, %c0_3] : memref<21x512xf32, #tpu.memory_space<vmem>>, vector<21x512xf32>
    %cst = arith.constant dense<0.000000e+00> : vector<64x512xf32>
    %3 = tpu.matmul %1, %2, %cst {dimension_numbers = #tpu.dot_dimension_numbers<[1], [0], [0], [1], [0, 0, 1, 1], [], []>} : vector<64x21xf32>, vector<21x512xf32>, vector<64x512xf32> -> vector<64x512xf32>
    %c0_4 = arith.constant 0 : index
    %c0_5 = arith.constant 0 : index
    %4 = vector.load %arg4[%c0_4, %c0_5] : memref<1x512xf32, #tpu.memory_space<vmem>>, vector<1x512xf32>
    %5 = vector.broadcast %4 : vector<1x512xf32> to vector<64x512xf32>
    %6 = arith.addf %3, %5 : vector<64x512xf32>
    %7 = vector.shape_cast %6 : vector<64x512xf32> to vector<8x8x512xf32>
    %c0_6 = arith.constant 0 : index
    %c0_7 = arith.constant 0 : index
    %c0_8 = arith.constant 0 : index
    %8 = vector.load %arg13[%c0_6, %c0_7, %c0_8] : memref<8x8x512xf32, #tpu.memory_space<vmem>>, vector<8x8x512xf32>
    tpu.vector_store %arg13[%c0_6, %c0_7, %c0_8], %7 {strides = array<i32>} : memref<8x8x512xf32, #tpu.memory_space<vmem>>, vector<8x8x512xf32>,
    %cst_9 = arith.constant 0.000000e+00 : f32
    %9 = vector.broadcast %cst_9 : f32 to vector<8x128xf32>
    %cst_10 = arith.constant 0.000000e+00 : f32
    %10 = vector.broadcast %cst_10 : f32 to vector<8x128xf32>
    %c0_11 = arith.constant 0 : index
    %c0_12 = arith.constant 0 : index
    %c0_13 = arith.constant 0 : index
    %11 = vector.load %arg13[%c0_11, %c0_12, %c0_13] : memref<8x8x512xf32, #tpu.memory_space<vmem>>, vector<1x8x512xf32>
    %12 = vector.shape_cast %11 : vector<1x8x512xf32> to vector<8x512xf32>
    %c0_14 = arith.constant 0 : index
    %c0_15 = arith.constant 0 : index
    %13 = vector.load %arg3[%c0_14, %c0_15] : memref<128x512xf32, #tpu.memory_space<vmem>>, vector<128x512xf32>
    %cst_16 = arith.constant dense<0.000000e+00> : vector<8x512xf32>
    %14 = tpu.matmul %9, %13, %cst_16 {dimension_numbers = #tpu.dot_dimension_numbers<[1], [0], [0], [1], [0, 0, 1, 1], [], []>} : vector<8x128xf32>, vector<128x512xf32>, vector<8x512xf32> -> vector<8x512xf32>
    %15 = arith.addf %12, %14 : vector<8x512xf32>
    %16 = vector.extract_strided_slice %15 {offsets = [0, 0], sizes = [8, 128], strides = [1, 1]} : vector<8x512xf32> to vector<8x128xf32>
    %cst_17 = arith.constant 5.000000e-01 : f32
    %17 = vector.broadcast %cst_17 : f32 to vector<8x128xf32>
    %18 = arith.mulf %17, %16 : vector<8x128xf32>
    %19 = math.tanh %18 : vector<8x128xf32>
    %cst_18 = arith.constant 5.000000e-01 : f32
    %20 = vector.broadcast %cst_18 : f32 to vector<8x128xf32>
    %21 = arith.mulf %20, %19 : vector<8x128xf32>
    %cst_19 = arith.constant 5.000000e-01 : f32
    %22 = vector.broadcast %cst_19 : f32 to vector<8x128xf32>
    %23 = arith.addf %21, %22 : vector<8x128xf32>
    %24 = vector.extract_strided_slice %15 {offsets = [0, 128], sizes = [8, 128], strides = [1, 1]} : vector<8x512xf32> to vector<8x128xf32>
    %cst_20 = arith.constant 5.000000e-01 : f32
    %25 = vector.broadcast %cst_20 : f32 to vector<8x128xf32>
    %26 = arith.mulf %25, %24 : vector<8x128xf32>
    %27 = math.tanh %26 : vector<8x128xf32>
    %cst_21 = arith.constant 5.000000e-01 : f32
    %28 = vector.broadcast %cst_21 : f32 to vector<8x128xf32>
    %29 = arith.mulf %28, %27 : vector<8x128xf32>
    %cst_22 = arith.constant 5.000000e-01 : f32
    %30 = vector.broadcast %cst_22 : f32 to vector<8x128xf32>
    %31 = arith.addf %29, %30 : vector<8x128xf32>
    %32 = vector.extract_strided_slice %15 {offsets = [0, 256], sizes = [8, 128], strides = [1, 1]} : vector<8x512xf32> to vector<8x128xf32>
    %33 = math.tanh %32 : vector<8x128xf32>
    %34 = vector.extract_strided_slice %15 {offsets = [0, 384], sizes = [8, 128], strides = [1, 1]} : vector<8x512xf32> to vector<8x128xf32>
    %cst_23 = arith.constant 5.000000e-01 : f32
    %35 = vector.broadcast %cst_23 : f32 to vector<8x128xf32>
    %36 = arith.mulf %35, %34 : vector<8x128xf32>
    %37 = math.tanh %36 : vector<8x128xf32>
    %cst_24 = arith.constant 5.000000e-01 : f32
    %38 = vector.broadcast %cst_24 : f32 to vector<8x128xf32>
    %39 = arith.mulf %38, %37 : vector<8x128xf32>
    %cst_25 = arith.constant 5.000000e-01 : f32
    %40 = vector.broadcast %cst_25 : f32 to vector<8x128xf32>
    %41 = arith.addf %39, %40 : vector<8x128xf32>
    %42 = arith.mulf %31, %10 : vector<8x128xf32>
    %43 = arith.mulf %23, %33 : vector<8x128xf32>
    %44 = arith.addf %42, %43 : vector<8x128xf32>
    %45 = math.tanh %44 : vector<8x128xf32>
    %46 = arith.mulf %41, %45 : vector<8x128xf32>
    %c0_26 = arith.constant 0 : index
    %c0_27 = arith.constant 0 : index
    %c0_28 = arith.constant 0 : index
    %47 = vector.load %arg14[%c0_26, %c0_27, %c0_28] : memref<8x8x128xf32, #tpu.memory_space<vmem>>, vector<1x8x128xf32>
    %48 = vector.shape_cast %47 : vector<1x8x128xf32> to vector<8x128xf32>
    %49 = vector.shape_cast %46 : vector<8x128xf32> to vector<1x8x128xf32>
    tpu.vector_store %arg14[%c0_26, %c0_27, %c0_28], %49 {strides = array<i32>} : memref<8x8x128xf32, #tpu.memory_space<vmem>>, vector<1x8x128xf32>,
    %c1 = arith.constant 1 : index
    %c0_29 = arith.constant 0 : index
    %c0_30 = arith.constant 0 : index
    %50 = vector.load %arg13[%c1, %c0_29, %c0_30] : memref<8x8x512xf32, #tpu.memory_space<vmem>>, vector<1x8x512xf32>
    %51 = vector.shape_cast %50 : vector<1x8x512xf32> to vector<8x512xf32>
    %c0_31 = arith.constant 0 : index
    %c0_32 = arith.constant 0 : index
    %52 = vector.load %arg3[%c0_31, %c0_32] : memref<128x512xf32, #tpu.memory_space<vmem>>, vector<128x512xf32>
    %cst_33 = arith.constant dense<0.000000e+00> : vector<8x512xf32>
    %53 = tpu.matmul %46, %52, %cst_33 {dimension_numbers = #tpu.dot_dimension_numbers<[1], [0], [0], [1], [0, 0, 1, 1], [], []>} : vector<8x128xf32>, vector<128x512xf32>, vector<8x512xf32> -> vector<8x512xf32>
    %54 = arith.addf %51, %53 : vector<8x512xf32>
    %55 = vector.extract_strided_slice %54 {offsets = [0, 0], sizes = [8, 128], strides = [1, 1]} : vector<8x512xf32> to vector<8x128xf32>
    %cst_34 = arith.constant 5.000000e-01 : f32
    %56 = vector.broadcast %cst_34 : f32 to vector<8x128xf32>
    %57 = arith.mulf %56, %55 : vector<8x128xf32>
    %58 = math.tanh %57 : vector<8x128xf32>
    %cst_35 = arith.constant 5.000000e-01 : f32
    %59 = vector.broadcast %cst_35 : f32 to vector<8x128xf32>
    %60 = arith.mulf %59, %58 : vector<8x128xf32>
    %cst_36 = arith.constant 5.000000e-01 : f32
    %61 = vector.broadcast %cst_36 : f32 to vector<8x128xf32>
    %62 = arith.addf %60, %61 : vector<8x128xf32>
    %63 = vector.extract_strided_slice %54 {offsets = [0, 128], sizes = [8, 128], strides = [1, 1]} : vector<8x512xf32> to vector<8x128xf32>
    %cst_37 = arith.constant 5.000000e-01 : f32
    %64 = vector.broadcast %cst_37 : f32 to vector<8x128xf32>
    %65 = arith.mulf %64, %63 : vector<8x128xf32>
    %66 = math.tanh %65 : vector<8x128xf32>
    %cst_38 = arith.constant 5.000000e-01 : f32
    %67 = vector.broadcast %cst_38 : f32 to vector<8x128xf32>
    %68 = arith.mulf %67, %66 : vector<8x128xf32>
    %cst_39 = arith.constant 5.000000e-01 : f32
    %69 = vector.broadcast %cst_39 : f32 to vector<8x128xf32>
    %70 = arith.addf %68, %69 : vector<8x128xf32>
    %71 = vector.extract_strided_slice %54 {offsets = [0, 256], sizes = [8, 128], strides = [1, 1]} : vector<8x512xf32> to vector<8x128xf32>
    %72 = math.tanh %71 : vector<8x128xf32>
    %73 = vector.extract_strided_slice %54 {offsets = [0, 384], sizes = [8, 128], strides = [1, 1]} : vector<8x512xf32> to vector<8x128xf32>
    %cst_40 = arith.constant 5.000000e-01 : f32
    %74 = vector.broadcast %cst_40 : f32 to vector<8x128xf32>
    %75 = arith.mulf %74, %73 : vector<8x128xf32>
    %76 = math.tanh %75 : vector<8x128xf32>
    %cst_41 = arith.constant 5.000000e-01 : f32
    %77 = vector.broadcast %cst_41 : f32 to vector<8x128xf32>
    %78 = arith.mulf %77, %76 : vector<8x128xf32>
    %cst_42 = arith.constant 5.000000e-01 : f32
    %79 = vector.broadcast %cst_42 : f32 to vector<8x128xf32>
    %80 = arith.addf %78, %79 : vector<8x128xf32>
    %81 = arith.mulf %70, %44 : vector<8x128xf32>
    %82 = arith.mulf %62, %72 : vector<8x128xf32>
    %83 = arith.addf %81, %82 : vector<8x128xf32>
    %84 = math.tanh %83 : vector<8x128xf32>
    %85 = arith.mulf %80, %84 : vector<8x128xf32>
    %c1_43 = arith.constant 1 : index
    %c0_44 = arith.constant 0 : index
    %c0_45 = arith.constant 0 : index
    %86 = vector.load %arg14[%c1_43, %c0_44, %c0_45] : memref<8x8x128xf32, #tpu.memory_space<vmem>>, vector<1x8x128xf32>
    %87 = vector.shape_cast %86 : vector<1x8x128xf32> to vector<8x128xf32>
    %88 = vector.shape_cast %85 : vector<8x128xf32> to vector<1x8x128xf32>
    tpu.vector_store %arg14[%c1_43, %c0_44, %c0_45], %88 {strides = array<i32>} : memref<8x8x128xf32, #tpu.memory_space<vmem>>, vector<1x8x128xf32>,
    %c2 = arith.constant 2 : index
    %c0_46 = arith.constant 0 : index
    %c0_47 = arith.constant 0 : index
    %89 = vector.load %arg13[%c2, %c0_46, %c0_47] : memref<8x8x512xf32, #tpu.memory_space<vmem>>, vector<1x8x512xf32>
    %90 = vector.shape_cast %89 : vector<1x8x512xf32> to vector<8x512xf32>
    %c0_48 = arith.constant 0 : index
    %c0_49 = arith.constant 0 : index
    %91 = vector.load %arg3[%c0_48, %c0_49] : memref<128x512xf32, #tpu.memory_space<vmem>>, vector<128x512xf32>
    %cst_50 = arith.constant dense<0.000000e+00> : vector<8x512xf32>
    %92 = tpu.matmul %85, %91, %cst_50 {dimension_numbers = #tpu.dot_dimension_numbers<[1], [0], [0], [1], [0, 0, 1, 1], [], []>} : vector<8x128xf32>, vector<128x512xf32>, vector<8x512xf32> -> vector<8x512xf32>
    %93 = arith.addf %90, %92 : vector<8x512xf32>
    %94 = vector.extract_strided_slice %93 {offsets = [0, 0], sizes = [8, 128], strides = [1, 1]} : vector<8x512xf32> to vector<8x128xf32>
    %cst_51 = arith.constant 5.000000e-01 : f32
    %95 = vector.broadcast %cst_51 : f32 to vector<8x128xf32>
    %96 = arith.mulf %95, %94 : vector<8x128xf32>
    %97 = math.tanh %96 : vector<8x128xf32>
    %cst_52 = arith.constant 5.000000e-01 : f32
    %98 = vector.broadcast %cst_52 : f32 to vector<8x128xf32>
    %99 = arith.mulf %98, %97 : vector<8x128xf32>
    %cst_53 = arith.constant 5.000000e-01 : f32
    %100 = vector.broadcast %cst_53 : f32 to vector<8x128xf32>
    %101 = arith.addf %99, %100 : vector<8x128xf32>
    %102 = vector.extract_strided_slice %93 {offsets = [0, 128], sizes = [8, 128], strides = [1, 1]} : vector<8x512xf32> to vector<8x128xf32>
    %cst_54 = arith.constant 5.000000e-01 : f32
    %103 = vector.broadcast %cst_54 : f32 to vector<8x128xf32>
    %104 = arith.mulf %103, %102 : vector<8x128xf32>
    %105 = math.tanh %104 : vector<8x128xf32>
    %cst_55 = arith.constant 5.000000e-01 : f32
    %106 = vector.broadcast %cst_55 : f32 to vector<8x128xf32>
    %107 = arith.mulf %106, %105 : vector<8x128xf32>
    %cst_56 = arith.constant 5.000000e-01 : f32
    %108 = vector.broadcast %cst_56 : f32 to vector<8x128xf32>
    %109 = arith.addf %107, %108 : vector<8x128xf32>
    %110 = vector.extract_strided_slice %93 {offsets = [0, 256], sizes = [8, 128], strides = [1, 1]} : vector<8x512xf32> to vector<8x128xf32>
    %111 = math.tanh %110 : vector<8x128xf32>
    %112 = vector.extract_strided_slice %93 {offsets = [0, 384], sizes = [8, 128], strides = [1, 1]} : vector<8x512xf32> to vector<8x128xf32>
    %cst_57 = arith.constant 5.000000e-01 : f32
    %113 = vector.broadcast %cst_57 : f32 to vector<8x128xf32>
    %114 = arith.mulf %113, %112 : vector<8x128xf32>
    %115 = math.tanh %114 : vector<8x128xf32>
    %cst_58 = arith.constant 5.000000e-01 : f32
    %116 = vector.broadcast %cst_58 : f32 to vector<8x128xf32>
    %117 = arith.mulf %116, %115 : vector<8x128xf32>
    %cst_59 = arith.constant 5.000000e-01 : f32
    %118 = vector.broadcast %cst_59 : f32 to vector<8x128xf32>
    %119 = arith.addf %117, %118 : vector<8x128xf32>
    %120 = arith.mulf %109, %83 : vector<8x128xf32>
    %121 = arith.mulf %101, %111 : vector<8x128xf32>
    %122 = arith.addf %120, %121 : vector<8x128xf32>
    %123 = math.tanh %122 : vector<8x128xf32>
    %124 = arith.mulf %119, %123 : vector<8x128xf32>
    %c2_60 = arith.constant 2 : index
    %c0_61 = arith.constant 0 : index
    %c0_62 = arith.constant 0 : index
    %125 = vector.load %arg14[%c2_60, %c0_61, %c0_62] : memref<8x8x128xf32, #tpu.memory_space<vmem>>, vector<1x8x128xf32>
    %126 = vector.shape_cast %125 : vector<1x8x128xf32> to vector<8x128xf32>
    %127 = vector.shape_cast %124 : vector<8x128xf32> to vector<1x8x128xf32>
    tpu.vector_store %arg14[%c2_60, %c0_61, %c0_62], %127 {strides = array<i32>} : memref<8x8x128xf32, #tpu.memory_space<vmem>>, vector<1x8x128xf32>,
    %c3 = arith.constant 3 : index
    %c0_63 = arith.constant 0 : index
    %c0_64 = arith.constant 0 : index
    %128 = vector.load %arg13[%c3, %c0_63, %c0_64] : memref<8x8x512xf32, #tpu.memory_space<vmem>>, vector<1x8x512xf32>
    %129 = vector.shape_cast %128 : vector<1x8x512xf32> to vector<8x512xf32>
    %c0_65 = arith.constant 0 : index
    %c0_66 = arith.constant 0 : index
    %130 = vector.load %arg3[%c0_65, %c0_66] : memref<128x512xf32, #tpu.memory_space<vmem>>, vector<128x512xf32>
    %cst_67 = arith.constant dense<0.000000e+00> : vector<8x512xf32>
    %131 = tpu.matmul %124, %130, %cst_67 {dimension_numbers = #tpu.dot_dimension_numbers<[1], [0], [0], [1], [0, 0, 1, 1], [], []>} : vector<8x128xf32>, vector<128x512xf32>, vector<8x512xf32> -> vector<8x512xf32>
    %132 = arith.addf %129, %131 : vector<8x512xf32>
    %133 = vector.extract_strided_slice %132 {offsets = [0, 0], sizes = [8, 128], strides = [1, 1]} : vector<8x512xf32> to vector<8x128xf32>
    %cst_68 = arith.constant 5.000000e-01 : f32
    %134 = vector.broadcast %cst_68 : f32 to vector<8x128xf32>
    %135 = arith.mulf %134, %133 : vector<8x128xf32>
    %136 = math.tanh %135 : vector<8x128xf32>
    %cst_69 = arith.constant 5.000000e-01 : f32
    %137 = vector.broadcast %cst_69 : f32 to vector<8x128xf32>
    %138 = arith.mulf %137, %136 : vector<8x128xf32>
    %cst_70 = arith.constant 5.000000e-01 : f32
    %139 = vector.broadcast %cst_70 : f32 to vector<8x128xf32>
    %140 = arith.addf %138, %139 : vector<8x128xf32>
    %141 = vector.extract_strided_slice %132 {offsets = [0, 128], sizes = [8, 128], strides = [1, 1]} : vector<8x512xf32> to vector<8x128xf32>
    %cst_71 = arith.constant 5.000000e-01 : f32
    %142 = vector.broadcast %cst_71 : f32 to vector<8x128xf32>
    %143 = arith.mulf %142, %141 : vector<8x128xf32>
    %144 = math.tanh %143 : vector<8x128xf32>
    %cst_72 = arith.constant 5.000000e-01 : f32
    %145 = vector.broadcast %cst_72 : f32 to vector<8x128xf32>
    %146 = arith.mulf %145, %144 : vector<8x128xf32>
    %cst_73 = arith.constant 5.000000e-01 : f32
    %147 = vector.broadcast %cst_73 : f32 to vector<8x128xf32>
    %148 = arith.addf %146, %147 : vector<8x128xf32>
    %149 = vector.extract_strided_slice %132 {offsets = [0, 256], sizes = [8, 128], strides = [1, 1]} : vector<8x512xf32> to vector<8x128xf32>
    %150 = math.tanh %149 : vector<8x128xf32>
    %151 = vector.extract_strided_slice %132 {offsets = [0, 384], sizes = [8, 128], strides = [1, 1]} : vector<8x512xf32> to vector<8x128xf32>
    %cst_74 = arith.constant 5.000000e-01 : f32
    %152 = vector.broadcast %cst_74 : f32 to vector<8x128xf32>
    %153 = arith.mulf %152, %151 : vector<8x128xf32>
    %154 = math.tanh %153 : vector<8x128xf32>
    %cst_75 = arith.constant 5.000000e-01 : f32
    %155 = vector.broadcast %cst_75 : f32 to vector<8x128xf32>
    %156 = arith.mulf %155, %154 : vector<8x128xf32>
    %cst_76 = arith.constant 5.000000e-01 : f32
    %157 = vector.broadcast %cst_76 : f32 to vector<8x128xf32>
    %158 = arith.addf %156, %157 : vector<8x128xf32>
    %159 = arith.mulf %148, %122 : vector<8x128xf32>
    %160 = arith.mulf %140, %150 : vector<8x128xf32>
    %161 = arith.addf %159, %160 : vector<8x128xf32>
    %162 = math.tanh %161 : vector<8x128xf32>
    %163 = arith.mulf %158, %162 : vector<8x128xf32>
    %c3_77 = arith.constant 3 : index
    %c0_78 = arith.constant 0 : index
    %c0_79 = arith.constant 0 : index
    %164 = vector.load %arg14[%c3_77, %c0_78, %c0_79] : memref<8x8x128xf32, #tpu.memory_space<vmem>>, vector<1x8x128xf32>
    %165 = vector.shape_cast %164 : vector<1x8x128xf32> to vector<8x128xf32>
    %166 = vector.shape_cast %163 : vector<8x128xf32> to vector<1x8x128xf32>
    tpu.vector_store %arg14[%c3_77, %c0_78, %c0_79], %166 {strides = array<i32>} : memref<8x8x128xf32, #tpu.memory_space<vmem>>, vector<1x8x128xf32>,
    %c4 = arith.constant 4 : index
    %c0_80 = arith.constant 0 : index
    %c0_81 = arith.constant 0 : index
    %167 = vector.load %arg13[%c4, %c0_80, %c0_81] : memref<8x8x512xf32, #tpu.memory_space<vmem>>, vector<1x8x512xf32>
    %168 = vector.shape_cast %167 : vector<1x8x512xf32> to vector<8x512xf32>
    %c0_82 = arith.constant 0 : index
    %c0_83 = arith.constant 0 : index
    %169 = vector.load %arg3[%c0_82, %c0_83] : memref<128x512xf32, #tpu.memory_space<vmem>>, vector<128x512xf32>
    %cst_84 = arith.constant dense<0.000000e+00> : vector<8x512xf32>
    %170 = tpu.matmul %163, %169, %cst_84 {dimension_numbers = #tpu.dot_dimension_numbers<[1], [0], [0], [1], [0, 0, 1, 1], [], []>} : vector<8x128xf32>, vector<128x512xf32>, vector<8x512xf32> -> vector<8x512xf32>
    %171 = arith.addf %168, %170 : vector<8x512xf32>
    %172 = vector.extract_strided_slice %171 {offsets = [0, 0], sizes = [8, 128], strides = [1, 1]} : vector<8x512xf32> to vector<8x128xf32>
    %cst_85 = arith.constant 5.000000e-01 : f32
    %173 = vector.broadcast %cst_85 : f32 to vector<8x128xf32>
    %174 = arith.mulf %173, %172 : vector<8x128xf32>
    %175 = math.tanh %174 : vector<8x128xf32>
    %cst_86 = arith.constant 5.000000e-01 : f32
    %176 = vector.broadcast %cst_86 : f32 to vector<8x128xf32>
    %177 = arith.mulf %176, %175 : vector<8x128xf32>
    %cst_87 = arith.constant 5.000000e-01 : f32
    %178 = vector.broadcast %cst_87 : f32 to vector<8x128xf32>
    %179 = arith.addf %177, %178 : vector<8x128xf32>
    %180 = vector.extract_strided_slice %171 {offsets = [0, 128], sizes = [8, 128], strides = [1, 1]} : vector<8x512xf32> to vector<8x128xf32>
    %cst_88 = arith.constant 5.000000e-01 : f32
    %181 = vector.broadcast %cst_88 : f32 to vector<8x128xf32>
    %182 = arith.mulf %181, %180 : vector<8x128xf32>
    %183 = math.tanh %182 : vector<8x128xf32>
    %cst_89 = arith.constant 5.000000e-01 : f32
    %184 = vector.broadcast %cst_89 : f32 to vector<8x128xf32>
    %185 = arith.mulf %184, %183 : vector<8x128xf32>
    %cst_90 = arith.constant 5.000000e-01 : f32
    %186 = vector.broadcast %cst_90 : f32 to vector<8x128xf32>
    %187 = arith.addf %185, %186 : vector<8x128xf32>
    %188 = vector.extract_strided_slice %171 {offsets = [0, 256], sizes = [8, 128], strides = [1, 1]} : vector<8x512xf32> to vector<8x128xf32>
    %189 = math.tanh %188 : vector<8x128xf32>
    %190 = vector.extract_strided_slice %171 {offsets = [0, 384], sizes = [8, 128], strides = [1, 1]} : vector<8x512xf32> to vector<8x128xf32>
    %cst_91 = arith.constant 5.000000e-01 : f32
    %191 = vector.broadcast %cst_91 : f32 to vector<8x128xf32>
    %192 = arith.mulf %191, %190 : vector<8x128xf32>
    %193 = math.tanh %192 : vector<8x128xf32>
    %cst_92 = arith.constant 5.000000e-01 : f32
    %194 = vector.broadcast %cst_92 : f32 to vector<8x128xf32>
    %195 = arith.mulf %194, %193 : vector<8x128xf32>
    %cst_93 = arith.constant 5.000000e-01 : f32
    %196 = vector.broadcast %cst_93 : f32 to vector<8x128xf32>
    %197 = arith.addf %195, %196 : vector<8x128xf32>
    %198 = arith.mulf %187, %161 : vector<8x128xf32>
    %199 = arith.mulf %179, %189 : vector<8x128xf32>
    %200 = arith.addf %198, %199 : vector<8x128xf32>
    %201 = math.tanh %200 : vector<8x128xf32>
    %202 = arith.mulf %197, %201 : vector<8x128xf32>
    %c4_94 = arith.constant 4 : index
    %c0_95 = arith.constant 0 : index
    %c0_96 = arith.constant 0 : index
    %203 = vector.load %arg14[%c4_94, %c0_95, %c0_96] : memref<8x8x128xf32, #tpu.memory_space<vmem>>, vector<1x8x128xf32>
    %204 = vector.shape_cast %203 : vector<1x8x128xf32> to vector<8x128xf32>
    %205 = vector.shape_cast %202 : vector<8x128xf32> to vector<1x8x128xf32>
    tpu.vector_store %arg14[%c4_94, %c0_95, %c0_96], %205 {strides = array<i32>} : memref<8x8x128xf32, #tpu.memory_space<vmem>>, vector<1x8x128xf32>,
    %c5 = arith.constant 5 : index
    %c0_97 = arith.constant 0 : index
    %c0_98 = arith.constant 0 : index
    %206 = vector.load %arg13[%c5, %c0_97, %c0_98] : memref<8x8x512xf32, #tpu.memory_space<vmem>>, vector<1x8x512xf32>
    %207 = vector.shape_cast %206 : vector<1x8x512xf32> to vector<8x512xf32>
    %c0_99 = arith.constant 0 : index
    %c0_100 = arith.constant 0 : index
    %208 = vector.load %arg3[%c0_99, %c0_100] : memref<128x512xf32, #tpu.memory_space<vmem>>, vector<128x512xf32>
    %cst_101 = arith.constant dense<0.000000e+00> : vector<8x512xf32>
    %209 = tpu.matmul %202, %208, %cst_101 {dimension_numbers = #tpu.dot_dimension_numbers<[1], [0], [0], [1], [0, 0, 1, 1], [], []>} : vector<8x128xf32>, vector<128x512xf32>, vector<8x512xf32> -> vector<8x512xf32>
    %210 = arith.addf %207, %209 : vector<8x512xf32>
    %211 = vector.extract_strided_slice %210 {offsets = [0, 0], sizes = [8, 128], strides = [1, 1]} : vector<8x512xf32> to vector<8x128xf32>
    %cst_102 = arith.constant 5.000000e-01 : f32
    %212 = vector.broadcast %cst_102 : f32 to vector<8x128xf32>
    %213 = arith.mulf %212, %211 : vector<8x128xf32>
    %214 = math.tanh %213 : vector<8x128xf32>
    %cst_103 = arith.constant 5.000000e-01 : f32
    %215 = vector.broadcast %cst_103 : f32 to vector<8x128xf32>
    %216 = arith.mulf %215, %214 : vector<8x128xf32>
    %cst_104 = arith.constant 5.000000e-01 : f32
    %217 = vector.broadcast %cst_104 : f32 to vector<8x128xf32>
    %218 = arith.addf %216, %217 : vector<8x128xf32>
    %219 = vector.extract_strided_slice %210 {offsets = [0, 128], sizes = [8, 128], strides = [1, 1]} : vector<8x512xf32> to vector<8x128xf32>
    %cst_105 = arith.constant 5.000000e-01 : f32
    %220 = vector.broadcast %cst_105 : f32 to vector<8x128xf32>
    %221 = arith.mulf %220, %219 : vector<8x128xf32>
    %222 = math.tanh %221 : vector<8x128xf32>
    %cst_106 = arith.constant 5.000000e-01 : f32
    %223 = vector.broadcast %cst_106 : f32 to vector<8x128xf32>
    %224 = arith.mulf %223, %222 : vector<8x128xf32>
    %cst_107 = arith.constant 5.000000e-01 : f32
    %225 = vector.broadcast %cst_107 : f32 to vector<8x128xf32>
    %226 = arith.addf %224, %225 : vector<8x128xf32>
    %227 = vector.extract_strided_slice %210 {offsets = [0, 256], sizes = [8, 128], strides = [1, 1]} : vector<8x512xf32> to vector<8x128xf32>
    %228 = math.tanh %227 : vector<8x128xf32>
    %229 = vector.extract_strided_slice %210 {offsets = [0, 384], sizes = [8, 128], strides = [1, 1]} : vector<8x512xf32> to vector<8x128xf32>
    %cst_108 = arith.constant 5.000000e-01 : f32
    %230 = vector.broadcast %cst_108 : f32 to vector<8x128xf32>
    %231 = arith.mulf %230, %229 : vector<8x128xf32>
    %232 = math.tanh %231 : vector<8x128xf32>
    %cst_109 = arith.constant 5.000000e-01 : f32
    %233 = vector.broadcast %cst_109 : f32 to vector<8x128xf32>
    %234 = arith.mulf %233, %232 : vector<8x128xf32>
    %cst_110 = arith.constant 5.000000e-01 : f32
    %235 = vector.broadcast %cst_110 : f32 to vector<8x128xf32>
    %236 = arith.addf %234, %235 : vector<8x128xf32>
    %237 = arith.mulf %226, %200 : vector<8x128xf32>
    %238 = arith.mulf %218, %228 : vector<8x128xf32>
    %239 = arith.addf %237, %238 : vector<8x128xf32>
    %240 = math.tanh %239 : vector<8x128xf32>
    %241 = arith.mulf %236, %240 : vector<8x128xf32>
    %c5_111 = arith.constant 5 : index
    %c0_112 = arith.constant 0 : index
    %c0_113 = arith.constant 0 : index
    %242 = vector.load %arg14[%c5_111, %c0_112, %c0_113] : memref<8x8x128xf32, #tpu.memory_space<vmem>>, vector<1x8x128xf32>
    %243 = vector.shape_cast %242 : vector<1x8x128xf32> to vector<8x128xf32>
    %244 = vector.shape_cast %241 : vector<8x128xf32> to vector<1x8x128xf32>
    tpu.vector_store %arg14[%c5_111, %c0_112, %c0_113], %244 {strides = array<i32>} : memref<8x8x128xf32, #tpu.memory_space<vmem>>, vector<1x8x128xf32>,
    %c6 = arith.constant 6 : index
    %c0_114 = arith.constant 0 : index
    %c0_115 = arith.constant 0 : index
    %245 = vector.load %arg13[%c6, %c0_114, %c0_115] : memref<8x8x512xf32, #tpu.memory_space<vmem>>, vector<1x8x512xf32>
    %246 = vector.shape_cast %245 : vector<1x8x512xf32> to vector<8x512xf32>
    %c0_116 = arith.constant 0 : index
    %c0_117 = arith.constant 0 : index
    %247 = vector.load %arg3[%c0_116, %c0_117] : memref<128x512xf32, #tpu.memory_space<vmem>>, vector<128x512xf32>
    %cst_118 = arith.constant dense<0.000000e+00> : vector<8x512xf32>
    %248 = tpu.matmul %241, %247, %cst_118 {dimension_numbers = #tpu.dot_dimension_numbers<[1], [0], [0], [1], [0, 0, 1, 1], [], []>} : vector<8x128xf32>, vector<128x512xf32>, vector<8x512xf32> -> vector<8x512xf32>
    %249 = arith.addf %246, %248 : vector<8x512xf32>
    %250 = vector.extract_strided_slice %249 {offsets = [0, 0], sizes = [8, 128], strides = [1, 1]} : vector<8x512xf32> to vector<8x128xf32>
    %cst_119 = arith.constant 5.000000e-01 : f32
    %251 = vector.broadcast %cst_119 : f32 to vector<8x128xf32>
    %252 = arith.mulf %251, %250 : vector<8x128xf32>
    %253 = math.tanh %252 : vector<8x128xf32>
    %cst_120 = arith.constant 5.000000e-01 : f32
    %254 = vector.broadcast %cst_120 : f32 to vector<8x128xf32>
    %255 = arith.mulf %254, %253 : vector<8x128xf32>
    %cst_121 = arith.constant 5.000000e-01 : f32
    %256 = vector.broadcast %cst_121 : f32 to vector<8x128xf32>
    %257 = arith.addf %255, %256 : vector<8x128xf32>
    %258 = vector.extract_strided_slice %249 {offsets = [0, 128], sizes = [8, 128], strides = [1, 1]} : vector<8x512xf32> to vector<8x128xf32>
    %cst_122 = arith.constant 5.000000e-01 : f32
    %259 = vector.broadcast %cst_122 : f32 to vector<8x128xf32>
    %260 = arith.mulf %259, %258 : vector<8x128xf32>
    %261 = math.tanh %260 : vector<8x128xf32>
    %cst_123 = arith.constant 5.000000e-01 : f32
    %262 = vector.broadcast %cst_123 : f32 to vector<8x128xf32>
    %263 = arith.mulf %262, %261 : vector<8x128xf32>
    %cst_124 = arith.constant 5.000000e-01 : f32
    %264 = vector.broadcast %cst_124 : f32 to vector<8x128xf32>
    %265 = arith.addf %263, %264 : vector<8x128xf32>
    %266 = vector.extract_strided_slice %249 {offsets = [0, 256], sizes = [8, 128], strides = [1, 1]} : vector<8x512xf32> to vector<8x128xf32>
    %267 = math.tanh %266 : vector<8x128xf32>
    %268 = vector.extract_strided_slice %249 {offsets = [0, 384], sizes = [8, 128], strides = [1, 1]} : vector<8x512xf32> to vector<8x128xf32>
    %cst_125 = arith.constant 5.000000e-01 : f32
    %269 = vector.broadcast %cst_125 : f32 to vector<8x128xf32>
    %270 = arith.mulf %269, %268 : vector<8x128xf32>
    %271 = math.tanh %270 : vector<8x128xf32>
    %cst_126 = arith.constant 5.000000e-01 : f32
    %272 = vector.broadcast %cst_126 : f32 to vector<8x128xf32>
    %273 = arith.mulf %272, %271 : vector<8x128xf32>
    %cst_127 = arith.constant 5.000000e-01 : f32
    %274 = vector.broadcast %cst_127 : f32 to vector<8x128xf32>
    %275 = arith.addf %273, %274 : vector<8x128xf32>
    %276 = arith.mulf %265, %239 : vector<8x128xf32>
    %277 = arith.mulf %257, %267 : vector<8x128xf32>
    %278 = arith.addf %276, %277 : vector<8x128xf32>
    %279 = math.tanh %278 : vector<8x128xf32>
    %280 = arith.mulf %275, %279 : vector<8x128xf32>
    %c6_128 = arith.constant 6 : index
    %c0_129 = arith.constant 0 : index
    %c0_130 = arith.constant 0 : index
    %281 = vector.load %arg14[%c6_128, %c0_129, %c0_130] : memref<8x8x128xf32, #tpu.memory_space<vmem>>, vector<1x8x128xf32>
    %282 = vector.shape_cast %281 : vector<1x8x128xf32> to vector<8x128xf32>
    %283 = vector.shape_cast %280 : vector<8x128xf32> to vector<1x8x128xf32>
    tpu.vector_store %arg14[%c6_128, %c0_129, %c0_130], %283 {strides = array<i32>} : memref<8x8x128xf32, #tpu.memory_space<vmem>>, vector<1x8x128xf32>,
    %c7 = arith.constant 7 : index
    %c0_131 = arith.constant 0 : index
    %c0_132 = arith.constant 0 : index
    %284 = vector.load %arg13[%c7, %c0_131, %c0_132] : memref<8x8x512xf32, #tpu.memory_space<vmem>>, vector<1x8x512xf32>
    %285 = vector.shape_cast %284 : vector<1x8x512xf32> to vector<8x512xf32>
    %c0_133 = arith.constant 0 : index
    %c0_134 = arith.constant 0 : index
    %286 = vector.load %arg3[%c0_133, %c0_134] : memref<128x512xf32, #tpu.memory_space<vmem>>, vector<128x512xf32>
    %cst_135 = arith.constant dense<0.000000e+00> : vector<8x512xf32>
    %287 = tpu.matmul %280, %286, %cst_135 {dimension_numbers = #tpu.dot_dimension_numbers<[1], [0], [0], [1], [0, 0, 1, 1], [], []>} : vector<8x128xf32>, vector<128x512xf32>, vector<8x512xf32> -> vector<8x512xf32>
    %288 = arith.addf %285, %287 : vector<8x512xf32>
    %289 = vector.extract_strided_slice %288 {offsets = [0, 0], sizes = [8, 128], strides = [1, 1]} : vector<8x512xf32> to vector<8x128xf32>
    %cst_136 = arith.constant 5.000000e-01 : f32
    %290 = vector.broadcast %cst_136 : f32 to vector<8x128xf32>
    %291 = arith.mulf %290, %289 : vector<8x128xf32>
    %292 = math.tanh %291 : vector<8x128xf32>
    %cst_137 = arith.constant 5.000000e-01 : f32
    %293 = vector.broadcast %cst_137 : f32 to vector<8x128xf32>
    %294 = arith.mulf %293, %292 : vector<8x128xf32>
    %cst_138 = arith.constant 5.000000e-01 : f32
    %295 = vector.broadcast %cst_138 : f32 to vector<8x128xf32>
    %296 = arith.addf %294, %295 : vector<8x128xf32>
    %297 = vector.extract_strided_slice %288 {offsets = [0, 128], sizes = [8, 128], strides = [1, 1]} : vector<8x512xf32> to vector<8x128xf32>
    %cst_139 = arith.constant 5.000000e-01 : f32
    %298 = vector.broadcast %cst_139 : f32 to vector<8x128xf32>
    %299 = arith.mulf %298, %297 : vector<8x128xf32>
    %300 = math.tanh %299 : vector<8x128xf32>
    %cst_140 = arith.constant 5.000000e-01 : f32
    %301 = vector.broadcast %cst_140 : f32 to vector<8x128xf32>
    %302 = arith.mulf %301, %300 : vector<8x128xf32>
    %cst_141 = arith.constant 5.000000e-01 : f32
    %303 = vector.broadcast %cst_141 : f32 to vector<8x128xf32>
    %304 = arith.addf %302, %303 : vector<8x128xf32>
    %305 = vector.extract_strided_slice %288 {offsets = [0, 256], sizes = [8, 128], strides = [1, 1]} : vector<8x512xf32> to vector<8x128xf32>
    %306 = math.tanh %305 : vector<8x128xf32>
    %307 = vector.extract_strided_slice %288 {offsets = [0, 384], sizes = [8, 128], strides = [1, 1]} : vector<8x512xf32> to vector<8x128xf32>
    %cst_142 = arith.constant 5.000000e-01 : f32
    %308 = vector.broadcast %cst_142 : f32 to vector<8x128xf32>
    %309 = arith.mulf %308, %307 : vector<8x128xf32>
    %310 = math.tanh %309 : vector<8x128xf32>
    %cst_143 = arith.constant 5.000000e-01 : f32
    %311 = vector.broadcast %cst_143 : f32 to vector<8x128xf32>
    %312 = arith.mulf %311, %310 : vector<8x128xf32>
    %cst_144 = arith.constant 5.000000e-01 : f32
    %313 = vector.broadcast %cst_144 : f32 to vector<8x128xf32>
    %314 = arith.addf %312, %313 : vector<8x128xf32>
    %315 = arith.mulf %304, %278 : vector<8x128xf32>
    %316 = arith.mulf %296, %306 : vector<8x128xf32>
    %317 = arith.addf %315, %316 : vector<8x128xf32>
    %318 = math.tanh %317 : vector<8x128xf32>
    %319 = arith.mulf %314, %318 : vector<8x128xf32>
    %c7_145 = arith.constant 7 : index
    %c0_146 = arith.constant 0 : index
    %c0_147 = arith.constant 0 : index
    %320 = vector.load %arg14[%c7_145, %c0_146, %c0_147] : memref<8x8x128xf32, #tpu.memory_space<vmem>>, vector<1x8x128xf32>
    %321 = vector.shape_cast %320 : vector<1x8x128xf32> to vector<8x128xf32>
    %322 = vector.shape_cast %319 : vector<8x128xf32> to vector<1x8x128xf32>
    tpu.vector_store %arg14[%c7_145, %c0_146, %c0_147], %322 {strides = array<i32>} : memref<8x8x128xf32, #tpu.memory_space<vmem>>, vector<1x8x128xf32>,
    %c0_148 = arith.constant 0 : index
    %c0_149 = arith.constant 0 : index
    %c0_150 = arith.constant 0 : index
    %323 = vector.load %arg14[%c0_148, %c0_149, %c0_150] : memref<8x8x128xf32, #tpu.memory_space<vmem>>, vector<8x8x128xf32>
    %324 = vector.shape_cast %323 : vector<8x8x128xf32> to vector<64x128xf32>
    %c0_151 = arith.constant 0 : index
    %c0_152 = arith.constant 0 : index
    %325 = vector.load %arg5[%c0_151, %c0_152] : memref<128x512xf32, #tpu.memory_space<vmem>>, vector<128x512xf32>
    %cst_153 = arith.constant dense<0.000000e+00> : vector<64x512xf32>
    %326 = tpu.matmul %324, %325, %cst_153 {dimension_numbers = #tpu.dot_dimension_numbers<[1], [0], [0], [1], [0, 0, 1, 1], [], []>} : vector<64x128xf32>, vector<128x512xf32>, vector<64x512xf32> -> vector<64x512xf32>
    %c0_154 = arith.constant 0 : index
    %c0_155 = arith.constant 0 : index
    %327 = vector.load %arg7[%c0_154, %c0_155] : memref<1x512xf32, #tpu.memory_space<vmem>>, vector<1x512xf32>
    %328 = vector.broadcast %327 : vector<1x512xf32> to vector<64x512xf32>
    %329 = arith.addf %326, %328 : vector<64x512xf32>
    %330 = vector.shape_cast %329 : vector<64x512xf32> to vector<8x8x512xf32>
    %c0_156 = arith.constant 0 : index
    %c0_157 = arith.constant 0 : index
    %c0_158 = arith.constant 0 : index
    %331 = vector.load %arg13[%c0_156, %c0_157, %c0_158] : memref<8x8x512xf32, #tpu.memory_space<vmem>>, vector<8x8x512xf32>
    tpu.vector_store %arg13[%c0_156, %c0_157, %c0_158], %330 {strides = array<i32>} : memref<8x8x512xf32, #tpu.memory_space<vmem>>, vector<8x8x512xf32>,
    %cst_159 = arith.constant 0.000000e+00 : f32
    %332 = vector.broadcast %cst_159 : f32 to vector<8x128xf32>
    %cst_160 = arith.constant 0.000000e+00 : f32
    %333 = vector.broadcast %cst_160 : f32 to vector<8x128xf32>
    %c0_161 = arith.constant 0 : index
    %c0_162 = arith.constant 0 : index
    %c0_163 = arith.constant 0 : index
    %334 = vector.load %arg13[%c0_161, %c0_162, %c0_163] : memref<8x8x512xf32, #tpu.memory_space<vmem>>, vector<1x8x512xf32>
    %335 = vector.shape_cast %334 : vector<1x8x512xf32> to vector<8x512xf32>
    %c0_164 = arith.constant 0 : index
    %c0_165 = arith.constant 0 : index
    %336 = vector.load %arg6[%c0_164, %c0_165] : memref<128x512xf32, #tpu.memory_space<vmem>>, vector<128x512xf32>
    %cst_166 = arith.constant dense<0.000000e+00> : vector<8x512xf32>
    %337 = tpu.matmul %332, %336, %cst_166 {dimension_numbers = #tpu.dot_dimension_numbers<[1], [0], [0], [1], [0, 0, 1, 1], [], []>} : vector<8x128xf32>, vector<128x512xf32>, vector<8x512xf32> -> vector<8x512xf32>
    %338 = arith.addf %335, %337 : vector<8x512xf32>
    %339 = vector.extract_strided_slice %338 {offsets = [0, 0], sizes = [8, 128], strides = [1, 1]} : vector<8x512xf32> to vector<8x128xf32>
    %cst_167 = arith.constant 5.000000e-01 : f32
    %340 = vector.broadcast %cst_167 : f32 to vector<8x128xf32>
    %341 = arith.mulf %340, %339 : vector<8x128xf32>
    %342 = math.tanh %341 : vector<8x128xf32>
    %cst_168 = arith.constant 5.000000e-01 : f32
    %343 = vector.broadcast %cst_168 : f32 to vector<8x128xf32>
    %344 = arith.mulf %343, %342 : vector<8x128xf32>
    %cst_169 = arith.constant 5.000000e-01 : f32
    %345 = vector.broadcast %cst_169 : f32 to vector<8x128xf32>
    %346 = arith.addf %344, %345 : vector<8x128xf32>
    %347 = vector.extract_strided_slice %338 {offsets = [0, 128], sizes = [8, 128], strides = [1, 1]} : vector<8x512xf32> to vector<8x128xf32>
    %cst_170 = arith.constant 5.000000e-01 : f32
    %348 = vector.broadcast %cst_170 : f32 to vector<8x128xf32>
    %349 = arith.mulf %348, %347 : vector<8x128xf32>
    %350 = math.tanh %349 : vector<8x128xf32>
    %cst_171 = arith.constant 5.000000e-01 : f32
    %351 = vector.broadcast %cst_171 : f32 to vector<8x128xf32>
    %352 = arith.mulf %351, %350 : vector<8x128xf32>
    %cst_172 = arith.constant 5.000000e-01 : f32
    %353 = vector.broadcast %cst_172 : f32 to vector<8x128xf32>
    %354 = arith.addf %352, %353 : vector<8x128xf32>
    %355 = vector.extract_strided_slice %338 {offsets = [0, 256], sizes = [8, 128], strides = [1, 1]} : vector<8x512xf32> to vector<8x128xf32>
    %356 = math.tanh %355 : vector<8x128xf32>
    %357 = vector.extract_strided_slice %338 {offsets = [0, 384], sizes = [8, 128], strides = [1, 1]} : vector<8x512xf32> to vector<8x128xf32>
    %cst_173 = arith.constant 5.000000e-01 : f32
    %358 = vector.broadcast %cst_173 : f32 to vector<8x128xf32>
    %359 = arith.mulf %358, %357 : vector<8x128xf32>
    %360 = math.tanh %359 : vector<8x128xf32>
    %cst_174 = arith.constant 5.000000e-01 : f32
    %361 = vector.broadcast %cst_174 : f32 to vector<8x128xf32>
    %362 = arith.mulf %361, %360 : vector<8x128xf32>
    %cst_175 = arith.constant 5.000000e-01 : f32
    %363 = vector.broadcast %cst_175 : f32 to vector<8x128xf32>
    %364 = arith.addf %362, %363 : vector<8x128xf32>
    %365 = arith.mulf %354, %333 : vector<8x128xf32>
    %366 = arith.mulf %346, %356 : vector<8x128xf32>
    %367 = arith.addf %365, %366 : vector<8x128xf32>
    %368 = math.tanh %367 : vector<8x128xf32>
    %369 = arith.mulf %364, %368 : vector<8x128xf32>
    %c0_176 = arith.constant 0 : index
    %c0_177 = arith.constant 0 : index
    %c0_178 = arith.constant 0 : index
    %370 = vector.load %arg15[%c0_176, %c0_177, %c0_178] : memref<8x8x128xf32, #tpu.memory_space<vmem>>, vector<1x8x128xf32>
    %371 = vector.shape_cast %370 : vector<1x8x128xf32> to vector<8x128xf32>
    %372 = vector.shape_cast %369 : vector<8x128xf32> to vector<1x8x128xf32>
    tpu.vector_store %arg15[%c0_176, %c0_177, %c0_178], %372 {strides = array<i32>} : memref<8x8x128xf32, #tpu.memory_space<vmem>>, vector<1x8x128xf32>,
    %c1_179 = arith.constant 1 : index
    %c0_180 = arith.constant 0 : index
    %c0_181 = arith.constant 0 : index
    %373 = vector.load %arg13[%c1_179, %c0_180, %c0_181] : memref<8x8x512xf32, #tpu.memory_space<vmem>>, vector<1x8x512xf32>
    %374 = vector.shape_cast %373 : vector<1x8x512xf32> to vector<8x512xf32>
    %c0_182 = arith.constant 0 : index
    %c0_183 = arith.constant 0 : index
    %375 = vector.load %arg6[%c0_182, %c0_183] : memref<128x512xf32, #tpu.memory_space<vmem>>, vector<128x512xf32>
    %cst_184 = arith.constant dense<0.000000e+00> : vector<8x512xf32>
    %376 = tpu.matmul %369, %375, %cst_184 {dimension_numbers = #tpu.dot_dimension_numbers<[1], [0], [0], [1], [0, 0, 1, 1], [], []>} : vector<8x128xf32>, vector<128x512xf32>, vector<8x512xf32> -> vector<8x512xf32>
    %377 = arith.addf %374, %376 : vector<8x512xf32>
    %378 = vector.extract_strided_slice %377 {offsets = [0, 0], sizes = [8, 128], strides = [1, 1]} : vector<8x512xf32> to vector<8x128xf32>
    %cst_185 = arith.constant 5.000000e-01 : f32
    %379 = vector.broadcast %cst_185 : f32 to vector<8x128xf32>
    %380 = arith.mulf %379, %378 : vector<8x128xf32>
    %381 = math.tanh %380 : vector<8x128xf32>
    %cst_186 = arith.constant 5.000000e-01 : f32
    %382 = vector.broadcast %cst_186 : f32 to vector<8x128xf32>
    %383 = arith.mulf %382, %381 : vector<8x128xf32>
    %cst_187 = arith.constant 5.000000e-01 : f32
    %384 = vector.broadcast %cst_187 : f32 to vector<8x128xf32>
    %385 = arith.addf %383, %384 : vector<8x128xf32>
    %386 = vector.extract_strided_slice %377 {offsets = [0, 128], sizes = [8, 128], strides = [1, 1]} : vector<8x512xf32> to vector<8x128xf32>
    %cst_188 = arith.constant 5.000000e-01 : f32
    %387 = vector.broadcast %cst_188 : f32 to vector<8x128xf32>
    %388 = arith.mulf %387, %386 : vector<8x128xf32>
    %389 = math.tanh %388 : vector<8x128xf32>
    %cst_189 = arith.constant 5.000000e-01 : f32
    %390 = vector.broadcast %cst_189 : f32 to vector<8x128xf32>
    %391 = arith.mulf %390, %389 : vector<8x128xf32>
    %cst_190 = arith.constant 5.000000e-01 : f32
    %392 = vector.broadcast %cst_190 : f32 to vector<8x128xf32>
    %393 = arith.addf %391, %392 : vector<8x128xf32>
    %394 = vector.extract_strided_slice %377 {offsets = [0, 256], sizes = [8, 128], strides = [1, 1]} : vector<8x512xf32> to vector<8x128xf32>
    %395 = math.tanh %394 : vector<8x128xf32>
    %396 = vector.extract_strided_slice %377 {offsets = [0, 384], sizes = [8, 128], strides = [1, 1]} : vector<8x512xf32> to vector<8x128xf32>
    %cst_191 = arith.constant 5.000000e-01 : f32
    %397 = vector.broadcast %cst_191 : f32 to vector<8x128xf32>
    %398 = arith.mulf %397, %396 : vector<8x128xf32>
    %399 = math.tanh %398 : vector<8x128xf32>
    %cst_192 = arith.constant 5.000000e-01 : f32
    %400 = vector.broadcast %cst_192 : f32 to vector<8x128xf32>
    %401 = arith.mulf %400, %399 : vector<8x128xf32>
    %cst_193 = arith.constant 5.000000e-01 : f32
    %402 = vector.broadcast %cst_193 : f32 to vector<8x128xf32>
    %403 = arith.addf %401, %402 : vector<8x128xf32>
    %404 = arith.mulf %393, %367 : vector<8x128xf32>
    %405 = arith.mulf %385, %395 : vector<8x128xf32>
    %406 = arith.addf %404, %405 : vector<8x128xf32>
    %407 = math.tanh %406 : vector<8x128xf32>
    %408 = arith.mulf %403, %407 : vector<8x128xf32>
    %c1_194 = arith.constant 1 : index
    %c0_195 = arith.constant 0 : index
    %c0_196 = arith.constant 0 : index
    %409 = vector.load %arg15[%c1_194, %c0_195, %c0_196] : memref<8x8x128xf32, #tpu.memory_space<vmem>>, vector<1x8x128xf32>
    %410 = vector.shape_cast %409 : vector<1x8x128xf32> to vector<8x128xf32>
    %411 = vector.shape_cast %408 : vector<8x128xf32> to vector<1x8x128xf32>
    tpu.vector_store %arg15[%c1_194, %c0_195, %c0_196], %411 {strides = array<i32>} : memref<8x8x128xf32, #tpu.memory_space<vmem>>, vector<1x8x128xf32>,
    %c2_197 = arith.constant 2 : index
    %c0_198 = arith.constant 0 : index
    %c0_199 = arith.constant 0 : index
    %412 = vector.load %arg13[%c2_197, %c0_198, %c0_199] : memref<8x8x512xf32, #tpu.memory_space<vmem>>, vector<1x8x512xf32>
    %413 = vector.shape_cast %412 : vector<1x8x512xf32> to vector<8x512xf32>
    %c0_200 = arith.constant 0 : index
    %c0_201 = arith.constant 0 : index
    %414 = vector.load %arg6[%c0_200, %c0_201] : memref<128x512xf32, #tpu.memory_space<vmem>>, vector<128x512xf32>
    %cst_202 = arith.constant dense<0.000000e+00> : vector<8x512xf32>
    %415 = tpu.matmul %408, %414, %cst_202 {dimension_numbers = #tpu.dot_dimension_numbers<[1], [0], [0], [1], [0, 0, 1, 1], [], []>} : vector<8x128xf32>, vector<128x512xf32>, vector<8x512xf32> -> vector<8x512xf32>
    %416 = arith.addf %413, %415 : vector<8x512xf32>
    %417 = vector.extract_strided_slice %416 {offsets = [0, 0], sizes = [8, 128], strides = [1, 1]} : vector<8x512xf32> to vector<8x128xf32>
    %cst_203 = arith.constant 5.000000e-01 : f32
    %418 = vector.broadcast %cst_203 : f32 to vector<8x128xf32>
    %419 = arith.mulf %418, %417 : vector<8x128xf32>
    %420 = math.tanh %419 : vector<8x128xf32>
    %cst_204 = arith.constant 5.000000e-01 : f32
    %421 = vector.broadcast %cst_204 : f32 to vector<8x128xf32>
    %422 = arith.mulf %421, %420 : vector<8x128xf32>
    %cst_205 = arith.constant 5.000000e-01 : f32
    %423 = vector.broadcast %cst_205 : f32 to vector<8x128xf32>
    %424 = arith.addf %422, %423 : vector<8x128xf32>
    %425 = vector.extract_strided_slice %416 {offsets = [0, 128], sizes = [8, 128], strides = [1, 1]} : vector<8x512xf32> to vector<8x128xf32>
    %cst_206 = arith.constant 5.000000e-01 : f32
    %426 = vector.broadcast %cst_206 : f32 to vector<8x128xf32>
    %427 = arith.mulf %426, %425 : vector<8x128xf32>
    %428 = math.tanh %427 : vector<8x128xf32>
    %cst_207 = arith.constant 5.000000e-01 : f32
    %429 = vector.broadcast %cst_207 : f32 to vector<8x128xf32>
    %430 = arith.mulf %429, %428 : vector<8x128xf32>
    %cst_208 = arith.constant 5.000000e-01 : f32
    %431 = vector.broadcast %cst_208 : f32 to vector<8x128xf32>
    %432 = arith.addf %430, %431 : vector<8x128xf32>
    %433 = vector.extract_strided_slice %416 {offsets = [0, 256], sizes = [8, 128], strides = [1, 1]} : vector<8x512xf32> to vector<8x128xf32>
    %434 = math.tanh %433 : vector<8x128xf32>
    %435 = vector.extract_strided_slice %416 {offsets = [0, 384], sizes = [8, 128], strides = [1, 1]} : vector<8x512xf32> to vector<8x128xf32>
    %cst_209 = arith.constant 5.000000e-01 : f32
    %436 = vector.broadcast %cst_209 : f32 to vector<8x128xf32>
    %437 = arith.mulf %436, %435 : vector<8x128xf32>
    %438 = math.tanh %437 : vector<8x128xf32>
    %cst_210 = arith.constant 5.000000e-01 : f32
    %439 = vector.broadcast %cst_210 : f32 to vector<8x128xf32>
    %440 = arith.mulf %439, %438 : vector<8x128xf32>
    %cst_211 = arith.constant 5.000000e-01 : f32
    %441 = vector.broadcast %cst_211 : f32 to vector<8x128xf32>
    %442 = arith.addf %440, %441 : vector<8x128xf32>
    %443 = arith.mulf %432, %406 : vector<8x128xf32>
    %444 = arith.mulf %424, %434 : vector<8x128xf32>
    %445 = arith.addf %443, %444 : vector<8x128xf32>
    %446 = math.tanh %445 : vector<8x128xf32>
    %447 = arith.mulf %442, %446 : vector<8x128xf32>
    %c2_212 = arith.constant 2 : index
    %c0_213 = arith.constant 0 : index
    %c0_214 = arith.constant 0 : index
    %448 = vector.load %arg15[%c2_212, %c0_213, %c0_214] : memref<8x8x128xf32, #tpu.memory_space<vmem>>, vector<1x8x128xf32>
    %449 = vector.shape_cast %448 : vector<1x8x128xf32> to vector<8x128xf32>
    %450 = vector.shape_cast %447 : vector<8x128xf32> to vector<1x8x128xf32>
    tpu.vector_store %arg15[%c2_212, %c0_213, %c0_214], %450 {strides = array<i32>} : memref<8x8x128xf32, #tpu.memory_space<vmem>>, vector<1x8x128xf32>,
    %c3_215 = arith.constant 3 : index
    %c0_216 = arith.constant 0 : index
    %c0_217 = arith.constant 0 : index
    %451 = vector.load %arg13[%c3_215, %c0_216, %c0_217] : memref<8x8x512xf32, #tpu.memory_space<vmem>>, vector<1x8x512xf32>
    %452 = vector.shape_cast %451 : vector<1x8x512xf32> to vector<8x512xf32>
    %c0_218 = arith.constant 0 : index
    %c0_219 = arith.constant 0 : index
    %453 = vector.load %arg6[%c0_218, %c0_219] : memref<128x512xf32, #tpu.memory_space<vmem>>, vector<128x512xf32>
    %cst_220 = arith.constant dense<0.000000e+00> : vector<8x512xf32>
    %454 = tpu.matmul %447, %453, %cst_220 {dimension_numbers = #tpu.dot_dimension_numbers<[1], [0], [0], [1], [0, 0, 1, 1], [], []>} : vector<8x128xf32>, vector<128x512xf32>, vector<8x512xf32> -> vector<8x512xf32>
    %455 = arith.addf %452, %454 : vector<8x512xf32>
    %456 = vector.extract_strided_slice %455 {offsets = [0, 0], sizes = [8, 128], strides = [1, 1]} : vector<8x512xf32> to vector<8x128xf32>
    %cst_221 = arith.constant 5.000000e-01 : f32
    %457 = vector.broadcast %cst_221 : f32 to vector<8x128xf32>
    %458 = arith.mulf %457, %456 : vector<8x128xf32>
    %459 = math.tanh %458 : vector<8x128xf32>
    %cst_222 = arith.constant 5.000000e-01 : f32
    %460 = vector.broadcast %cst_222 : f32 to vector<8x128xf32>
    %461 = arith.mulf %460, %459 : vector<8x128xf32>
    %cst_223 = arith.constant 5.000000e-01 : f32
    %462 = vector.broadcast %cst_223 : f32 to vector<8x128xf32>
    %463 = arith.addf %461, %462 : vector<8x128xf32>
    %464 = vector.extract_strided_slice %455 {offsets = [0, 128], sizes = [8, 128], strides = [1, 1]} : vector<8x512xf32> to vector<8x128xf32>
    %cst_224 = arith.constant 5.000000e-01 : f32
    %465 = vector.broadcast %cst_224 : f32 to vector<8x128xf32>
    %466 = arith.mulf %465, %464 : vector<8x128xf32>
    %467 = math.tanh %466 : vector<8x128xf32>
    %cst_225 = arith.constant 5.000000e-01 : f32
    %468 = vector.broadcast %cst_225 : f32 to vector<8x128xf32>
    %469 = arith.mulf %468, %467 : vector<8x128xf32>
    %cst_226 = arith.constant 5.000000e-01 : f32
    %470 = vector.broadcast %cst_226 : f32 to vector<8x128xf32>
    %471 = arith.addf %469, %470 : vector<8x128xf32>
    %472 = vector.extract_strided_slice %455 {offsets = [0, 256], sizes = [8, 128], strides = [1, 1]} : vector<8x512xf32> to vector<8x128xf32>
    %473 = math.tanh %472 : vector<8x128xf32>
    %474 = vector.extract_strided_slice %455 {offsets = [0, 384], sizes = [8, 128], strides = [1, 1]} : vector<8x512xf32> to vector<8x128xf32>
    %cst_227 = arith.constant 5.000000e-01 : f32
    %475 = vector.broadcast %cst_227 : f32 to vector<8x128xf32>
    %476 = arith.mulf %475, %474 : vector<8x128xf32>
    %477 = math.tanh %476 : vector<8x128xf32>
    %cst_228 = arith.constant 5.000000e-01 : f32
    %478 = vector.broadcast %cst_228 : f32 to vector<8x128xf32>
    %479 = arith.mulf %478, %477 : vector<8x128xf32>
    %cst_229 = arith.constant 5.000000e-01 : f32
    %480 = vector.broadcast %cst_229 : f32 to vector<8x128xf32>
    %481 = arith.addf %479, %480 : vector<8x128xf32>
    %482 = arith.mulf %471, %445 : vector<8x128xf32>
    %483 = arith.mulf %463, %473 : vector<8x128xf32>
    %484 = arith.addf %482, %483 : vector<8x128xf32>
    %485 = math.tanh %484 : vector<8x128xf32>
    %486 = arith.mulf %481, %485 : vector<8x128xf32>
    %c3_230 = arith.constant 3 : index
    %c0_231 = arith.constant 0 : index
    %c0_232 = arith.constant 0 : index
    %487 = vector.load %arg15[%c3_230, %c0_231, %c0_232] : memref<8x8x128xf32, #tpu.memory_space<vmem>>, vector<1x8x128xf32>
    %488 = vector.shape_cast %487 : vector<1x8x128xf32> to vector<8x128xf32>
    %489 = vector.shape_cast %486 : vector<8x128xf32> to vector<1x8x128xf32>
    tpu.vector_store %arg15[%c3_230, %c0_231, %c0_232], %489 {strides = array<i32>} : memref<8x8x128xf32, #tpu.memory_space<vmem>>, vector<1x8x128xf32>,
    %c4_233 = arith.constant 4 : index
    %c0_234 = arith.constant 0 : index
    %c0_235 = arith.constant 0 : index
    %490 = vector.load %arg13[%c4_233, %c0_234, %c0_235] : memref<8x8x512xf32, #tpu.memory_space<vmem>>, vector<1x8x512xf32>
    %491 = vector.shape_cast %490 : vector<1x8x512xf32> to vector<8x512xf32>
    %c0_236 = arith.constant 0 : index
    %c0_237 = arith.constant 0 : index
    %492 = vector.load %arg6[%c0_236, %c0_237] : memref<128x512xf32, #tpu.memory_space<vmem>>, vector<128x512xf32>
    %cst_238 = arith.constant dense<0.000000e+00> : vector<8x512xf32>
    %493 = tpu.matmul %486, %492, %cst_238 {dimension_numbers = #tpu.dot_dimension_numbers<[1], [0], [0], [1], [0, 0, 1, 1], [], []>} : vector<8x128xf32>, vector<128x512xf32>, vector<8x512xf32> -> vector<8x512xf32>
    %494 = arith.addf %491, %493 : vector<8x512xf32>
    %495 = vector.extract_strided_slice %494 {offsets = [0, 0], sizes = [8, 128], strides = [1, 1]} : vector<8x512xf32> to vector<8x128xf32>
    %cst_239 = arith.constant 5.000000e-01 : f32
    %496 = vector.broadcast %cst_239 : f32 to vector<8x128xf32>
    %497 = arith.mulf %496, %495 : vector<8x128xf32>
    %498 = math.tanh %497 : vector<8x128xf32>
    %cst_240 = arith.constant 5.000000e-01 : f32
    %499 = vector.broadcast %cst_240 : f32 to vector<8x128xf32>
    %500 = arith.mulf %499, %498 : vector<8x128xf32>
    %cst_241 = arith.constant 5.000000e-01 : f32
    %501 = vector.broadcast %cst_241 : f32 to vector<8x128xf32>
    %502 = arith.addf %500, %501 : vector<8x128xf32>
    %503 = vector.extract_strided_slice %494 {offsets = [0, 128], sizes = [8, 128], strides = [1, 1]} : vector<8x512xf32> to vector<8x128xf32>
    %cst_242 = arith.constant 5.000000e-01 : f32
    %504 = vector.broadcast %cst_242 : f32 to vector<8x128xf32>
    %505 = arith.mulf %504, %503 : vector<8x128xf32>
    %506 = math.tanh %505 : vector<8x128xf32>
    %cst_243 = arith.constant 5.000000e-01 : f32
    %507 = vector.broadcast %cst_243 : f32 to vector<8x128xf32>
    %508 = arith.mulf %507, %506 : vector<8x128xf32>
    %cst_244 = arith.constant 5.000000e-01 : f32
    %509 = vector.broadcast %cst_244 : f32 to vector<8x128xf32>
    %510 = arith.addf %508, %509 : vector<8x128xf32>
    %511 = vector.extract_strided_slice %494 {offsets = [0, 256], sizes = [8, 128], strides = [1, 1]} : vector<8x512xf32> to vector<8x128xf32>
    %512 = math.tanh %511 : vector<8x128xf32>
    %513 = vector.extract_strided_slice %494 {offsets = [0, 384], sizes = [8, 128], strides = [1, 1]} : vector<8x512xf32> to vector<8x128xf32>
    %cst_245 = arith.constant 5.000000e-01 : f32
    %514 = vector.broadcast %cst_245 : f32 to vector<8x128xf32>
    %515 = arith.mulf %514, %513 : vector<8x128xf32>
    %516 = math.tanh %515 : vector<8x128xf32>
    %cst_246 = arith.constant 5.000000e-01 : f32
    %517 = vector.broadcast %cst_246 : f32 to vector<8x128xf32>
    %518 = arith.mulf %517, %516 : vector<8x128xf32>
    %cst_247 = arith.constant 5.000000e-01 : f32
    %519 = vector.broadcast %cst_247 : f32 to vector<8x128xf32>
    %520 = arith.addf %518, %519 : vector<8x128xf32>
    %521 = arith.mulf %510, %484 : vector<8x128xf32>
    %522 = arith.mulf %502, %512 : vector<8x128xf32>
    %523 = arith.addf %521, %522 : vector<8x128xf32>
    %524 = math.tanh %523 : vector<8x128xf32>
    %525 = arith.mulf %520, %524 : vector<8x128xf32>
    %c4_248 = arith.constant 4 : index
    %c0_249 = arith.constant 0 : index
    %c0_250 = arith.constant 0 : index
    %526 = vector.load %arg15[%c4_248, %c0_249, %c0_250] : memref<8x8x128xf32, #tpu.memory_space<vmem>>, vector<1x8x128xf32>
    %527 = vector.shape_cast %526 : vector<1x8x128xf32> to vector<8x128xf32>
    %528 = vector.shape_cast %525 : vector<8x128xf32> to vector<1x8x128xf32>
    tpu.vector_store %arg15[%c4_248, %c0_249, %c0_250], %528 {strides = array<i32>} : memref<8x8x128xf32, #tpu.memory_space<vmem>>, vector<1x8x128xf32>,
    %c5_251 = arith.constant 5 : index
    %c0_252 = arith.constant 0 : index
    %c0_253 = arith.constant 0 : index
    %529 = vector.load %arg13[%c5_251, %c0_252, %c0_253] : memref<8x8x512xf32, #tpu.memory_space<vmem>>, vector<1x8x512xf32>
    %530 = vector.shape_cast %529 : vector<1x8x512xf32> to vector<8x512xf32>
    %c0_254 = arith.constant 0 : index
    %c0_255 = arith.constant 0 : index
    %531 = vector.load %arg6[%c0_254, %c0_255] : memref<128x512xf32, #tpu.memory_space<vmem>>, vector<128x512xf32>
    %cst_256 = arith.constant dense<0.000000e+00> : vector<8x512xf32>
    %532 = tpu.matmul %525, %531, %cst_256 {dimension_numbers = #tpu.dot_dimension_numbers<[1], [0], [0], [1], [0, 0, 1, 1], [], []>} : vector<8x128xf32>, vector<128x512xf32>, vector<8x512xf32> -> vector<8x512xf32>
    %533 = arith.addf %530, %532 : vector<8x512xf32>
    %534 = vector.extract_strided_slice %533 {offsets = [0, 0], sizes = [8, 128], strides = [1, 1]} : vector<8x512xf32> to vector<8x128xf32>
    %cst_257 = arith.constant 5.000000e-01 : f32
    %535 = vector.broadcast %cst_257 : f32 to vector<8x128xf32>
    %536 = arith.mulf %535, %534 : vector<8x128xf32>
    %537 = math.tanh %536 : vector<8x128xf32>
    %cst_258 = arith.constant 5.000000e-01 : f32
    %538 = vector.broadcast %cst_258 : f32 to vector<8x128xf32>
    %539 = arith.mulf %538, %537 : vector<8x128xf32>
    %cst_259 = arith.constant 5.000000e-01 : f32
    %540 = vector.broadcast %cst_259 : f32 to vector<8x128xf32>
    %541 = arith.addf %539, %540 : vector<8x128xf32>
    %542 = vector.extract_strided_slice %533 {offsets = [0, 128], sizes = [8, 128], strides = [1, 1]} : vector<8x512xf32> to vector<8x128xf32>
    %cst_260 = arith.constant 5.000000e-01 : f32
    %543 = vector.broadcast %cst_260 : f32 to vector<8x128xf32>
    %544 = arith.mulf %543, %542 : vector<8x128xf32>
    %545 = math.tanh %544 : vector<8x128xf32>
    %cst_261 = arith.constant 5.000000e-01 : f32
    %546 = vector.broadcast %cst_261 : f32 to vector<8x128xf32>
    %547 = arith.mulf %546, %545 : vector<8x128xf32>
    %cst_262 = arith.constant 5.000000e-01 : f32
    %548 = vector.broadcast %cst_262 : f32 to vector<8x128xf32>
    %549 = arith.addf %547, %548 : vector<8x128xf32>
    %550 = vector.extract_strided_slice %533 {offsets = [0, 256], sizes = [8, 128], strides = [1, 1]} : vector<8x512xf32> to vector<8x128xf32>
    %551 = math.tanh %550 : vector<8x128xf32>
    %552 = vector.extract_strided_slice %533 {offsets = [0, 384], sizes = [8, 128], strides = [1, 1]} : vector<8x512xf32> to vector<8x128xf32>
    %cst_263 = arith.constant 5.000000e-01 : f32
    %553 = vector.broadcast %cst_263 : f32 to vector<8x128xf32>
    %554 = arith.mulf %553, %552 : vector<8x128xf32>
    %555 = math.tanh %554 : vector<8x128xf32>
    %cst_264 = arith.constant 5.000000e-01 : f32
    %556 = vector.broadcast %cst_264 : f32 to vector<8x128xf32>
    %557 = arith.mulf %556, %555 : vector<8x128xf32>
    %cst_265 = arith.constant 5.000000e-01 : f32
    %558 = vector.broadcast %cst_265 : f32 to vector<8x128xf32>
    %559 = arith.addf %557, %558 : vector<8x128xf32>
    %560 = arith.mulf %549, %523 : vector<8x128xf32>
    %561 = arith.mulf %541, %551 : vector<8x128xf32>
    %562 = arith.addf %560, %561 : vector<8x128xf32>
    %563 = math.tanh %562 : vector<8x128xf32>
    %564 = arith.mulf %559, %563 : vector<8x128xf32>
    %c5_266 = arith.constant 5 : index
    %c0_267 = arith.constant 0 : index
    %c0_268 = arith.constant 0 : index
    %565 = vector.load %arg15[%c5_266, %c0_267, %c0_268] : memref<8x8x128xf32, #tpu.memory_space<vmem>>, vector<1x8x128xf32>
    %566 = vector.shape_cast %565 : vector<1x8x128xf32> to vector<8x128xf32>
    %567 = vector.shape_cast %564 : vector<8x128xf32> to vector<1x8x128xf32>
    tpu.vector_store %arg15[%c5_266, %c0_267, %c0_268], %567 {strides = array<i32>} : memref<8x8x128xf32, #tpu.memory_space<vmem>>, vector<1x8x128xf32>,
    %c6_269 = arith.constant 6 : index
    %c0_270 = arith.constant 0 : index
    %c0_271 = arith.constant 0 : index
    %568 = vector.load %arg13[%c6_269, %c0_270, %c0_271] : memref<8x8x512xf32, #tpu.memory_space<vmem>>, vector<1x8x512xf32>
    %569 = vector.shape_cast %568 : vector<1x8x512xf32> to vector<8x512xf32>
    %c0_272 = arith.constant 0 : index
    %c0_273 = arith.constant 0 : index
    %570 = vector.load %arg6[%c0_272, %c0_273] : memref<128x512xf32, #tpu.memory_space<vmem>>, vector<128x512xf32>
    %cst_274 = arith.constant dense<0.000000e+00> : vector<8x512xf32>
    %571 = tpu.matmul %564, %570, %cst_274 {dimension_numbers = #tpu.dot_dimension_numbers<[1], [0], [0], [1], [0, 0, 1, 1], [], []>} : vector<8x128xf32>, vector<128x512xf32>, vector<8x512xf32> -> vector<8x512xf32>
    %572 = arith.addf %569, %571 : vector<8x512xf32>
    %573 = vector.extract_strided_slice %572 {offsets = [0, 0], sizes = [8, 128], strides = [1, 1]} : vector<8x512xf32> to vector<8x128xf32>
    %cst_275 = arith.constant 5.000000e-01 : f32
    %574 = vector.broadcast %cst_275 : f32 to vector<8x128xf32>
    %575 = arith.mulf %574, %573 : vector<8x128xf32>
    %576 = math.tanh %575 : vector<8x128xf32>
    %cst_276 = arith.constant 5.000000e-01 : f32
    %577 = vector.broadcast %cst_276 : f32 to vector<8x128xf32>
    %578 = arith.mulf %577, %576 : vector<8x128xf32>
    %cst_277 = arith.constant 5.000000e-01 : f32
    %579 = vector.broadcast %cst_277 : f32 to vector<8x128xf32>
    %580 = arith.addf %578, %579 : vector<8x128xf32>
    %581 = vector.extract_strided_slice %572 {offsets = [0, 128], sizes = [8, 128], strides = [1, 1]} : vector<8x512xf32> to vector<8x128xf32>
    %cst_278 = arith.constant 5.000000e-01 : f32
    %582 = vector.broadcast %cst_278 : f32 to vector<8x128xf32>
    %583 = arith.mulf %582, %581 : vector<8x128xf32>
    %584 = math.tanh %583 : vector<8x128xf32>
    %cst_279 = arith.constant 5.000000e-01 : f32
    %585 = vector.broadcast %cst_279 : f32 to vector<8x128xf32>
    %586 = arith.mulf %585, %584 : vector<8x128xf32>
    %cst_280 = arith.constant 5.000000e-01 : f32
    %587 = vector.broadcast %cst_280 : f32 to vector<8x128xf32>
    %588 = arith.addf %586, %587 : vector<8x128xf32>
    %589 = vector.extract_strided_slice %572 {offsets = [0, 256], sizes = [8, 128], strides = [1, 1]} : vector<8x512xf32> to vector<8x128xf32>
    %590 = math.tanh %589 : vector<8x128xf32>
    %591 = vector.extract_strided_slice %572 {offsets = [0, 384], sizes = [8, 128], strides = [1, 1]} : vector<8x512xf32> to vector<8x128xf32>
    %cst_281 = arith.constant 5.000000e-01 : f32
    %592 = vector.broadcast %cst_281 : f32 to vector<8x128xf32>
    %593 = arith.mulf %592, %591 : vector<8x128xf32>
    %594 = math.tanh %593 : vector<8x128xf32>
    %cst_282 = arith.constant 5.000000e-01 : f32
    %595 = vector.broadcast %cst_282 : f32 to vector<8x128xf32>
    %596 = arith.mulf %595, %594 : vector<8x128xf32>
    %cst_283 = arith.constant 5.000000e-01 : f32
    %597 = vector.broadcast %cst_283 : f32 to vector<8x128xf32>
    %598 = arith.addf %596, %597 : vector<8x128xf32>
    %599 = arith.mulf %588, %562 : vector<8x128xf32>
    %600 = arith.mulf %580, %590 : vector<8x128xf32>
    %601 = arith.addf %599, %600 : vector<8x128xf32>
    %602 = math.tanh %601 : vector<8x128xf32>
    %603 = arith.mulf %598, %602 : vector<8x128xf32>
    %c6_284 = arith.constant 6 : index
    %c0_285 = arith.constant 0 : index
    %c0_286 = arith.constant 0 : index
    %604 = vector.load %arg15[%c6_284, %c0_285, %c0_286] : memref<8x8x128xf32, #tpu.memory_space<vmem>>, vector<1x8x128xf32>
    %605 = vector.shape_cast %604 : vector<1x8x128xf32> to vector<8x128xf32>
    %606 = vector.shape_cast %603 : vector<8x128xf32> to vector<1x8x128xf32>
    tpu.vector_store %arg15[%c6_284, %c0_285, %c0_286], %606 {strides = array<i32>} : memref<8x8x128xf32, #tpu.memory_space<vmem>>, vector<1x8x128xf32>,
    %c7_287 = arith.constant 7 : index
    %c0_288 = arith.constant 0 : index
    %c0_289 = arith.constant 0 : index
    %607 = vector.load %arg13[%c7_287, %c0_288, %c0_289] : memref<8x8x512xf32, #tpu.memory_space<vmem>>, vector<1x8x512xf32>
    %608 = vector.shape_cast %607 : vector<1x8x512xf32> to vector<8x512xf32>
    %c0_290 = arith.constant 0 : index
    %c0_291 = arith.constant 0 : index
    %609 = vector.load %arg6[%c0_290, %c0_291] : memref<128x512xf32, #tpu.memory_space<vmem>>, vector<128x512xf32>
    %cst_292 = arith.constant dense<0.000000e+00> : vector<8x512xf32>
    %610 = tpu.matmul %603, %609, %cst_292 {dimension_numbers = #tpu.dot_dimension_numbers<[1], [0], [0], [1], [0, 0, 1, 1], [], []>} : vector<8x128xf32>, vector<128x512xf32>, vector<8x512xf32> -> vector<8x512xf32>
    %611 = arith.addf %608, %610 : vector<8x512xf32>
    %612 = vector.extract_strided_slice %611 {offsets = [0, 0], sizes = [8, 128], strides = [1, 1]} : vector<8x512xf32> to vector<8x128xf32>
    %cst_293 = arith.constant 5.000000e-01 : f32
    %613 = vector.broadcast %cst_293 : f32 to vector<8x128xf32>
    %614 = arith.mulf %613, %612 : vector<8x128xf32>
    %615 = math.tanh %614 : vector<8x128xf32>
    %cst_294 = arith.constant 5.000000e-01 : f32
    %616 = vector.broadcast %cst_294 : f32 to vector<8x128xf32>
    %617 = arith.mulf %616, %615 : vector<8x128xf32>
    %cst_295 = arith.constant 5.000000e-01 : f32
    %618 = vector.broadcast %cst_295 : f32 to vector<8x128xf32>
    %619 = arith.addf %617, %618 : vector<8x128xf32>
    %620 = vector.extract_strided_slice %611 {offsets = [0, 128], sizes = [8, 128], strides = [1, 1]} : vector<8x512xf32> to vector<8x128xf32>
    %cst_296 = arith.constant 5.000000e-01 : f32
    %621 = vector.broadcast %cst_296 : f32 to vector<8x128xf32>
    %622 = arith.mulf %621, %620 : vector<8x128xf32>
    %623 = math.tanh %622 : vector<8x128xf32>
    %cst_297 = arith.constant 5.000000e-01 : f32
    %624 = vector.broadcast %cst_297 : f32 to vector<8x128xf32>
    %625 = arith.mulf %624, %623 : vector<8x128xf32>
    %cst_298 = arith.constant 5.000000e-01 : f32
    %626 = vector.broadcast %cst_298 : f32 to vector<8x128xf32>
    %627 = arith.addf %625, %626 : vector<8x128xf32>
    %628 = vector.extract_strided_slice %611 {offsets = [0, 256], sizes = [8, 128], strides = [1, 1]} : vector<8x512xf32> to vector<8x128xf32>
    %629 = math.tanh %628 : vector<8x128xf32>
    %630 = vector.extract_strided_slice %611 {offsets = [0, 384], sizes = [8, 128], strides = [1, 1]} : vector<8x512xf32> to vector<8x128xf32>
    %cst_299 = arith.constant 5.000000e-01 : f32
    %631 = vector.broadcast %cst_299 : f32 to vector<8x128xf32>
    %632 = arith.mulf %631, %630 : vector<8x128xf32>
    %633 = math.tanh %632 : vector<8x128xf32>
    %cst_300 = arith.constant 5.000000e-01 : f32
    %634 = vector.broadcast %cst_300 : f32 to vector<8x128xf32>
    %635 = arith.mulf %634, %633 : vector<8x128xf32>
    %cst_301 = arith.constant 5.000000e-01 : f32
    %636 = vector.broadcast %cst_301 : f32 to vector<8x128xf32>
    %637 = arith.addf %635, %636 : vector<8x128xf32>
    %638 = arith.mulf %627, %601 : vector<8x128xf32>
    %639 = arith.mulf %619, %629 : vector<8x128xf32>
    %640 = arith.addf %638, %639 : vector<8x128xf32>
    %641 = math.tanh %640 : vector<8x128xf32>
    %642 = arith.mulf %637, %641 : vector<8x128xf32>
    %c7_302 = arith.constant 7 : index
    %c0_303 = arith.constant 0 : index
    %c0_304 = arith.constant 0 : index
    %643 = vector.load %arg15[%c7_302, %c0_303, %c0_304] : memref<8x8x128xf32, #tpu.memory_space<vmem>>, vector<1x8x128xf32>
    %644 = vector.shape_cast %643 : vector<1x8x128xf32> to vector<8x128xf32>
    %645 = vector.shape_cast %642 : vector<8x128xf32> to vector<1x8x128xf32>
    tpu.vector_store %arg15[%c7_302, %c0_303, %c0_304], %645 {strides = array<i32>} : memref<8x8x128xf32, #tpu.memory_space<vmem>>, vector<1x8x128xf32>,
    %c0_305 = arith.constant 0 : index
    %c0_306 = arith.constant 0 : index
    %c0_307 = arith.constant 0 : index
    %646 = vector.load %arg15[%c0_305, %c0_306, %c0_307] : memref<8x8x128xf32, #tpu.memory_space<vmem>>, vector<8x8x128xf32>
    %647 = vector.shape_cast %646 : vector<8x8x128xf32> to vector<64x128xf32>
    %c0_308 = arith.constant 0 : index
    %c0_309 = arith.constant 0 : index
    %648 = vector.load %arg8[%c0_308, %c0_309] : memref<128x256xf32, #tpu.memory_space<vmem>>, vector<128x256xf32>
    %cst_310 = arith.constant dense<0.000000e+00> : vector<64x256xf32>
    %649 = tpu.matmul %647, %648, %cst_310 {dimension_numbers = #tpu.dot_dimension_numbers<[1], [0], [0], [1], [0, 0, 1, 1], [], []>} : vector<64x128xf32>, vector<128x256xf32>, vector<64x256xf32> -> vector<64x256xf32>
    %c0_311 = arith.constant 0 : index
    %c0_312 = arith.constant 0 : index
    %650 = vector.load %arg9[%c0_311, %c0_312] : memref<1x256xf32, #tpu.memory_space<vmem>>, vector<1x256xf32>
    %651 = vector.broadcast %650 : vector<1x256xf32> to vector<64x256xf32>
    %652 = arith.addf %649, %651 : vector<64x256xf32>
    %c0_313 = arith.constant 0 : index
    %c0_314 = arith.constant 0 : index
    %653 = vector.load %arg10[%c0_313, %c0_314] : memref<256x384xf32, #tpu.memory_space<vmem>>, vector<256x384xf32>
    %cst_315 = arith.constant dense<0.000000e+00> : vector<64x384xf32>
    %654 = tpu.matmul %652, %653, %cst_315 {dimension_numbers = #tpu.dot_dimension_numbers<[1], [0], [0], [1], [0, 0, 1, 1], [], []>} : vector<64x256xf32>, vector<256x384xf32>, vector<64x384xf32> -> vector<64x384xf32>
    %c0_316 = arith.constant 0 : index
    %c0_317 = arith.constant 0 : index
    %655 = vector.load %arg11[%c0_316, %c0_317] : memref<1x384xf32, #tpu.memory_space<vmem>>, vector<1x384xf32>
    %656 = vector.broadcast %655 : vector<1x384xf32> to vector<64x384xf32>
    %657 = arith.addf %654, %656 : vector<64x384xf32>
    %658 = vector.shape_cast %657 : vector<64x384xf32> to vector<8x8x384xf32>
    %c0_318 = arith.constant 0 : index
    %c0_319 = arith.constant 0 : index
    %c0_320 = arith.constant 0 : index
    %659 = vector.load %arg12[%c0_318, %c0_319, %c0_320] : memref<8x8x384xf32, #tpu.memory_space<vmem>>, vector<8x8x384xf32>
    tpu.vector_store %arg12[%c0_318, %c0_319, %c0_320], %658 {strides = array<i32>} : memref<8x8x384xf32, #tpu.memory_space<vmem>>, vector<8x8x384xf32>,
    return
  }
  func.func @transform_0(%arg0: i32) -> (i32, i32, i32) {
    %c0_i32 = arith.constant 0 : i32
    %c0_i32_0 = arith.constant 0 : i32
    %c0_i32_1 = arith.constant 0 : i32
    return %c0_i32, %arg0, %c0_i32_0 : i32, i32, i32
  }
  func.func @transform_1(%arg0: i32) -> (i32, i32) {
    %c0_i32 = arith.constant 0 : i32
    %c0_i32_0 = arith.constant 0 : i32
    %c0_i32_1 = arith.constant 0 : i32
    return %c0_i32, %c0_i32_0 : i32, i32
  }
  func.func @transform_2(%arg0: i32) -> (i32, i32) {
    %c0_i32 = arith.constant 0 : i32
    %c0_i32_0 = arith.constant 0 : i32
    %c0_i32_1 = arith.constant 0 : i32
    return %c0_i32, %c0_i32_0 : i32, i32
  }
  func.func @transform_3(%arg0: i32) -> (i32, i32) {
    %c0_i32 = arith.constant 0 : i32
    %c0_i32_0 = arith.constant 0 : i32
    %c0_i32_1 = arith.constant 0 : i32
    return %c0_i32, %c0_i32_0 : i32, i32
  }
  func.func @transform_4(%arg0: i32) -> (i32, i32) {
    %c0_i32 = arith.constant 0 : i32
    %c0_i32_0 = arith.constant 0 : i32
    %c0_i32_1 = arith.constant 0 : i32
    return %c0_i32, %c0_i32_0 : i32, i32
  }
  func.func @transform_5(%arg0: i32) -> (i32, i32) {
    %c0_i32 = arith.constant 0 : i32
    %c0_i32_0 = arith.constant 0 : i32
    %c0_i32_1 = arith.constant 0 : i32
    return %c0_i32, %c0_i32_0 : i32, i32
  }
  func.func @transform_6(%arg0: i32) -> (i32, i32) {
    %c0_i32 = arith.constant 0 : i32
    %c0_i32_0 = arith.constant 0 : i32
    %c0_i32_1 = arith.constant 0 : i32
    return %c0_i32, %c0_i32_0 : i32, i32
  }
  func.func @transform_7(%arg0: i32) -> (i32, i32) {
    %c0_i32 = arith.constant 0 : i32
    %c0_i32_0 = arith.constant 0 : i32
    %c0_i32_1 = arith.constant 0 : i32
    return %c0_i32, %c0_i32_0 : i32, i32
  }
  func.func @transform_8(%arg0: i32) -> (i32, i32) {
    %c0_i32 = arith.constant 0 : i32
    %c0_i32_0 = arith.constant 0 : i32
    %c0_i32_1 = arith.constant 0 : i32
    return %c0_i32, %c0_i32_0 : i32, i32
  }
  func.func @transform_9(%arg0: i32) -> (i32, i32) {
    %c0_i32 = arith.constant 0 : i32
    %c0_i32_0 = arith.constant 0 : i32
    %c0_i32_1 = arith.constant 0 : i32
    return %c0_i32, %c0_i32_0 : i32, i32
  }
  func.func @transform_10(%arg0: i32) -> (i32, i32) {
    %c0_i32 = arith.constant 0 : i32
    %c0_i32_0 = arith.constant 0 : i32
    %c0_i32_1 = arith.constant 0 : i32
    return %c0_i32, %c0_i32_0 : i32, i32
  }
  func.func @transform_11(%arg0: i32) -> (i32, i32, i32) {
    %c0_i32 = arith.constant 0 : i32
    %c0_i32_0 = arith.constant 0 : i32
    %c0_i32_1 = arith.constant 0 : i32
    return %c0_i32, %arg0, %c0_i32_0 : i32, i32, i32
  }
}

</mosaic_0001>

<bundles_post_ra>
// kernel: tpu_custom_call.1
= control target key start
LH: loop header
LB: loop body
LE: loop exit
PB: predicated region body
PF: predicated region fallthrough
CT: control target
= control target key end

     0   :  { %16 = vsyncpa [#allocation6], 0  ;;  %s8260_s0 = inlined_call_operand.hbm [shape: f32[8,8,21], index: 0, kind: input, shape index: {}]   ;;  %s8261_s1 = inlined_call_operand.hbm [shape: f32[21,512], index: 1, kind: input, shape index: {}]   ;;  %s8262_s2 = inlined_call_operand.hbm [shape: f32[128,512], index: 2, kind: input, shape index: {}]   ;;  %s8263_s3 = inlined_call_operand.vmem [shape: f32[1,512], index: 3, kind: input, shape index: {}]   ;;  %s8264_s4 = inlined_call_operand.hbm [shape: f32[128,512], index: 4, kind: input, shape index: {}]   ;;  %s8265_s5 = inlined_call_operand.hbm [shape: f32[128,512], index: 5, kind: input, shape index: {}]   ;;  %s8266_s6 = inlined_call_operand.vmem [shape: f32[1,512], index: 6, kind: input, shape index: {}]   ;;  %s8267_s7 = inlined_call_operand.hbm [shape: f32[128,256], index: 7, kind: input, shape index: {}]   ;;  %s8268_s8 = inlined_call_operand.vmem [shape: f32[1,256], index: 8, kind: input, shape index: {}]   ;;  %s8269_s9 = inlined_call_operand.hbm [shape: f32[256,384], index: 9, kind: input, shape index: {}]   ;;  %s8270_s10 = inlined_call_operand.vmem [shape: f32[1,384], index: 10, kind: input, shape index: {}]   ;;  %s8271_s11 = inlined_call_operand.hbm [shape: f32[8,8,384], index: 11, kind: output, shape index: {}]  }
   0x1   :  { %17 = vsyncpa [#allocation9], 0 }
   0x2   :  { %18 = vsyncpa [#allocation12], 0 }
   0x3   :  { %19 = vsyncpa [#allocation15], 0 }
   0x4   :  { %20 = vsyncpa [#allocation7], 0  ;;  %s6904_s17 = smov [#allocation8]   ;;  %s6718_s21 = scalar_lea.hbm %s8261_s1, 1536 }
   0x5   :  { %s38_s18 = sshll.u32 %s6904_s17, 4  ;;  %p6719_p0 = scmp.ne.s32.totalorder %s8261_s1, %s6718_s21  ;;  %s39_s18 = int_to_ptr.vmem [resolvable:$true] %s38_s18 }
   0x6   :  { %p6722_p1 = scmp.lt.u32.totalorder %s6718_s21, %s8261_s1 }
   0x8   :  { %p6724_p2 = pnand %p6722_p1, %p6719_p0 }
   0xa   :  { %6727 = shalt.err (!%p6724_p2)
}
   0xb   :  { %s6728_s26 = scalar_lea.vmem %s39_s18, 1536  ;;  %p6733_p4 = scmp.lt.s32.totalorder %s39_s18, %s39_s18 }
   0xc   :  { %p6729_p3 = scmp.ne.s32.totalorder %s39_s18, %s6728_s26  ;;  %p6734_p5 = scmp.lt.s32.totalorder %s6728_s26, %s6728_s26 }
   0xe   :  { %p6735_p6 = por %p6734_p5, %p6733_p4 }
  0x10   :  { %p6736_p7 = pnand %p6735_p6, %p6729_p3 }
  0x12   :  { %6739 = shalt.err (!%p6736_p7)
}
  0x13   :  { %s6905_s27 = smov 512   ;;  %s6906_s28 = smov 32  }
  0x14   :  { %44 = dma.hbm_to_vmem [thread:$0]  %s8261_s1, 1536, %s39_s18, [#allocation9], %s6905_s27, %s6905_s27, %s6906_s28  }
  0x15   :  { %s6907_s12 = smov [#allocation11]   ;;  %s6908_s14 = smov [#allocation14]  }
  0x16   :  { %s64_s13 = sshll.u32 %s6907_s12, 4  ;;  %s90_s15 = sshll.u32 %s6908_s14, 4  ;;  %s65_s13 = int_to_ptr.vmem [resolvable:$true] %s64_s13  ;;  %s91_s15 = int_to_ptr.vmem [resolvable:$true] %s90_s15 }
  0x17   :  { %s6740_s19 = scalar_lea.hbm %s8264_s4, 8192 }
  0x18   :  { %p6741_p8 = scmp.ne.s32.totalorder %s8264_s4, %s6740_s19  ;;  %p6744_p9 = scmp.lt.u32.totalorder %s6740_s19, %s8264_s4 }
  0x1a   :  { %p6746_p10 = pnand %p6744_p9, %p6741_p8 }
  0x1c   :  { %6749 = shalt.err (!%p6746_p10)
}
  0x1d   :  { %s6750_s1 = scalar_lea.vmem %s65_s13, 8192  ;;  %p6755_p12 = scmp.lt.s32.totalorder %s65_s13, %s65_s13 }
  0x1e   :  { %p6751_p11 = scmp.ne.s32.totalorder %s65_s13, %s6750_s1  ;;  %p6756_p13 = scmp.lt.s32.totalorder %s6750_s1, %s6750_s1 }
  0x20   :  { %p6757_p0 = por %p6756_p13, %p6755_p12 }
  0x22   :  { %p6758_p1 = pnand %p6757_p0, %p6751_p11 }
  0x24   :  { %6761 = shalt.err (!%p6758_p1)
}
  0x25   :  { %70 = dma.hbm_to_vmem [thread:$0]  %s8264_s4, 8192, %s65_s13, [#allocation12], %s6905_s27, %s6905_s27, %s6906_s28  }
  0x26   :  { %s6762_s29 = scalar_lea.hbm %s8267_s7, 4096 }
  0x27   :  { %p6763_p2 = scmp.ne.s32.totalorder %s8267_s7, %s6762_s29  ;;  %p6766_p3 = scmp.lt.u32.totalorder %s6762_s29, %s8267_s7 }
  0x29   :  { %p6768_p4 = pnand %p6766_p3, %p6763_p2 }
  0x2b   :  { %6771 = shalt.err (!%p6768_p4)
}
  0x2c   :  { %s6772_s17 = scalar_lea.vmem %s91_s15, 4096  ;;  %p6777_p6 = scmp.lt.s32.totalorder %s91_s15, %s91_s15 }
  0x2d   :  { %p6773_p5 = scmp.ne.s32.totalorder %s91_s15, %s6772_s17  ;;  %p6778_p7 = scmp.lt.s32.totalorder %s6772_s17, %s6772_s17 }
  0x2f   :  { %p6779_p8 = por %p6778_p7, %p6777_p6 }
  0x31   :  { %p6780_p9 = pnand %p6779_p8, %p6773_p5 }
  0x33   :  { %6783 = shalt.err (!%p6780_p9)
}
  0x34   :  { %s6909_s4 = smov 256   ;;  %s6910_s13 = smov 16  }
  0x35   :  { %96 = dma.hbm_to_vmem [thread:$0]  %s8267_s7, 4096, %s91_s15, [#allocation15], %s6909_s4, %s6909_s4, %s6910_s13  }
  0x36   :  { %s6911_s21 = smov [#allocation5]   ;;  %s6784_s18 = scalar_lea.hbm %s8260_s0, 1024 }
  0x37   :  { %s26_s22 = sshll.u32 %s6911_s21, 4  ;;  %p6785_p10 = scmp.ne.s32.totalorder %s8260_s0, %s6784_s18  ;;  %s27_s22 = int_to_ptr.vmem [resolvable:$true] %s26_s22 }
  0x38   :  { %p6788_p11 = scmp.lt.u32.totalorder %s6784_s18, %s8260_s0 }
  0x3a   :  { %p6790_p12 = pnand %p6788_p11, %p6785_p10 }
  0x3c   :  { %6793 = shalt.err (!%p6790_p12)
}
  0x3d   :  { %s6794_s30 = scalar_lea.vmem %s27_s22, 1024  ;;  %p6799_p0 = scmp.lt.s32.totalorder %s27_s22, %s27_s22 }
  0x3e   :  { %p6795_p13 = scmp.ne.s32.totalorder %s27_s22, %s6794_s30  ;;  %p6800_p1 = scmp.lt.s32.totalorder %s6794_s30, %s6794_s30 }
  0x40   :  { %p6801_p2 = por %p6800_p1, %p6799_p0 }
  0x42   :  { %p6802_p3 = pnand %p6801_p2, %p6795_p13 }
  0x44   :  { %6805 = shalt.err (!%p6802_p3)
}
  0x45   :  { %s6912_s7 = smov 128   ;;  %s6913_s15 = smov 8  }
  0x46   :  { %32 = dma.hbm_to_vmem [thread:$0]  %s8260_s0, 1024, %s27_s22, [#allocation6], %s6912_s7, %s6912_s7, %s6913_s15  }
  0x47   :  { %s6914_s16 = smov [#allocation10]   ;;  %s6915_s4 = smov [#allocation13]  }
  0x48   :  { %s50_s17 = sshll.u32 %s6914_s16, 4  ;;  %s76_s13 = sshll.u32 %s6915_s4, 4  ;;  %s51_s17 = int_to_ptr.vmem [resolvable:$true] %s50_s17  ;;  %s7035_s13 = int_to_ptr.vmem [resolvable:$true] %s76_s13 }
  0x49   :  { %s6806_s21 = scalar_lea.hbm %s8262_s2, 8192 }
  0x4a   :  { %p6807_p4 = scmp.ne.s32.totalorder %s8262_s2, %s6806_s21  ;;  %p6810_p5 = scmp.lt.u32.totalorder %s6806_s21, %s8262_s2 }
  0x4c   :  { %p6812_p6 = pnand %p6810_p5, %p6807_p4 }
  0x4e   :  { %6815 = shalt.err (!%p6812_p6)
}
  0x4f   :  { %s6816_s0 = scalar_lea.vmem %s51_s17, 8192  ;;  %p6821_p8 = scmp.lt.s32.totalorder %s51_s17, %s51_s17 }
  0x50   :  { %p6817_p7 = scmp.ne.s32.totalorder %s51_s17, %s6816_s0  ;;  %p6822_p9 = scmp.lt.s32.totalorder %s6816_s0, %s6816_s0 }
  0x52   :  { %p6823_p10 = por %p6822_p9, %p6821_p8 }
  0x54   :  { %p6824_p11 = pnand %p6823_p10, %p6817_p7 }
  0x56   :  { %6827 = shalt.err (!%p6824_p11)
}
  0x57   :  { %56 = dma.hbm_to_vmem [thread:$0]  %s8262_s2, 8192, %s51_s17, [#allocation9], %s6905_s27, %s6905_s27, %s6906_s28  }
  0x58   :  { %s6828_s30 = scalar_lea.hbm %s8265_s5, 8192 }
  0x59   :  { %p6829_p12 = scmp.ne.s32.totalorder %s8265_s5, %s6828_s30  ;;  %p6832_p13 = scmp.lt.u32.totalorder %s6828_s30, %s8265_s5 }
  0x5b   :  { %p6834_p0 = pnand %p6832_p13, %p6829_p12 }
  0x5d   :  { %6837 = shalt.err (!%p6834_p0)
}
  0x5e   :  { %s6838_s16 = scalar_lea.vmem %s7035_s13, 8192  ;;  %p6843_p2 = scmp.lt.s32.totalorder %s7035_s13, %s7035_s13 }
  0x5f   :  { %p6839_p1 = scmp.ne.s32.totalorder %s7035_s13, %s6838_s16  ;;  %p6844_p3 = scmp.lt.s32.totalorder %s6838_s16, %s6838_s16 }
  0x61   :  { %p6845_p4 = por %p6844_p3, %p6843_p2 }
  0x63   :  { %p6846_p5 = pnand %p6845_p4, %p6839_p1 }
  0x65   :  { %6849 = shalt.err (!%p6846_p5)
}
  0x66   :  { %82 = dma.hbm_to_vmem [thread:$0]  %s8265_s5, 8192, %s7035_s13, [#allocation12], %s6905_s27, %s6905_s27, %s6906_s28  }
  0x67   :  { %s6916_s4 = smov [#allocation16]   ;;  %s6850_s23 = scalar_lea.hbm %s8269_s9, 12288 }
  0x68   :  { %s104_s19 = sshll.u32 %s6916_s4, 4  ;;  %p6851_p6 = scmp.ne.s32.totalorder %s8269_s9, %s6850_s23  ;;  %s105_s19 = int_to_ptr.vmem [resolvable:$true] %s104_s19 }
  0x69   :  { %p6854_p7 = scmp.lt.u32.totalorder %s6850_s23, %s8269_s9 }
  0x6b   :  { %p6856_p8 = pnand %p6854_p7, %p6851_p6 }
  0x6d   :  { %6859 = shalt.err (!%p6856_p8)
}
  0x6e   :  { %s6860_s22 = scalar_lea.vmem %s105_s19, 12288  ;;  %p6865_p10 = scmp.lt.s32.totalorder %s105_s19, %s105_s19 }
  0x6f   :  { %p6861_p9 = scmp.ne.s32.totalorder %s105_s19, %s6860_s22  ;;  %p6866_p11 = scmp.lt.s32.totalorder %s6860_s22, %s6860_s22 }
  0x71   :  { %p6867_p12 = por %p6866_p11, %p6865_p10 }
  0x73   :  { %p6868_p13 = pnand %p6867_p12, %p6861_p9 }
  0x75   :  { %6871 = shalt.err (!%p6868_p13)
}
  0x76   :  { %s6917_s5 = smov 384   ;;  %s6918_s27 = smov 24  }
  0x77   :  { %110 = dma.hbm_to_vmem [thread:$0]  %s8269_s9, 12288, %s105_s19, [#allocation15], %s6917_s5, %s6917_s5, %s6918_s27  }
  0x78   :  { %6894 = dma.done.wait [#allocation6], 1024  }
  0x79   :  { %6895 = vsyncadd [#allocation6], 4294966272 }
  0x7a   :  { %6896 = dma.done.wait [#allocation9], 9728  }
  0x7b   :  { %6897 = vsyncadd [#allocation9], 4294957568 }
  0x7c   :  { %6898 = dma.done.wait [#allocation12], 16384  }
  0x7d   :  { %6899 = vsyncadd [#allocation12], 4294950912 }
  0x7e   :  { %6900 = dma.done.wait [#allocation15], 16384  }
  0x7f   :  { %6901 = vsyncadd [#allocation15], 4294950912  ;;  %v6919_v0 = vmov 0.0   ;;  %v143_v1 = vld [vmem:[#allocation8 + $0x8] sm:$0xff]  ;;  %v145_v3 = vld [vmem:[#allocation8 + $0x18] sm:$0xff]  ;;  %vm201_vm0 = vcmask 1044480  }
  0x80   :  { %278 = vmatprep.mubr.f32.mxu0 %v6919_v0  ;;  %391 = vmatprep.mubr.f32.mxu1 %v6919_v0  ;;  %v147_v2 = vld [vmem:[#allocation8 + $0x28] sm:$0xff]  ;;  %v149_v5 = vld [vmem:[#allocation8 + $0x38] sm:$0xff]  ;;  %v142_v6 = vld [vmem:[#allocation8] sm:$0xff]  ;;  %vm176_vm1 = vcmask 171008  }
  0x81   :  { %v5189_v4 = vpack.c.bf16 %v147_v2, %v143_v1  ;;  %v146_v7 = vld [vmem:[#allocation8 + $0x20] sm:$0xff]  ;;  %v5193_v8 = vpack.c.bf16 %v149_v5, %v145_v3  ;;  %v144_v10 = vld [vmem:[#allocation8 + $0x10] sm:$0xff]  ;;  %v151_v12 = vld [vmem:[#allocation8 + $0x48] sm:$0x1f] }
  0x82   :  { %v5191_v9 = vpack.c.bf16 %v146_v7, %v142_v6  ;;  %v148_v11 = vld [vmem:[#allocation8 + $0x30] sm:$0xff]  ;;  %v153_v14 = vld [vmem:[#allocation8 + $0x58] sm:$0x1f]  ;;  %v150_v15 = vld [vmem:[#allocation8 + $0x40] sm:$0x1f] }
  0x83   :  { %5190 = vmatprep.subr.bf16.mxu0 %v5189_v4  ;;  %v5195_v13 = vpack.c.bf16 %v148_v11, %v144_v10  ;;  %5194 = vmatprep.subr.bf16.mxu1 %v5193_v8  ;;  %v152_v16 = vld [vmem:[#allocation8 + $0x50] sm:$0x1f]  ;;  %v134_v17 = vld [vmem:[#allocation5] sm:$0xff]  ;;  %v477_v18 = vld [vmem:[#allocation10 + $0x8] sm:$0xff] }
  0x84   :  { %5192 = vmatpush1.bf16.msra.mxu0 %v5191_v9  ;;  %v481_v19 = vld [vmem:[#allocation10 + $0x28] sm:$0xff]  ;;  %v479_v20 = vld [vmem:[#allocation10 + $0x18] sm:$0xff]  ;;  %v476_v22 = vld [vmem:[#allocation10] sm:$0xff] }
  0x85   :  { %5196 = vmatpush1.bf16.msra.mxu1 %v5195_v13  ;;  %5113 = vmatprep.subr.msk.mxu0 %vm201_vm0, %v151_v12  ;;  %v483_v21 = vld [vmem:[#allocation10 + $0x38] sm:$0xff]  ;;  %v7091_v23 = vpack.c.bf16 %v481_v19, %v477_v18  ;;  %v480_v24 = vld [vmem:[#allocation10 + $0x20] sm:$0xff]  ;;  %v478_v25 = vld [vmem:[#allocation10 + $0x10] sm:$0xff] }
  0x86   :  { %5123 = vmatprep.subr.msk.mxu1 %vm201_vm0, %v153_v14  ;;  %v482_v26 = vld [vmem:[#allocation10 + $0x30] sm:$0xff]  ;;  %v7093_v27 = vpack.c.bf16 %v483_v21, %v479_v20  ;;  %v7095_v28 = vpack.c.bf16 %v480_v24, %v476_v22  ;;  %v485_v29 = vld [vmem:[#allocation10 + $0x48] sm:$0xff]  ;;  %v487_v32 = vld [vmem:[#allocation10 + $0x58] sm:$0xff] }
  0x87   :  { %v489_v30 = vld [vmem:[#allocation10 + $0x68] sm:$0xff]  ;;  %v7098_v31 = vpack.c.bf16 %v482_v26, %v478_v25  ;;  %v491_v33 = vld [vmem:[#allocation10 + $0x78] sm:$0xff]  ;;  %v484_v34 = vld [vmem:[#allocation10 + $0x40] sm:$0xff] }
  0x88   :  { %5114 = vmatpush1.msk.msra.mxu0 %vm201_vm0, %v150_v15  ;;  %v488_v35 = vld [vmem:[#allocation10 + $0x60] sm:$0xff]  ;;  %v486_v36 = vld [vmem:[#allocation10 + $0x50] sm:$0xff]  ;;  %v135_v38 = vld [vmem:[#allocation5 + $0x8] sm:$0xff]  ;;  %v7104_v39 = vpack.c.bf16 %v489_v30, %v485_v29  ;;  %v7108_v40 = vpack.c.bf16 %v491_v33, %v487_v32 }
  0x89   :  { %5124 = vmatpush1.msk.msra.mxu1 %vm201_vm0, %v152_v16  ;;  %5115 = vmatmul.mubr.msk.f32.vlgmr.msra.gmra.mrb[0].mxu0 %vm176_vm1, %v134_v17  ;;  %v490_v37 = vld [vmem:[#allocation10 + $0x70] sm:$0xff]  ;;  %v7110_v41 = vpack.c.bf16 %v488_v35, %v484_v34  ;;  %v493_v42 = vld [vmem:[#allocation10 + $0x88] sm:$0xff]  ;;  %v495_v44 = vld [vmem:[#allocation10 + $0x98] sm:$0xff] }
  0x8a   :  { %5125 = vmatmul.mubr.msk.f32.vlgmr.msra.gmra.mrb[0].mxu1 %vm176_vm1, %v134_v17  ;;  %5198 = vmatprep.subr.bf16.mxu0 %v7091_v23  ;;  %v497_v43 = vld [vmem:[#allocation10 + $0xa8] sm:$0xff]  ;;  %v7114_v45 = vpack.c.bf16 %v490_v37, %v486_v36  ;;  %v499_v46 = vld [vmem:[#allocation10 + $0xb8] sm:$0xff]  ;;  %v492_v47 = vld [vmem:[#allocation10 + $0x80] sm:$0xff] }
  0x8b   :  { %5230 = vmatprep.subr.bf16.mxu1 %v7093_v27  ;;  %5200 = vmatpush1.bf16.msra.mxu0 %v7095_v28  ;;  %v496_v48 = vld [vmem:[#allocation10 + $0xa0] sm:$0xff]  ;;  %v494_v49 = vld [vmem:[#allocation10 + $0x90] sm:$0xff]  ;;  %v7120_v52 = vpack.c.bf16 %v497_v43, %v493_v42  ;;  %v7124_v53 = vpack.c.bf16 %v499_v46, %v495_v44  ;;  %v501_v55 = vld [vmem:[#allocation10 + $0xc8] sm:$0xff] }
  0x8c   :  { %5232 = vmatpush1.bf16.msra.mxu1 %v7098_v31  ;;  %284 = vmatprep.mubr.f32.mxu0 %v6919_v0  ;;  %v498_v50 = vld [vmem:[#allocation10 + $0xb0] sm:$0xff]  ;;  %v7126_v54 = vpack.c.bf16 %v496_v48, %v492_v47  ;;  %v505_v56 = vld [vmem:[#allocation10 + $0xe8] sm:$0xff]  ;;  %v503_v57 = vld [vmem:[#allocation10 + $0xd8] sm:$0xff] }
  0x8d   :  { %397 = vmatprep.mubr.f32.mxu1 %v6919_v0  ;;  %5116 = vmatmul.mubr.msk.f32.gmra.mrb[2].mxu0 %vm176_vm1, %v135_v38  ;;  %v136_v51 = vld [vmem:[#allocation5 + $0x10] sm:$0xff]  ;;  %v7130_v58 = vpack.c.bf16 %v498_v50, %v494_v49  ;;  %v507_v59 = vld [vmem:[#allocation10 + $0xf8] sm:$0xff]  ;;  %v500_v60 = vld [vmem:[#allocation10 + $0xc0] sm:$0xff]  ;;  %v7136_v2 = vpack.c.bf16 %v505_v56, %v501_v55 }
  0x8e   :  { %5126 = vmatmul.mubr.msk.f32.gmra.mrb[2].mxu1 %vm176_vm1, %v135_v38  ;;  %5202 = vmatprep.subr.bf16.mxu0 %v7104_v39  ;;  %v504_v61 = vld [vmem:[#allocation10 + $0xe0] sm:$0xff]  ;;  %v502_v62 = vld [vmem:[#allocation10 + $0xd0] sm:$0xff]  ;;  %v137_v1 = vld [vmem:[#allocation5 + $0x18] sm:$0xff]  ;;  %v7140_v3 = vpack.c.bf16 %v507_v59, %v503_v57 }
  0x8f   :  { %5234 = vmatprep.subr.bf16.mxu1 %v7108_v40  ;;  %5204 = vmatpush1.bf16.msra.mxu0 %v7110_v41  ;;  %v506_v63 = vld [vmem:[#allocation10 + $0xf0] sm:$0xff]  ;;  %v7142_v4 = vpack.c.bf16 %v504_v61, %v500_v60  ;;  %v509_v5 = vld [vmem:[#allocation10 + $0x108] sm:$0xff]  ;;  %v511_v7 = vld [vmem:[#allocation10 + $0x118] sm:$0xff] }
  0x90   :  { %5236 = vmatpush1.bf16.msra.mxu1 %v7114_v45  ;;  %290 = vmatprep.mubr.f32.mxu0 %v6919_v0  ;;  %v513_v6 = vld [vmem:[#allocation10 + $0x128] sm:$0xff]  ;;  %v7146_v8 = vpack.c.bf16 %v506_v63, %v502_v62  ;;  %v515_v9 = vld [vmem:[#allocation10 + $0x138] sm:$0xff]  ;;  %v508_v10 = vld [vmem:[#allocation10 + $0x100] sm:$0xff] }
  0x91   :  { %403 = vmatprep.mubr.f32.mxu1 %v6919_v0  ;;  %5117 = vmatmul.mubr.msk.f32.gmra.mrb[4].mxu0 %vm176_vm1, %v136_v51  ;;  %v512_v11 = vld [vmem:[#allocation10 + $0x120] sm:$0xff]  ;;  %v510_v12 = vld [vmem:[#allocation10 + $0x110] sm:$0xff]  ;;  %v7152_v15 = vpack.c.bf16 %v513_v6, %v509_v5  ;;  %v7156_v16 = vpack.c.bf16 %v515_v9, %v511_v7  ;;  %v517_v18 = vld [vmem:[#allocation10 + $0x148] sm:$0xff] }
  0x92   :  { %5127 = vmatmul.mubr.msk.f32.gmra.mrb[4].mxu1 %vm176_vm1, %v136_v51  ;;  %5206 = vmatprep.subr.bf16.mxu0 %v7120_v52  ;;  %v514_v13 = vld [vmem:[#allocation10 + $0x130] sm:$0xff]  ;;  %v138_v14 = vld [vmem:[#allocation5 + $0x20] sm:$0xff]  ;;  %v7158_v17 = vpack.c.bf16 %v512_v11, %v508_v10  ;;  %v521_v19 = vld [vmem:[#allocation10 + $0x168] sm:$0xff]  ;;  %v156_v11 = vlaneseq }
  0x93   :  { %5238 = vmatprep.subr.bf16.mxu1 %v7124_v53  ;;  %5208 = vmatpush1.bf16.msra.mxu0 %v7126_v54  ;;  %v519_v20 = vld [vmem:[#allocation10 + $0x158] sm:$0xff]  ;;  %v7162_v21 = vpack.c.bf16 %v514_v13, %v510_v12  ;;  %v516_v24 = vld [vmem:[#allocation10 + $0x140] sm:$0xff]  ;;  %v518_v26 = vld [vmem:[#allocation10 + $0x150] sm:$0xff]  ;;  %v7168_v32 = vpack.c.bf16 %v521_v19, %v517_v18 }
  0x94   :  { %5240 = vmatpush1.bf16.msra.mxu1 %v7130_v58  ;;  %296 = vmatprep.mubr.f32.mxu0 %v6919_v0  ;;  %v523_v22 = vld [vmem:[#allocation10 + $0x178] sm:$0xff]  ;;  %v520_v25 = vld [vmem:[#allocation10 + $0x160] sm:$0xff]  ;;  %v522_v29 = vld [vmem:[#allocation10 + $0x170] sm:$0xff]  ;;  %v7259_v12 = vshrl.u32 %v156_v11, 7 }
  0x95   :  { %409 = vmatprep.mubr.f32.mxu1 %v6919_v0  ;;  %5118 = vmatmul.mubr.msk.f32.gmra.mrb[6].mxu0 %vm176_vm1, %v137_v1  ;;  %v139_v30 = vld [vmem:[#allocation5 + $0x28] sm:$0xff]  ;;  %v7172_v33 = vpack.c.bf16 %v523_v22, %v519_v20  ;;  %v7174_v34 = vpack.c.bf16 %v520_v25, %v516_v24  ;;  %v527_v37 = vld [vmem:[#allocation10 + $0x198] sm:$0xff]  ;;  %v7178_v38 = vpack.c.bf16 %v522_v29, %v518_v26  ;;  %v524_v43 = vld [vmem:[#allocation10 + $0x180] sm:$0xff] }
  0x96   :  { %5128 = vmatmul.mubr.msk.f32.gmra.mrb[6].mxu1 %vm176_vm1, %v137_v1  ;;  %5210 = vmatprep.subr.bf16.mxu0 %v7136_v2  ;;  %v525_v35 = vld [vmem:[#allocation10 + $0x188] sm:$0xff]  ;;  %v531_v42 = vld [vmem:[#allocation10 + $0x1b8] sm:$0xff]  ;;  %v528_v44 = vld [vmem:[#allocation10 + $0x1a0] sm:$0xff]  ;;  %v7262_v13 = vsub.s32 0, %v7259_v12  ;;  %v7268_v18 = vsub.s32 1, %v7259_v12  ;;  %v170_v29 = vsub.s32 3, %v7259_v12 }
  0x97   :  { %5242 = vmatprep.subr.bf16.mxu1 %v7140_v3  ;;  %5212 = vmatpush1.bf16.msra.mxu0 %v7142_v4  ;;  %v529_v36 = vld [vmem:[#allocation10 + $0x1a8] sm:$0xff]  ;;  %v526_v46 = vld [vmem:[#allocation10 + $0x190] sm:$0xff]  ;;  %v7188_v50 = vpack.c.bf16 %v531_v42, %v527_v37  ;;  %v7190_v51 = vpack.c.bf16 %v528_v44, %v524_v43  ;;  %v535_v57 = vld [vmem:[#allocation10 + $0x1d8] sm:$0xff] }
  0x98   :  { %5244 = vmatpush1.bf16.msra.mxu1 %v7146_v8  ;;  %302 = vmatprep.mubr.f32.mxu0 %v6919_v0  ;;  %v530_v47 = vld [vmem:[#allocation10 + $0x1b0] sm:$0xff]  ;;  %v7184_v49 = vpack.c.bf16 %v529_v36, %v525_v35  ;;  %v533_v55 = vld [vmem:[#allocation10 + $0x1c8] sm:$0xff]  ;;  %v539_v60 = vld [vmem:[#allocation10 + $0x1f8] sm:$0xff] }
  0x99   :  { %415 = vmatprep.mubr.f32.mxu1 %v6919_v0  ;;  %5119 = vmatmul.mubr.msk.f32.gmra.mrb[8].mxu0 %vm176_vm1, %v138_v14  ;;  %v140_v48 = vld [vmem:[#allocation5 + $0x30] sm:$0xff]  ;;  %v537_v56 = vld [vmem:[#allocation10 + $0x1e8] sm:$0xff]  ;;  %v7194_v59 = vpack.c.bf16 %v530_v47, %v526_v46  ;;  %v532_v61 = vld [vmem:[#allocation10 + $0x1c0] sm:$0xff]  ;;  %v7204_v7 = vpack.c.bf16 %v539_v60, %v535_v57 }
  0x9a   :  { %5129 = vmatmul.mubr.msk.f32.gmra.mrb[8].mxu1 %vm176_vm1, %v138_v14  ;;  %5214 = vmatprep.subr.bf16.mxu0 %v7152_v15  ;;  %v536_v62 = vld [vmem:[#allocation10 + $0x1e0] sm:$0xff]  ;;  %v534_v63 = vld [vmem:[#allocation10 + $0x1d0] sm:$0xff]  ;;  %v141_v5 = vld [vmem:[#allocation5 + $0x38] sm:$0xff]  ;;  %v7200_v6 = vpack.c.bf16 %v537_v56, %v533_v55 }
  0x9b   :  { %5246 = vmatprep.subr.bf16.mxu1 %v7156_v16  ;;  %5216 = vmatpush1.bf16.msra.mxu0 %v7158_v17  ;;  %v538_v1 = vld [vmem:[#allocation10 + $0x1f0] sm:$0xff]  ;;  %v7206_v9 = vpack.c.bf16 %v536_v62, %v532_v61  ;;  %v154_v14 = vld [vmem:[%s8263_s3] sm:$0xf] }
  0x9c   :  { %5248 = vmatpush1.bf16.msra.mxu1 %v7162_v21  ;;  %308 = vmatprep.mubr.f32.mxu0 %v6919_v0  ;;  %v7210_v10 = vpack.c.bf16 %v538_v1, %v534_v63  ;;  %v7271_v19 = vrot.slane %v154_v14, %v7262_v13  ;;  %v7288_v43 = vrot.slane %v154_v14, %v170_v29 }
  0x9d   :  { %421 = vmatprep.mubr.f32.mxu1 %v6919_v0  ;;  %5120 = vmatmul.mubr.msk.f32.gmra.mrb[10].mxu0 %vm176_vm1, %v139_v30 }
  0x9e   :  { %5130 = vmatmul.mubr.msk.f32.gmra.mrb[10].mxu1 %vm176_vm1, %v139_v30  ;;  %5218 = vmatprep.subr.bf16.mxu0 %v7168_v32 }
  0x9f   :  { %5250 = vmatprep.subr.bf16.mxu1 %v7172_v33  ;;  %5220 = vmatpush1.bf16.msra.mxu0 %v7174_v34 }
  0xa0   :  { %5252 = vmatpush1.bf16.msra.mxu1 %v7178_v38  ;;  %314 = vmatprep.mubr.f32.mxu0 %v6919_v0 }
  0xa1   :  { %427 = vmatprep.mubr.f32.mxu1 %v6919_v0  ;;  %5121 = vmatmul.mubr.msk.f32.gmra.mrb[12].mxu0 %vm176_vm1, %v140_v48 }
  0xa2   :  { %5131 = vmatmul.mubr.msk.f32.gmra.mrb[12].mxu1 %vm176_vm1, %v140_v48  ;;  %5222 = vmatprep.subr.bf16.mxu0 %v7184_v49 }
  0xa3   :  { %5254 = vmatprep.subr.bf16.mxu1 %v7188_v50  ;;  %5224 = vmatpush1.bf16.msra.mxu0 %v7190_v51 }
  0xa4   :  { %5256 = vmatpush1.bf16.msra.mxu1 %v7194_v59  ;;  %320 = vmatprep.mubr.f32.mxu0 %v6919_v0 }
  0xa5   :  { %433 = vmatprep.mubr.f32.mxu1 %v6919_v0  ;;  %5122 = vmatmul.mubr.msk.f32.gmra.mrb[14].mxu0 %vm176_vm1, %v141_v5 }
  0xa6   :  { %5132 = vmatmul.mubr.msk.f32.gmra.mrb[14].mxu1 %vm176_vm1, %v141_v5  ;;  %5226 = vmatprep.subr.bf16.mxu0 %v7200_v6 }
  0xa7   :  { %5258 = vmatprep.subr.bf16.mxu1 %v7204_v7  ;;  %5228 = vmatpush1.bf16.msra.mxu0 %v7206_v9 }
  0xa8   :  { %5260 = vmatpush1.bf16.msra.mxu1 %v7210_v10  ;;  %604 = vmatprep.mubr.f32.mxu0 %v6919_v0 }
  0xa9   :  { %675 = vmatprep.mubr.f32.mxu1 %v6919_v0  ;;  %5262 = vmatprep.subr.bf16.mxu0 %v7091_v23 }
  0xaa   :  { %605 = vmatmul.mubr.f32.vlgmr.msra.gmra.mrb[0].mxu0 %v6919_v0  ;;  %5294 = vmatprep.subr.bf16.mxu1 %v7093_v27 }
  0xab   :  { %676 = vmatmul.mubr.f32.vlgmr.msra.gmra.mrb[0].mxu1 %v6919_v0  ;;  %5264 = vmatpush1.bf16.msra.mxu0 %v7095_v28 }
  0xac   :  { %5296 = vmatpush1.bf16.msra.mxu1 %v7098_v31  ;;  %5266 = vmatprep.subr.bf16.mxu0 %v7104_v39 }
  0xad   :  { %5298 = vmatprep.subr.bf16.mxu1 %v7108_v40  ;;  %838 = vmatprep.mubr.f32.mxu0 %v6919_v0 }
  0xae   :  { %909 = vmatprep.mubr.f32.mxu1 %v6919_v0 }
  0xaf   :  { %5268 = vmatpush1.bf16.msra.mxu0 %v7110_v41 }
  0xb0   :  { %5300 = vmatpush1.bf16.msra.mxu1 %v7114_v45  ;;  %5270 = vmatprep.subr.bf16.mxu0 %v7120_v52 }
  0xb1   :  { %5302 = vmatprep.subr.bf16.mxu1 %v7124_v53 }
  0xb3   :  { %5272 = vmatpush1.bf16.msra.mxu0 %v7126_v54 }
  0xb4   :  { %5304 = vmatpush1.bf16.msra.mxu1 %v7130_v58  ;;  %5274 = vmatprep.subr.bf16.mxu0 %v7136_v2 }
  0xb5   :  { %5306 = vmatprep.subr.bf16.mxu1 %v7140_v3 }
  0xb7   :  { %5276 = vmatpush1.bf16.msra.mxu0 %v7142_v4 }
  0xb8   :  { %5308 = vmatpush1.bf16.msra.mxu1 %v7146_v8  ;;  %5278 = vmatprep.subr.bf16.mxu0 %v7152_v15 }
  0xb9   :  { %5310 = vmatprep.subr.bf16.mxu1 %v7156_v16 }
  0xbb   :  { %5280 = vmatpush1.bf16.msra.mxu0 %v7158_v17 }
  0xbc   :  { %5312 = vmatpush1.bf16.msra.mxu1 %v7162_v21  ;;  %5282 = vmatprep.subr.bf16.mxu0 %v7168_v32 }
  0xbd   :  { %5314 = vmatprep.subr.bf16.mxu1 %v7172_v33 }
  0xbf   :  { %5284 = vmatpush1.bf16.msra.mxu0 %v7174_v34 }
  0xc0   :  { %5316 = vmatpush1.bf16.msra.mxu1 %v7178_v38  ;;  %5286 = vmatprep.subr.bf16.mxu0 %v7184_v49 }
  0xc1   :  { %5318 = vmatprep.subr.bf16.mxu1 %v7188_v50 }
  0xc3   :  { %5288 = vmatpush1.bf16.msra.mxu0 %v7190_v51 }
  0xc4   :  { %5320 = vmatpush1.bf16.msra.mxu1 %v7194_v59  ;;  %5290 = vmatprep.subr.bf16.mxu0 %v7200_v6 }
  0xc5   :  { %5322 = vmatprep.subr.bf16.mxu1 %v7204_v7 }
  0xc7   :  { %5292 = vmatpush1.bf16.msra.mxu0 %v7206_v9 }
  0xc8   :  { %5324 = vmatpush1.bf16.msra.mxu1 %v7210_v10  ;;  %5326 = vmatprep.subr.bf16.mxu0 %v7091_v23  ;;  %v7274_v23 = vsub.s32 2, %v7259_v12 }
  0xc9   :  { %5358 = vmatprep.subr.bf16.mxu1 %v7093_v27  ;;  %v7277_v27 = vrot.slane %v154_v14, %v7268_v18 }
  0xca   :  { %v7281_v24 = vrot.slane %v154_v14, %v7274_v23 }
 0x17d   :  { %v606_v20 = vpop.f32.mrb[0].mxu0 }
 0x17e   :  { %v6413_v22 = vadd.f32 %v606_v20, %v7271_v19  ;;  %v677_v25 = vpop.f32.mrb[0].mxu1  ;;  %v608_v26 = vpop.f32.mrb[1].mxu0 }
 0x17f   :  { %v6414_v30 = vadd.f32 %v608_v26, %v7277_v27  ;;  %v679_v35 = vpop.f32.mrb[1].mxu1  ;;  %v6429_v42 = vadd.f32 %v677_v25, %v7281_v24 }
 0x180   :  { %v686_v36 = vmul.f32 0.5, %v6413_v22  ;;  %v6430_v44 = vadd.f32 %v679_v35, %v7288_v43 }
 0x181   :  { %v690_v37 = vmul.f32 0.5, %v6414_v30 }
 0x182   :  { %6558 = vtanh.f32 %v686_v36  ;;  %v695_v46 = vmul.f32 0.5, %v6430_v44 }
 0x183   :  { %6560 = vtanh.f32 %v690_v37 }
 0x184   :  { %6562 = vtanh.f32 %v6429_v42 }
 0x185   :  { %6564 = vtanh.f32 %v695_v46 }
 0x18c   :  { %v6559_v47 = vpop.eup %6558 }
 0x18d   :  { %v6561_v48 = vpop.eup %6560  ;;  %v688_v55 = vmul.f32 0.5, %v6559_v47 }
 0x18e   :  { %v692_v56 = vmul.f32 0.5, %v6561_v48  ;;  %v6563_v60 = vpop.eup %6562 }
 0x18f   :  { %v689_v57 = vadd.f32 0.5, %v688_v55  ;;  %v6565_v5 = vpop.eup %6564 }
 0x190   :  { %v693_v61 = vadd.f32 0.5, %v692_v56  ;;  %v697_v11 = vmul.f32 0.5, %v6565_v5 }
 0x191   :  { %v700_v62 = vmul.f32 %v6563_v60, %v689_v57 }
 0x192   :  { %v699_v63 = vmul.f32 0.0, %v693_v61  ;;  %v698_v14 = vadd.f32 0.5, %v697_v11 }
 0x194   :  { %v7291_v1 = vadd.f32 %v700_v62, %v699_v63 }
 0x196   :  { %6566 = vtanh.f32 %v7291_v1 }
 0x1a0   :  { %v6567_v20 = vpop.eup %6566 }
 0x1a1   :  { %v7294_v22 = vmul.f32 %v6567_v20, %v698_v14  ;;  %v1181_v14 = vld [vmem:[#allocation10 + $0x8] sm:$0xff]  ;;  %v1183_v20 = vld [vmem:[#allocation10 + $0x18] sm:$0xff] }
 0x1a3   :  { %839 = vmatmul.mubr.f32.vlgmr.msra.gmra.mrb[2].mxu0 %v7294_v22  ;;  %910 = vmatmul.mubr.f32.vlgmr.msra.gmra.mrb[2].mxu1 %v7294_v22 }
 0x1a4   :  { %5328 = vmatpush1.bf16.msra.mxu0 %v7095_v28  ;;  %5360 = vmatpush1.bf16.msra.mxu1 %v7098_v31 }
 0x1a5   :  { %5330 = vmatprep.subr.bf16.mxu0 %v7104_v39  ;;  %5362 = vmatprep.subr.bf16.mxu1 %v7108_v40 }
 0x1a6   :  { %1073 = vmatprep.mubr.f32.mxu0 %v6919_v0  ;;  %1144 = vmatprep.mubr.f32.mxu1 %v6919_v0 }
 0x1a8   :  { %5332 = vmatpush1.bf16.msra.mxu0 %v7110_v41  ;;  %5364 = vmatpush1.bf16.msra.mxu1 %v7114_v45 }
 0x1a9   :  { %5334 = vmatprep.subr.bf16.mxu0 %v7120_v52  ;;  %5366 = vmatprep.subr.bf16.mxu1 %v7124_v53 }
 0x1ac   :  { %5336 = vmatpush1.bf16.msra.mxu0 %v7126_v54  ;;  %5368 = vmatpush1.bf16.msra.mxu1 %v7130_v58 }
 0x1ad   :  { %5338 = vmatprep.subr.bf16.mxu0 %v7136_v2  ;;  %5370 = vmatprep.subr.bf16.mxu1 %v7140_v3 }
 0x1b0   :  { %5340 = vmatpush1.bf16.msra.mxu0 %v7142_v4  ;;  %5372 = vmatpush1.bf16.msra.mxu1 %v7146_v8 }
 0x1b1   :  { %5342 = vmatprep.subr.bf16.mxu0 %v7152_v15  ;;  %5374 = vmatprep.subr.bf16.mxu1 %v7156_v16 }
 0x1b4   :  { %5344 = vmatpush1.bf16.msra.mxu0 %v7158_v17  ;;  %5376 = vmatpush1.bf16.msra.mxu1 %v7162_v21 }
 0x1b5   :  { %5346 = vmatprep.subr.bf16.mxu0 %v7168_v32  ;;  %5378 = vmatprep.subr.bf16.mxu1 %v7172_v33 }
 0x1b8   :  { %5348 = vmatpush1.bf16.msra.mxu0 %v7174_v34  ;;  %5380 = vmatpush1.bf16.msra.mxu1 %v7178_v38 }
 0x1b9   :  { %5350 = vmatprep.subr.bf16.mxu0 %v7184_v49  ;;  %5382 = vmatprep.subr.bf16.mxu1 %v7188_v50 }
 0x1bc   :  { %5352 = vmatpush1.bf16.msra.mxu0 %v7190_v51  ;;  %5384 = vmatpush1.bf16.msra.mxu1 %v7194_v59 }
 0x1bd   :  { %5354 = vmatprep.subr.bf16.mxu0 %v7200_v6  ;;  %5386 = vmatprep.subr.bf16.mxu1 %v7204_v7 }
 0x1c0   :  { %5356 = vmatpush1.bf16.msra.mxu0 %v7206_v9  ;;  %5388 = vmatpush1.bf16.msra.mxu1 %v7210_v10 }
 0x276   :  { %v840_v28 = vpop.f32.mrb[2].mxu0  ;;  %v911_v31 = vpop.f32.mrb[2].mxu1 }
 0x277   :  { %v6415_v39 = vadd.f32 %v840_v28, %v7271_v19  ;;  %v842_v40 = vpop.f32.mrb[3].mxu0  ;;  %v913_v41 = vpop.f32.mrb[3].mxu1  ;;  %v6431_v30 = vadd.f32 %v911_v31, %v7281_v24  ;;  %v1187_v31 = vld [vmem:[#allocation10 + $0x38] sm:$0xff] }
 0x278   :  { %v6416_v45 = vadd.f32 %v842_v40, %v7277_v27  ;;  %v6432_v35 = vadd.f32 %v913_v41, %v7288_v43  ;;  %v1184_v40 = vld [vmem:[#allocation10 + $0x20] sm:$0xff]  ;;  %v7346_v41 = vpack.c.bf16 %v1187_v31, %v1183_v20  ;;  %v1438_v20 = vld [vmem:[#allocation10 + $0xb8] sm:$0xff] }
 0x279   :  { %v920_v25 = vmul.f32 0.5, %v6415_v39  ;;  %v1180_v39 = vld [vmem:[#allocation10] sm:$0xff] }
 0x27a   :  { %v924_v26 = vmul.f32 0.5, %v6416_v45  ;;  %v929_v36 = vmul.f32 0.5, %v6432_v35  ;;  %v7348_v45 = vpack.c.bf16 %v1184_v40, %v1180_v39  ;;  %5422 = vmatprep.subr.bf16.mxu1 %v7346_v41  ;;  %v1189_v35 = vld [vmem:[#allocation10 + $0x48] sm:$0xff]  ;;  %v1431_v31 = vld [vmem:[#allocation10 + $0x80] sm:$0xff] }
 0x27b   :  { %6568 = vtanh.f32 %v920_v25  ;;  %v1182_v25 = vld [vmem:[#allocation10 + $0x10] sm:$0xff]  ;;  %v1435_v39 = vld [vmem:[#allocation10 + $0xa0] sm:$0xff] }
 0x27c   :  { %6570 = vtanh.f32 %v924_v26  ;;  %v1186_v26 = vld [vmem:[#allocation10 + $0x30] sm:$0xff] }
 0x27d   :  { %6572 = vtanh.f32 %v6431_v30  ;;  %v7351_v30 = vpack.c.bf16 %v1186_v26, %v1182_v25  ;;  %v7418_v25 = vpack.c.bf16 %v1435_v39, %v1431_v31  ;;  %v1433_v26 = vld [vmem:[#allocation10 + $0x90] sm:$0xff] }
 0x27e   :  { %6574 = vtanh.f32 %v929_v36  ;;  %v1193_v36 = vld [vmem:[#allocation10 + $0x68] sm:$0xff]  ;;  %v1461_v31 = vld [vmem:[#allocation10 + $0x170] sm:$0xff] }
 0x285   :  { %v6569_v37 = vpop.eup %6568 }
 0x286   :  { %v6571_v42 = vpop.eup %6570  ;;  %v922_v44 = vmul.f32 0.5, %v6569_v37  ;;  %v1191_v37 = vld [vmem:[#allocation10 + $0x58] sm:$0xff] }
 0x287   :  { %v926_v46 = vmul.f32 0.5, %v6571_v42  ;;  %v6573_v48 = vpop.eup %6572  ;;  %v7356_v42 = vpack.c.bf16 %v1193_v36, %v1189_v35  ;;  %v1437_v35 = vld [vmem:[#allocation10 + $0xb0] sm:$0xff] }
 0x288   :  { %v923_v47 = vadd.f32 0.5, %v922_v44  ;;  %v6575_v61 = vpop.eup %6574  ;;  %v1195_v44 = vld [vmem:[#allocation10 + $0x78] sm:$0xff]  ;;  %v7421_v36 = vpack.c.bf16 %v1437_v35, %v1433_v26  ;;  %v1464_v26 = vld [vmem:[#allocation10 + $0x188] sm:$0xff] }
 0x289   :  { %v927_v55 = vadd.f32 0.5, %v926_v46  ;;  %v931_v62 = vmul.f32 0.5, %v6575_v61  ;;  %v1188_v46 = vld [vmem:[#allocation10 + $0x40] sm:$0xff]  ;;  %v1468_v35 = vld [vmem:[#allocation10 + $0x1a8] sm:$0xff] }
 0x28a   :  { %v934_v56 = vmul.f32 %v6573_v48, %v923_v47  ;;  %v1192_v47 = vld [vmem:[#allocation10 + $0x60] sm:$0xff]  ;;  %v7358_v48 = vpack.c.bf16 %v1195_v44, %v1191_v37  ;;  %v1440_v37 = vld [vmem:[#allocation10 + $0xc8] sm:$0xff] }
 0x28b   :  { %v933_v57 = vmul.f32 %v927_v55, %v7291_v1  ;;  %v932_v63 = vadd.f32 0.5, %v931_v62  ;;  %v1185_v1 = vld [vmem:[#allocation10 + $0x28] sm:$0xff]  ;;  %v7360_v55 = vpack.c.bf16 %v1192_v47, %v1188_v46  ;;  %v1442_v46 = vld [vmem:[#allocation10 + $0xd8] sm:$0xff] }
 0x28c   :  { %v7344_v28 = vpack.c.bf16 %v1185_v1, %v1181_v14  ;;  %v1434_v14 = vld [vmem:[#allocation10 + $0x98] sm:$0xff]  ;;  %v1444_v44 = vld [vmem:[#allocation10 + $0xe8] sm:$0xff] }
 0x28d   :  { %v7335_v60 = vadd.f32 %v934_v56, %v933_v57  ;;  %v1190_v56 = vld [vmem:[#allocation10 + $0x50] sm:$0xff]  ;;  %v7416_v40 = vpack.c.bf16 %v1438_v20, %v1434_v14  ;;  %v7426_v47 = vpack.c.bf16 %v1444_v44, %v1440_v37  ;;  %v1466_v37 = vld [vmem:[#allocation10 + $0x198] sm:$0xff]  ;;  %v7462_v44 = vpack.c.bf16 %v1468_v35, %v1464_v26 }
 0x28e   :  { %5390 = vmatprep.subr.bf16.mxu0 %v7344_v28  ;;  %v1194_v57 = vld [vmem:[#allocation10 + $0x70] sm:$0xff] }
 0x28f   :  { %6576 = vtanh.f32 %v7335_v60  ;;  %v7363_v61 = vpack.c.bf16 %v1194_v57, %v1190_v56  ;;  %v1446_v56 = vld [vmem:[#allocation10 + $0xf8] sm:$0xff]  ;;  %v1439_v57 = vld [vmem:[#allocation10 + $0xc0] sm:$0xff]  ;;  %v1457_v20 = vld [vmem:[#allocation10 + $0x150] sm:$0xff] }
 0x290   :  { %v7457_v39 = vpack.c.bf16 %v1461_v31, %v1457_v20 }
 0x299   :  { %v6577_v5 = vpop.eup %6576 }
 0x29a   :  { %v7338_v11 = vmul.f32 %v6577_v5, %v932_v63  ;;  %v1436_v5 = vld [vmem:[#allocation10 + $0xa8] sm:$0xff] }
 0x29c   :  { %1074 = vmatmul.mubr.f32.vlgmr.msra.gmra.mrb[4].mxu0 %v7338_v11  ;;  %1145 = vmatmul.mubr.f32.vlgmr.msra.gmra.mrb[4].mxu1 %v7338_v11 }
 0x29d   :  { %1308 = vmatprep.mubr.f32.mxu0 %v6919_v0  ;;  %1379 = vmatprep.mubr.f32.mxu1 %v6919_v0 }
 0x29e   :  { %5392 = vmatpush1.bf16.msra.mxu0 %v7348_v45  ;;  %5424 = vmatpush1.bf16.msra.mxu1 %v7351_v30 }
 0x29f   :  { %5394 = vmatprep.subr.bf16.mxu0 %v7356_v42  ;;  %5426 = vmatprep.subr.bf16.mxu1 %v7358_v48 }
 0x2a2   :  { %5396 = vmatpush1.bf16.msra.mxu0 %v7360_v55  ;;  %5428 = vmatpush1.bf16.msra.mxu1 %v7363_v61 }
 0x2a3   :  { %5398 = vmatprep.subr.bf16.mxu0 %v7120_v52  ;;  %5430 = vmatprep.subr.bf16.mxu1 %v7124_v53 }
 0x2a6   :  { %5400 = vmatpush1.bf16.msra.mxu0 %v7126_v54  ;;  %5432 = vmatpush1.bf16.msra.mxu1 %v7130_v58 }
 0x2a7   :  { %5402 = vmatprep.subr.bf16.mxu0 %v7136_v2  ;;  %5434 = vmatprep.subr.bf16.mxu1 %v7140_v3 }
 0x2aa   :  { %5404 = vmatpush1.bf16.msra.mxu0 %v7142_v4  ;;  %5436 = vmatpush1.bf16.msra.mxu1 %v7146_v8 }
 0x2ab   :  { %5406 = vmatprep.subr.bf16.mxu0 %v7152_v15  ;;  %5438 = vmatprep.subr.bf16.mxu1 %v7156_v16 }
 0x2ae   :  { %5408 = vmatpush1.bf16.msra.mxu0 %v7158_v17  ;;  %5440 = vmatpush1.bf16.msra.mxu1 %v7162_v21 }
 0x2af   :  { %5410 = vmatprep.subr.bf16.mxu0 %v7168_v32  ;;  %5442 = vmatprep.subr.bf16.mxu1 %v7172_v33 }
 0x2b2   :  { %5412 = vmatpush1.bf16.msra.mxu0 %v7174_v34  ;;  %5444 = vmatpush1.bf16.msra.mxu1 %v7178_v38 }
 0x2b3   :  { %5414 = vmatprep.subr.bf16.mxu0 %v7184_v49  ;;  %5446 = vmatprep.subr.bf16.mxu1 %v7188_v50 }
 0x2b6   :  { %5416 = vmatpush1.bf16.msra.mxu0 %v7190_v51  ;;  %5448 = vmatpush1.bf16.msra.mxu1 %v7194_v59 }
 0x2b7   :  { %5418 = vmatprep.subr.bf16.mxu0 %v7200_v6  ;;  %5450 = vmatprep.subr.bf16.mxu1 %v7204_v7 }
 0x2ba   :  { %5420 = vmatpush1.bf16.msra.mxu0 %v7206_v9  ;;  %5452 = vmatpush1.bf16.msra.mxu1 %v7210_v10 }
 0x2bb   :  { %5454 = vmatprep.subr.bf16.mxu0 %v7344_v28  ;;  %5486 = vmatprep.subr.bf16.mxu1 %v7346_v41 }
 0x36f   :  { %v1075_v52 = vpop.f32.mrb[4].mxu0  ;;  %v1146_v53 = vpop.f32.mrb[4].mxu1 }
 0x370   :  { %v6417_v54 = vadd.f32 %v1075_v52, %v7271_v19  ;;  %v1077_v58 = vpop.f32.mrb[5].mxu0  ;;  %v1148_v2 = vpop.f32.mrb[5].mxu1  ;;  %v6433_v15 = vadd.f32 %v1146_v53, %v7281_v24  ;;  %v1443_v52 = vld [vmem:[#allocation10 + $0xe0] sm:$0xff]  ;;  %v7428_v53 = vpack.c.bf16 %v1446_v56, %v1442_v46  ;;  %v1470_v46 = vld [vmem:[#allocation10 + $0x1b8] sm:$0xff] }
 0x371   :  { %v6418_v3 = vadd.f32 %v1077_v58, %v7277_v27  ;;  %v6434_v16 = vadd.f32 %v1148_v2, %v7288_v43  ;;  %v1441_v58 = vld [vmem:[#allocation10 + $0xd0] sm:$0xff]  ;;  %v1463_v56 = vld [vmem:[#allocation10 + $0x180] sm:$0xff] }
 0x372   :  { %v1155_v4 = vmul.f32 0.5, %v6417_v54  ;;  %v7430_v54 = vpack.c.bf16 %v1443_v52, %v1439_v57  ;;  %v1445_v2 = vld [vmem:[#allocation10 + $0xf0] sm:$0xff]  ;;  %v1467_v57 = vld [vmem:[#allocation10 + $0x1a0] sm:$0xff]  ;;  %v7464_v52 = vpack.c.bf16 %v1470_v46, %v1466_v37 }
 0x373   :  { %v1159_v8 = vmul.f32 0.5, %v6418_v3  ;;  %v1164_v17 = vmul.f32 0.5, %v6434_v16  ;;  %v7433_v3 = vpack.c.bf16 %v1445_v2, %v1441_v58  ;;  %v7466_v58 = vpack.c.bf16 %v1467_v57, %v1463_v56  ;;  %v1465_v2 = vld [vmem:[#allocation10 + $0x190] sm:$0xff] }
 0x374   :  { %6578 = vtanh.f32 %v1155_v4  ;;  %v1448_v4 = vld [vmem:[#allocation10 + $0x108] sm:$0xff] }
 0x375   :  { %6580 = vtanh.f32 %v1159_v8  ;;  %v1452_v8 = vld [vmem:[#allocation10 + $0x128] sm:$0xff] }
 0x376   :  { %6582 = vtanh.f32 %v6433_v15  ;;  %v1450_v15 = vld [vmem:[#allocation10 + $0x118] sm:$0xff]  ;;  %v7438_v16 = vpack.c.bf16 %v1452_v8, %v1448_v4  ;;  %v1469_v4 = vld [vmem:[#allocation10 + $0x1b0] sm:$0xff] }
 0x377   :  { %6584 = vtanh.f32 %v1164_v17  ;;  %v1454_v17 = vld [vmem:[#allocation10 + $0x138] sm:$0xff]  ;;  %v7469_v8 = vpack.c.bf16 %v1469_v4, %v1465_v2 }
 0x37e   :  { %v6579_v21 = vpop.eup %6578 }
 0x37f   :  { %v6581_v32 = vpop.eup %6580  ;;  %v1157_v33 = vmul.f32 0.5, %v6579_v21  ;;  %v1447_v21 = vld [vmem:[#allocation10 + $0x100] sm:$0xff] }
 0x380   :  { %v1161_v34 = vmul.f32 0.5, %v6581_v32  ;;  %v6583_v49 = vpop.eup %6582  ;;  %v1451_v32 = vld [vmem:[#allocation10 + $0x120] sm:$0xff] }
 0x381   :  { %v1158_v38 = vadd.f32 0.5, %v1157_v33  ;;  %v6585_v7 = vpop.eup %6584  ;;  %v7440_v33 = vpack.c.bf16 %v1454_v17, %v1450_v15  ;;  %v1472_v15 = vld [vmem:[#allocation10 + $0x1c8] sm:$0xff] }
 0x382   :  { %v1162_v50 = vadd.f32 0.5, %v1161_v34  ;;  %v1166_v9 = vmul.f32 0.5, %v6585_v7  ;;  %v7442_v34 = vpack.c.bf16 %v1451_v32, %v1447_v21  ;;  %v1458_v7 = vld [vmem:[#allocation10 + $0x158] sm:$0xff]  ;;  %v1476_v17 = vld [vmem:[#allocation10 + $0x1e8] sm:$0xff] }
 0x383   :  { %v1169_v51 = vmul.f32 %v6583_v49, %v1158_v38  ;;  %v1449_v38 = vld [vmem:[#allocation10 + $0x110] sm:$0xff]  ;;  %v1474_v21 = vld [vmem:[#allocation10 + $0x1d8] sm:$0xff]  ;;  %v7474_v32 = vpack.c.bf16 %v1476_v17, %v1472_v15 }
 0x384   :  { %v1168_v59 = vmul.f32 %v1162_v50, %v7335_v60  ;;  %v1167_v10 = vadd.f32 0.5, %v1166_v9  ;;  %v1432_v60 = vld [vmem:[#allocation10 + $0x88] sm:$0xff]  ;;  %v1453_v49 = vld [vmem:[#allocation10 + $0x130] sm:$0xff] }
 0x385   :  { %v7414_v1 = vpack.c.bf16 %v1436_v5, %v1432_v60  ;;  %v7445_v50 = vpack.c.bf16 %v1453_v49, %v1449_v38  ;;  %v1459_v60 = vld [vmem:[#allocation10 + $0x160] sm:$0xff]  ;;  %v1478_v38 = vld [vmem:[#allocation10 + $0x1f8] sm:$0xff] }
 0x386   :  { %v7399_v6 = vadd.f32 %v1169_v51, %v1168_v59  ;;  %v1456_v51 = vld [vmem:[#allocation10 + $0x148] sm:$0xff]  ;;  %v1471_v49 = vld [vmem:[#allocation10 + $0x1c0] sm:$0xff] }
 0x387   :  { %v1460_v59 = vld [vmem:[#allocation10 + $0x168] sm:$0xff] }
 0x388   :  { %6586 = vtanh.f32 %v7399_v6  ;;  %v7450_v9 = vpack.c.bf16 %v1460_v59, %v1456_v51  ;;  %v1475_v51 = vld [vmem:[#allocation10 + $0x1e0] sm:$0xff]  ;;  %v7476_v59 = vpack.c.bf16 %v1478_v38, %v1474_v21 }
 0x392   :  { %v6587_v62 = vpop.eup %6586 }
 0x393   :  { %v7402_v63 = vmul.f32 %v6587_v62, %v1167_v10  ;;  %v1462_v10 = vld [vmem:[#allocation10 + $0x178] sm:$0xff]  ;;  %v1455_v62 = vld [vmem:[#allocation10 + $0x140] sm:$0xff] }
 0x394   :  { %v7452_v5 = vpack.c.bf16 %v1462_v10, %v1458_v7  ;;  %v7454_v14 = vpack.c.bf16 %v1459_v60, %v1455_v62  ;;  %v7478_v7 = vpack.c.bf16 %v1475_v51, %v1471_v49  ;;  %v1473_v10 = vld [vmem:[#allocation10 + $0x1d0] sm:$0xff] }
 0x395   :  { %1309 = vmatmul.mubr.f32.vlgmr.msra.gmra.mrb[6].mxu0 %v7402_v63  ;;  %1380 = vmatmul.mubr.f32.vlgmr.msra.gmra.mrb[6].mxu1 %v7402_v63  ;;  %v1477_v62 = vld [vmem:[#allocation10 + $0x1f0] sm:$0xff] }
 0x396   :  { %5456 = vmatpush1.bf16.msra.mxu0 %v7348_v45  ;;  %5488 = vmatpush1.bf16.msra.mxu1 %v7351_v30  ;;  %v7481_v60 = vpack.c.bf16 %v1477_v62, %v1473_v10 }
 0x397   :  { %5458 = vmatprep.subr.bf16.mxu0 %v7356_v42  ;;  %5490 = vmatprep.subr.bf16.mxu1 %v7358_v48 }
 0x398   :  { %1543 = vmatprep.mubr.f32.mxu0 %v6919_v0  ;;  %1614 = vmatprep.mubr.f32.mxu1 %v6919_v0 }
 0x39a   :  { %5460 = vmatpush1.bf16.msra.mxu0 %v7360_v55  ;;  %5492 = vmatpush1.bf16.msra.mxu1 %v7363_v61 }
 0x39b   :  { %5462 = vmatprep.subr.bf16.mxu0 %v7414_v1  ;;  %5494 = vmatprep.subr.bf16.mxu1 %v7416_v40 }
 0x39e   :  { %5464 = vmatpush1.bf16.msra.mxu0 %v7418_v25  ;;  %5496 = vmatpush1.bf16.msra.mxu1 %v7421_v36 }
 0x39f   :  { %5466 = vmatprep.subr.bf16.mxu0 %v7426_v47  ;;  %5498 = vmatprep.subr.bf16.mxu1 %v7428_v53 }
 0x3a2   :  { %5468 = vmatpush1.bf16.msra.mxu0 %v7430_v54  ;;  %5500 = vmatpush1.bf16.msra.mxu1 %v7433_v3 }
 0x3a3   :  { %5470 = vmatprep.subr.bf16.mxu0 %v7438_v16  ;;  %5502 = vmatprep.subr.bf16.mxu1 %v7440_v33 }
 0x3a6   :  { %5472 = vmatpush1.bf16.msra.mxu0 %v7442_v34  ;;  %5504 = vmatpush1.bf16.msra.mxu1 %v7445_v50 }
 0x3a7   :  { %5474 = vmatprep.subr.bf16.mxu0 %v7450_v9  ;;  %5506 = vmatprep.subr.bf16.mxu1 %v7452_v5 }
 0x3aa   :  { %5476 = vmatpush1.bf16.msra.mxu0 %v7454_v14  ;;  %5508 = vmatpush1.bf16.msra.mxu1 %v7457_v39 }
 0x3ab   :  { %5478 = vmatprep.subr.bf16.mxu0 %v7462_v44  ;;  %5510 = vmatprep.subr.bf16.mxu1 %v7464_v52 }
 0x3ae   :  { %5480 = vmatpush1.bf16.msra.mxu0 %v7466_v58  ;;  %5512 = vmatpush1.bf16.msra.mxu1 %v7469_v8 }
 0x3af   :  { %5482 = vmatprep.subr.bf16.mxu0 %v7474_v32  ;;  %5514 = vmatprep.subr.bf16.mxu1 %v7476_v59 }
 0x3b2   :  { %5484 = vmatpush1.bf16.msra.mxu0 %v7478_v7  ;;  %5516 = vmatpush1.bf16.msra.mxu1 %v7481_v60 }
 0x3b3   :  { %5518 = vmatprep.subr.bf16.mxu0 %v7344_v28  ;;  %5550 = vmatprep.subr.bf16.mxu1 %v7346_v41 }
 0x468   :  { %v1310_v20 = vpop.f32.mrb[6].mxu0  ;;  %v1381_v31 = vpop.f32.mrb[6].mxu1 }
 0x469   :  { %v6419_v26 = vadd.f32 %v1310_v20, %v7271_v19  ;;  %v1312_v35 = vpop.f32.mrb[7].mxu0  ;;  %v1383_v37 = vpop.f32.mrb[7].mxu1  ;;  %v6435_v2 = vadd.f32 %v1381_v31, %v7281_v24 }
 0x46a   :  { %v6420_v46 = vadd.f32 %v1312_v35, %v7277_v27  ;;  %v6436_v4 = vadd.f32 %v1383_v37, %v7288_v43 }
 0x46b   :  { %v1390_v56 = vmul.f32 0.5, %v6419_v26 }
 0x46c   :  { %v1394_v57 = vmul.f32 0.5, %v6420_v46  ;;  %v1399_v15 = vmul.f32 0.5, %v6436_v4 }
 0x46d   :  { %6588 = vtanh.f32 %v1390_v56 }
 0x46e   :  { %6590 = vtanh.f32 %v1394_v57 }
 0x46f   :  { %6592 = vtanh.f32 %v6435_v2 }
 0x470   :  { %6594 = vtanh.f32 %v1399_v15 }
 0x477   :  { %v6589_v17 = vpop.eup %6588 }
 0x478   :  { %v6591_v21 = vpop.eup %6590  ;;  %v1392_v38 = vmul.f32 0.5, %v6589_v17 }
 0x479   :  { %v1396_v49 = vmul.f32 0.5, %v6591_v21  ;;  %v6593_v10 = vpop.eup %6592 }
 0x47a   :  { %v1393_v51 = vadd.f32 0.5, %v1392_v38  ;;  %v6595_v31 = vpop.eup %6594 }
 0x47b   :  { %v1397_v62 = vadd.f32 0.5, %v1396_v49  ;;  %v1401_v46 = vmul.f32 0.5, %v6595_v31 }
 0x47c   :  { %v1404_v20 = vmul.f32 %v6593_v10, %v1393_v51 }
 0x47d   :  { %v1403_v26 = vmul.f32 %v1397_v62, %v7399_v6  ;;  %v1402_v56 = vadd.f32 0.5, %v1401_v46 }
 0x47f   :  { %v7493_v35 = vadd.f32 %v1404_v20, %v1403_v26 }
 0x481   :  { %6596 = vtanh.f32 %v7493_v35 }
 0x48b   :  { %v6597_v37 = vpop.eup %6596 }
 0x48c   :  { %v7496_v57 = vmul.f32 %v6597_v37, %v1402_v56 }
 0x48e   :  { %1544 = vmatmul.mubr.f32.vlgmr.msra.gmra.mrb[8].mxu0 %v7496_v57  ;;  %1615 = vmatmul.mubr.f32.vlgmr.msra.gmra.mrb[8].mxu1 %v7496_v57 }
 0x48f   :  { %5520 = vmatpush1.bf16.msra.mxu0 %v7348_v45  ;;  %5552 = vmatpush1.bf16.msra.mxu1 %v7351_v30 }
 0x490   :  { %5522 = vmatprep.subr.bf16.mxu0 %v7356_v42  ;;  %5554 = vmatprep.subr.bf16.mxu1 %v7358_v48 }
 0x491   :  { %1778 = vmatprep.mubr.f32.mxu0 %v6919_v0  ;;  %1849 = vmatprep.mubr.f32.mxu1 %v6919_v0 }
 0x493   :  { %5524 = vmatpush1.bf16.msra.mxu0 %v7360_v55  ;;  %5556 = vmatpush1.bf16.msra.mxu1 %v7363_v61 }
 0x494   :  { %5526 = vmatprep.subr.bf16.mxu0 %v7414_v1  ;;  %5558 = vmatprep.subr.bf16.mxu1 %v7416_v40 }
 0x497   :  { %5528 = vmatpush1.bf16.msra.mxu0 %v7418_v25  ;;  %5560 = vmatpush1.bf16.msra.mxu1 %v7421_v36 }
 0x498   :  { %5530 = vmatprep.subr.bf16.mxu0 %v7426_v47  ;;  %5562 = vmatprep.subr.bf16.mxu1 %v7428_v53 }
 0x49b   :  { %5532 = vmatpush1.bf16.msra.mxu0 %v7430_v54  ;;  %5564 = vmatpush1.bf16.msra.mxu1 %v7433_v3 }
 0x49c   :  { %5534 = vmatprep.subr.bf16.mxu0 %v7438_v16  ;;  %5566 = vmatprep.subr.bf16.mxu1 %v7440_v33 }
 0x49f   :  { %5536 = vmatpush1.bf16.msra.mxu0 %v7442_v34  ;;  %5568 = vmatpush1.bf16.msra.mxu1 %v7445_v50 }
 0x4a0   :  { %5538 = vmatprep.subr.bf16.mxu0 %v7450_v9  ;;  %5570 = vmatprep.subr.bf16.mxu1 %v7452_v5 }
 0x4a3   :  { %5540 = vmatpush1.bf16.msra.mxu0 %v7454_v14  ;;  %5572 = vmatpush1.bf16.msra.mxu1 %v7457_v39 }
 0x4a4   :  { %5542 = vmatprep.subr.bf16.mxu0 %v7462_v44  ;;  %5574 = vmatprep.subr.bf16.mxu1 %v7464_v52 }
 0x4a7   :  { %5544 = vmatpush1.bf16.msra.mxu0 %v7466_v58  ;;  %5576 = vmatpush1.bf16.msra.mxu1 %v7469_v8 }
 0x4a8   :  { %5546 = vmatprep.subr.bf16.mxu0 %v7474_v32  ;;  %5578 = vmatprep.subr.bf16.mxu1 %v7476_v59 }
 0x4ab   :  { %5548 = vmatpush1.bf16.msra.mxu0 %v7478_v7  ;;  %5580 = vmatpush1.bf16.msra.mxu1 %v7481_v60 }
 0x4ac   :  { %5582 = vmatprep.subr.bf16.mxu0 %v7344_v28  ;;  %5614 = vmatprep.subr.bf16.mxu1 %v7346_v41 }
 0x561   :  { %v1545_v6 = vpop.f32.mrb[8].mxu0  ;;  %v1616_v2 = vpop.f32.mrb[8].mxu1 }
 0x562   :  { %v6421_v4 = vadd.f32 %v1545_v6, %v7271_v19  ;;  %v1547_v15 = vpop.f32.mrb[9].mxu0  ;;  %v1618_v17 = vpop.f32.mrb[9].mxu1  ;;  %v6437_v51 = vadd.f32 %v1616_v2, %v7281_v24 }
 0x563   :  { %v6422_v21 = vadd.f32 %v1547_v15, %v7277_v27  ;;  %v6438_v10 = vadd.f32 %v1618_v17, %v7288_v43 }
 0x564   :  { %v1625_v38 = vmul.f32 0.5, %v6421_v4 }
 0x565   :  { %v1629_v49 = vmul.f32 0.5, %v6422_v21  ;;  %v1634_v28 = vmul.f32 0.5, %v6438_v10 }
 0x566   :  { %6598 = vtanh.f32 %v1625_v38 }
 0x567   :  { %6600 = vtanh.f32 %v1629_v49 }
 0x568   :  { %6602 = vtanh.f32 %v6437_v51 }
 0x569   :  { %6604 = vtanh.f32 %v1634_v28 }
 0x570   :  { %v6599_v62 = vpop.eup %6598 }
 0x571   :  { %v6601_v41 = vpop.eup %6600  ;;  %v1627_v20 = vmul.f32 0.5, %v6599_v62 }
 0x572   :  { %v1631_v26 = vmul.f32 0.5, %v6601_v41  ;;  %v6603_v46 = vpop.eup %6602 }
 0x573   :  { %v1628_v31 = vadd.f32 0.5, %v1627_v20  ;;  %v6605_v2 = vpop.eup %6604 }
 0x574   :  { %v1632_v56 = vadd.f32 0.5, %v1631_v26  ;;  %v1636_v15 = vmul.f32 0.5, %v6605_v2 }
 0x575   :  { %v1639_v37 = vmul.f32 %v6603_v46, %v1628_v31 }
 0x576   :  { %v1638_v6 = vmul.f32 %v1632_v56, %v7493_v35  ;;  %v1637_v21 = vadd.f32 0.5, %v1636_v15 }
 0x578   :  { %v7539_v4 = vadd.f32 %v1639_v37, %v1638_v6 }
 0x57a   :  { %6606 = vtanh.f32 %v7539_v4 }
 0x584   :  { %v6607_v17 = vpop.eup %6606 }
 0x585   :  { %v7542_v38 = vmul.f32 %v6607_v17, %v1637_v21 }
 0x587   :  { %1779 = vmatmul.mubr.f32.vlgmr.msra.gmra.mrb[10].mxu0 %v7542_v38  ;;  %1850 = vmatmul.mubr.f32.vlgmr.msra.gmra.mrb[10].mxu1 %v7542_v38 }
 0x588   :  { %5584 = vmatpush1.bf16.msra.mxu0 %v7348_v45  ;;  %5616 = vmatpush1.bf16.msra.mxu1 %v7351_v30 }
 0x589   :  { %5586 = vmatprep.subr.bf16.mxu0 %v7356_v42  ;;  %5618 = vmatprep.subr.bf16.mxu1 %v7358_v48 }
 0x58a   :  { %2013 = vmatprep.mubr.f32.mxu0 %v6919_v0  ;;  %2084 = vmatprep.mubr.f32.mxu1 %v6919_v0 }
 0x58c   :  { %5588 = vmatpush1.bf16.msra.mxu0 %v7360_v55  ;;  %5620 = vmatpush1.bf16.msra.mxu1 %v7363_v61 }
 0x58d   :  { %5590 = vmatprep.subr.bf16.mxu0 %v7414_v1  ;;  %5622 = vmatprep.subr.bf16.mxu1 %v7416_v40 }
 0x590   :  { %5592 = vmatpush1.bf16.msra.mxu0 %v7418_v25  ;;  %5624 = vmatpush1.bf16.msra.mxu1 %v7421_v36 }
 0x591   :  { %5594 = vmatprep.subr.bf16.mxu0 %v7426_v47  ;;  %5626 = vmatprep.subr.bf16.mxu1 %v7428_v53 }
 0x594   :  { %5596 = vmatpush1.bf16.msra.mxu0 %v7430_v54  ;;  %5628 = vmatpush1.bf16.msra.mxu1 %v7433_v3 }
 0x595   :  { %5598 = vmatprep.subr.bf16.mxu0 %v7438_v16  ;;  %5630 = vmatprep.subr.bf16.mxu1 %v7440_v33 }
 0x598   :  { %5600 = vmatpush1.bf16.msra.mxu0 %v7442_v34  ;;  %5632 = vmatpush1.bf16.msra.mxu1 %v7445_v50 }
 0x599   :  { %5602 = vmatprep.subr.bf16.mxu0 %v7450_v9  ;;  %5634 = vmatprep.subr.bf16.mxu1 %v7452_v5 }
 0x59c   :  { %5604 = vmatpush1.bf16.msra.mxu0 %v7454_v14  ;;  %5636 = vmatpush1.bf16.msra.mxu1 %v7457_v39 }
 0x59d   :  { %5606 = vmatprep.subr.bf16.mxu0 %v7462_v44  ;;  %5638 = vmatprep.subr.bf16.mxu1 %v7464_v52 }
 0x5a0   :  { %5608 = vmatpush1.bf16.msra.mxu0 %v7466_v58  ;;  %5640 = vmatpush1.bf16.msra.mxu1 %v7469_v8 }
 0x5a1   :  { %5610 = vmatprep.subr.bf16.mxu0 %v7474_v32  ;;  %5642 = vmatprep.subr.bf16.mxu1 %v7476_v59 }
 0x5a4   :  { %5612 = vmatpush1.bf16.msra.mxu0 %v7478_v7  ;;  %5644 = vmatpush1.bf16.msra.mxu1 %v7481_v60 }
 0x65a   :  { %v1780_v45 = vpop.f32.mrb[10].mxu0  ;;  %v1851_v30 = vpop.f32.mrb[10].mxu1 }
 0x65b   :  { %v6423_v42 = vadd.f32 %v1780_v45, %v7271_v19  ;;  %v1782_v48 = vpop.f32.mrb[11].mxu0  ;;  %v1853_v55 = vpop.f32.mrb[11].mxu1  ;;  %v6439_v51 = vadd.f32 %v1851_v30, %v7281_v24 }
 0x65c   :  { %v6424_v61 = vadd.f32 %v1782_v48, %v7277_v27  ;;  %v6440_v10 = vadd.f32 %v1853_v55, %v7288_v43  ;;  %v2123_v48 = vld [vmem:[#allocation10 + $0x18] sm:$0xff] }
 0x65d   :  { %v1860_v35 = vmul.f32 0.5, %v6423_v42  ;;  %v2121_v42 = vld [vmem:[#allocation10 + $0x8] sm:$0xff] }
 0x65e   :  { %v1864_v49 = vmul.f32 0.5, %v6424_v61  ;;  %v1869_v28 = vmul.f32 0.5, %v6440_v10  ;;  %v2127_v61 = vld [vmem:[#allocation10 + $0x38] sm:$0xff] }
 0x65f   :  { %6608 = vtanh.f32 %v1860_v35  ;;  %v2120_v35 = vld [vmem:[#allocation10] sm:$0xff] }
 0x660   :  { %6610 = vtanh.f32 %v1864_v49  ;;  %v2124_v49 = vld [vmem:[#allocation10 + $0x20] sm:$0xff] }
 0x661   :  { %6612 = vtanh.f32 %v6439_v51  ;;  %v5677_v51 = vpack.c.bf16 %v2127_v61, %v2123_v48  ;;  %v5647_v10 = vpack.c.bf16 %v2124_v49, %v2120_v35  ;;  %v2358_v49 = vld [vmem:[#allocation11] sm:$0xff] }
 0x662   :  { %6614 = vtanh.f32 %v1869_v28  ;;  %v2122_v28 = vld [vmem:[#allocation10 + $0x10] sm:$0xff] }
 0x663   :  { %5678 = vmatprep.subr.bf16.mxu1 %v5677_v51  ;;  %v2362_v51 = vld [vmem:[#allocation11 + $0x20] sm:$0xff] }
 0x669   :  { %v6609_v62 = vpop.eup %6608 }
 0x66a   :  { %v6611_v41 = vpop.eup %6610  ;;  %v1862_v20 = vmul.f32 0.5, %v6609_v62  ;;  %v2126_v62 = vld [vmem:[#allocation10 + $0x30] sm:$0xff] }
 0x66b   :  { %v1866_v26 = vmul.f32 0.5, %v6611_v41  ;;  %v6613_v46 = vpop.eup %6612  ;;  %v5679_v41 = vpack.c.bf16 %v2126_v62, %v2122_v28  ;;  %v2364_v28 = vld [vmem:[#allocation11 + $0x30] sm:$0xff]  ;;  %v2367_v62 = vld [vmem:[#allocation11 + $0x48] sm:$0xff] }
 0x66c   :  { %v1863_v31 = vadd.f32 0.5, %v1862_v20  ;;  %v6615_v15 = vpop.eup %6614  ;;  %v2129_v20 = vld [vmem:[#allocation10 + $0x48] sm:$0xff] }
 0x66d   :  { %v1867_v56 = vadd.f32 0.5, %v1866_v26  ;;  %v1871_v21 = vmul.f32 0.5, %v6615_v15  ;;  %v2133_v26 = vld [vmem:[#allocation10 + $0x68] sm:$0xff] }
 0x66e   :  { %v1874_v37 = vmul.f32 %v6613_v46, %v1863_v31  ;;  %v2131_v31 = vld [vmem:[#allocation10 + $0x58] sm:$0xff]  ;;  %v5649_v46 = vpack.c.bf16 %v2133_v26, %v2129_v20 }
 0x66f   :  { %v1873_v6 = vmul.f32 %v1867_v56, %v7539_v4  ;;  %v1872_v17 = vadd.f32 0.5, %v1871_v21  ;;  %v2125_v4 = vld [vmem:[#allocation10 + $0x28] sm:$0xff]  ;;  %v2135_v56 = vld [vmem:[#allocation10 + $0x78] sm:$0xff] }
 0x670   :  { %v5645_v55 = vpack.c.bf16 %v2125_v4, %v2121_v42  ;;  %v5681_v15 = vpack.c.bf16 %v2135_v56, %v2131_v31  ;;  %v2369_v20 = vld [vmem:[#allocation11 + $0x58] sm:$0xff]  ;;  %v5711_v56 = vpack.c.bf16 %v2362_v51, %v2358_v49 }
 0x671   :  { %v7583_v2 = vadd.f32 %v1874_v37, %v1873_v6  ;;  %v2128_v37 = vld [vmem:[#allocation10 + $0x40] sm:$0xff]  ;;  %v2373_v26 = vld [vmem:[#allocation11 + $0x78] sm:$0xff] }
 0x672   :  { %5646 = vmatprep.subr.bf16.mxu0 %v5645_v55  ;;  %v2132_v6 = vld [vmem:[#allocation10 + $0x60] sm:$0xff] }
 0x673   :  { %6616 = vtanh.f32 %v7583_v2  ;;  %v5651_v21 = vpack.c.bf16 %v2132_v6, %v2128_v37  ;;  %v2366_v6 = vld [vmem:[#allocation11 + $0x40] sm:$0xff] }
 0x67d   :  { %v6617_v45 = vpop.eup %6616 }
 0x67e   :  { %v7586_v30 = vmul.f32 %v6617_v45, %v1872_v17  ;;  %v2130_v17 = vld [vmem:[#allocation10 + $0x50] sm:$0xff] }
 0x67f   :  { %v2134_v45 = vld [vmem:[#allocation10 + $0x70] sm:$0xff] }
 0x680   :  { %2014 = vmatmul.mubr.f32.vlgmr.msra.gmra.mrb[12].mxu0 %v7586_v30  ;;  %2085 = vmatmul.mubr.f32.vlgmr.msra.gmra.mrb[12].mxu1 %v7586_v30  ;;  %v5683_v42 = vpack.c.bf16 %v2134_v45, %v2130_v17  ;;  %v5745_v17 = vpack.c.bf16 %v2373_v26, %v2369_v20  ;;  %v2368_v45 = vld [vmem:[#allocation11 + $0x50] sm:$0xff] }
 0x681   :  { %2248 = vmatprep.mubr.f32.mxu0 %v6919_v0  ;;  %2319 = vmatprep.mubr.f32.mxu1 %v6919_v0  ;;  %v2392_v20 = vld [vmem:[#allocation11 + $0x110] sm:$0xff] }
 0x682   :  { %5648 = vmatpush1.bf16.msra.mxu0 %v5647_v10  ;;  %5680 = vmatpush1.bf16.msra.mxu1 %v5679_v41  ;;  %v2360_v10 = vld [vmem:[#allocation11 + $0x10] sm:$0xff]  ;;  %v2371_v41 = vld [vmem:[#allocation11 + $0x68] sm:$0xff] }
 0x683   :  { %5650 = vmatprep.subr.bf16.mxu0 %v5649_v46  ;;  %5682 = vmatprep.subr.bf16.mxu1 %v5681_v15  ;;  %v5743_v37 = vpack.c.bf16 %v2364_v28, %v2360_v10  ;;  %v2390_v10 = vld [vmem:[#allocation11 + $0x100] sm:$0xff]  ;;  %v2396_v26 = vld [vmem:[#allocation11 + $0x130] sm:$0xff] }
 0x684   :  { %v2394_v28 = vld [vmem:[#allocation11 + $0x120] sm:$0xff] }
 0x686   :  { %5652 = vmatpush1.bf16.msra.mxu0 %v5651_v21  ;;  %5684 = vmatpush1.bf16.msra.mxu1 %v5683_v42  ;;  %v5713_v21 = vpack.c.bf16 %v2371_v41, %v2367_v62  ;;  %v2372_v42 = vld [vmem:[#allocation11 + $0x70] sm:$0xff] }
 0x687   :  { %5654 = vmatprep.subr.bf16.mxu0 %v7414_v1  ;;  %5686 = vmatprep.subr.bf16.mxu1 %v7416_v40  ;;  %v2359_v1 = vld [vmem:[#allocation11 + $0x8] sm:$0xff] }
 0x688   :  { %v2363_v40 = vld [vmem:[#allocation11 + $0x28] sm:$0xff] }
 0x68a   :  { %5656 = vmatpush1.bf16.msra.mxu0 %v7418_v25  ;;  %5688 = vmatpush1.bf16.msra.mxu1 %v7421_v36  ;;  %v2361_v25 = vld [vmem:[#allocation11 + $0x18] sm:$0xff]  ;;  %v5709_v36 = vpack.c.bf16 %v2363_v40, %v2359_v1  ;;  %v2375_v1 = vld [vmem:[#allocation11 + $0x88] sm:$0xff] }
 0x68b   :  { %5658 = vmatprep.subr.bf16.mxu0 %v7426_v47  ;;  %5690 = vmatprep.subr.bf16.mxu1 %v7428_v53  ;;  %v2365_v47 = vld [vmem:[#allocation11 + $0x38] sm:$0xff]  ;;  %v2379_v40 = vld [vmem:[#allocation11 + $0xa8] sm:$0xff] }
 0x68c   :  { %v5741_v53 = vpack.c.bf16 %v2365_v47, %v2361_v25  ;;  %v2377_v25 = vld [vmem:[#allocation11 + $0x98] sm:$0xff] }
 0x68e   :  { %5660 = vmatpush1.bf16.msra.mxu0 %v7430_v54  ;;  %5692 = vmatpush1.bf16.msra.mxu1 %v7433_v3 }
 0x68f   :  { %5662 = vmatprep.subr.bf16.mxu0 %v7438_v16  ;;  %5694 = vmatprep.subr.bf16.mxu1 %v7440_v33 }
 0x692   :  { %5664 = vmatpush1.bf16.msra.mxu0 %v7442_v34  ;;  %5696 = vmatpush1.bf16.msra.mxu1 %v7445_v50 }
 0x693   :  { %5666 = vmatprep.subr.bf16.mxu0 %v7450_v9  ;;  %5698 = vmatprep.subr.bf16.mxu1 %v7452_v5 }
 0x696   :  { %5668 = vmatpush1.bf16.msra.mxu0 %v7454_v14  ;;  %5700 = vmatpush1.bf16.msra.mxu1 %v7457_v39 }
 0x697   :  { %5670 = vmatprep.subr.bf16.mxu0 %v7462_v44  ;;  %5702 = vmatprep.subr.bf16.mxu1 %v7464_v52 }
 0x69a   :  { %5672 = vmatpush1.bf16.msra.mxu0 %v7466_v58  ;;  %5704 = vmatpush1.bf16.msra.mxu1 %v7469_v8 }
 0x69b   :  { %5674 = vmatprep.subr.bf16.mxu0 %v7474_v32  ;;  %5706 = vmatprep.subr.bf16.mxu1 %v7476_v59 }
 0x69e   :  { %5676 = vmatpush1.bf16.msra.mxu0 %v7478_v7  ;;  %5708 = vmatpush1.bf16.msra.mxu1 %v7481_v60 }
 0x69f   :  { %5710 = vmatprep.subr.bf16.mxu0 %v5709_v36  ;;  %5742 = vmatprep.subr.bf16.mxu1 %v5741_v53  ;;  %v2381_v36 = vld [vmem:[#allocation11 + $0xb8] sm:$0xff]  ;;  %v5747_v53 = vpack.c.bf16 %v2372_v42, %v2368_v45 }
 0x753   :  { %v2015_v54 = vpop.f32.mrb[12].mxu0  ;;  %v2086_v3 = vpop.f32.mrb[12].mxu1 }
 0x754   :  { %v6425_v16 = vadd.f32 %v2015_v54, %v7271_v19  ;;  %v2017_v33 = vpop.f32.mrb[13].mxu0  ;;  %v2088_v34 = vpop.f32.mrb[13].mxu1  ;;  %v6441_v14 = vadd.f32 %v2086_v3, %v7281_v24  ;;  %v2374_v54 = vld [vmem:[#allocation11 + $0x80] sm:$0xff] }
 0x755   :  { %v6426_v50 = vadd.f32 %v2017_v33, %v7277_v27  ;;  %v6442_v39 = vadd.f32 %v2088_v34, %v7288_v43  ;;  %v2378_v3 = vld [vmem:[#allocation11 + $0xa0] sm:$0xff]  ;;  %v5749_v33 = vpack.c.bf16 %v2381_v36, %v2377_v25  ;;  %v2376_v34 = vld [vmem:[#allocation11 + $0x90] sm:$0xff]  ;;  %v2407_v25 = vld [vmem:[#allocation11 + $0x188] sm:$0xff] }
 0x756   :  { %v2095_v9 = vmul.f32 0.5, %v6425_v16  ;;  %v5717_v16 = vpack.c.bf16 %v2379_v40, %v2375_v1  ;;  %v2400_v1 = vld [vmem:[#allocation11 + $0x150] sm:$0xff]  ;;  %v2411_v36 = vld [vmem:[#allocation11 + $0x1a8] sm:$0xff] }
 0x757   :  { %v2099_v5 = vmul.f32 0.5, %v6426_v50  ;;  %v2104_v44 = vmul.f32 0.5, %v6442_v39  ;;  %v2380_v50 = vld [vmem:[#allocation11 + $0xb0] sm:$0xff]  ;;  %v2389_v39 = vld [vmem:[#allocation11 + $0xf8] sm:$0xff] }
 0x758   :  { %6618 = vtanh.f32 %v2095_v9  ;;  %v2383_v9 = vld [vmem:[#allocation11 + $0xc8] sm:$0xff]  ;;  %v2404_v40 = vld [vmem:[#allocation11 + $0x170] sm:$0xff] }
 0x759   :  { %6620 = vtanh.f32 %v2099_v5  ;;  %v2387_v5 = vld [vmem:[#allocation11 + $0xe8] sm:$0xff] }
 0x75a   :  { %6622 = vtanh.f32 %v6441_v14  ;;  %v2385_v14 = vld [vmem:[#allocation11 + $0xd8] sm:$0xff] }
 0x75b   :  { %6624 = vtanh.f32 %v2104_v44  ;;  %v5719_v44 = vpack.c.bf16 %v2378_v3, %v2374_v54  ;;  %v5763_v3 = vpack.c.bf16 %v2404_v40, %v2400_v1  ;;  %v2727_v1 = vld [vmem:[#allocation13 + $0xa8] sm:$0xff]  ;;  %v2725_v40 = vld [vmem:[#allocation13 + $0x98] sm:$0xff] }
 0x762   :  { %v6619_v52 = vpop.eup %6618 }
 0x763   :  { %v6621_v58 = vpop.eup %6620  ;;  %v2097_v8 = vmul.f32 0.5, %v6619_v52  ;;  %v5751_v52 = vpack.c.bf16 %v2380_v50, %v2376_v34  ;;  %v5733_v34 = vpack.c.bf16 %v2411_v36, %v2407_v25  ;;  %v2729_v36 = vld [vmem:[#allocation13 + $0xb8] sm:$0xff] }
 0x764   :  { %v2101_v32 = vmul.f32 0.5, %v6621_v58  ;;  %v6623_v7 = vpop.eup %6622  ;;  %v2382_v58 = vld [vmem:[#allocation11 + $0xc0] sm:$0xff] }
 0x765   :  { %v2098_v59 = vadd.f32 0.5, %v2097_v8  ;;  %v6625_v61 = vpop.eup %6624  ;;  %v2386_v8 = vld [vmem:[#allocation11 + $0xe0] sm:$0xff] }
 0x766   :  { %v2102_v60 = vadd.f32 0.5, %v2101_v32  ;;  %v2106_v35 = vmul.f32 0.5, %v6625_v61  ;;  %v5721_v32 = vpack.c.bf16 %v2387_v5, %v2383_v9  ;;  %v2393_v61 = vld [vmem:[#allocation11 + $0x118] sm:$0xff]  ;;  %v5723_v49 = vpack.c.bf16 %v2386_v8, %v2382_v58  ;;  %v2408_v9 = vld [vmem:[#allocation11 + $0x190] sm:$0xff] }
 0x767   :  { %v2109_v4 = vmul.f32 %v6623_v7, %v2098_v59  ;;  %v5753_v59 = vpack.c.bf16 %v2389_v39, %v2385_v14  ;;  %v2384_v7 = vld [vmem:[#allocation11 + $0xd0] sm:$0xff]  ;;  %v2415_v14 = vld [vmem:[#allocation11 + $0x1c8] sm:$0xff] }
 0x768   :  { %v2108_v48 = vmul.f32 %v2102_v60, %v7583_v2  ;;  %v2107_v31 = vadd.f32 0.5, %v2106_v35  ;;  %v2370_v2 = vld [vmem:[#allocation11 + $0x60] sm:$0xff]  ;;  %v2388_v60 = vld [vmem:[#allocation11 + $0xf0] sm:$0xff]  ;;  %v2397_v35 = vld [vmem:[#allocation11 + $0x138] sm:$0xff] }
 0x769   :  { %v5715_v47 = vpack.c.bf16 %v2370_v2, %v2366_v6  ;;  %v5755_v51 = vpack.c.bf16 %v2388_v60, %v2384_v7  ;;  %v5757_v41 = vpack.c.bf16 %v2397_v35, %v2393_v61  ;;  %v5727_v6 = vpack.c.bf16 %v2394_v28, %v2390_v10  ;;  %v2412_v5 = vld [vmem:[#allocation11 + $0x1b0] sm:$0xff]  ;;  %v2419_v39 = vld [vmem:[#allocation11 + $0x1e8] sm:$0xff]  ;;  %v2418_v60 = vld [vmem:[#allocation11 + $0x1e0] sm:$0xff] }
 0x76a   :  { %v7621_v55 = vadd.f32 %v2109_v4, %v2108_v48  ;;  %v2391_v4 = vld [vmem:[#allocation11 + $0x108] sm:$0xff]  ;;  %v5759_v2 = vpack.c.bf16 %v2396_v26, %v2392_v20  ;;  %v5767_v8 = vpack.c.bf16 %v2412_v5, %v2408_v9  ;;  %v2708_v28 = vld [vmem:[#allocation13 + $0x10] sm:$0xff]  ;;  %v2717_v26 = vld [vmem:[#allocation13 + $0x58] sm:$0xff] }
 0x76b   :  { %v2395_v48 = vld [vmem:[#allocation11 + $0x128] sm:$0xff]  ;;  %v2733_v5 = vld [vmem:[#allocation13 + $0xd8] sm:$0xff] }
 0x76c   :  { %6626 = vtanh.f32 %v7621_v55  ;;  %v5725_v62 = vpack.c.bf16 %v2395_v48, %v2391_v4  ;;  %v2416_v4 = vld [vmem:[#allocation11 + $0x1d0] sm:$0xff]  ;;  %v2719_v20 = vld [vmem:[#allocation13 + $0x68] sm:$0xff] }
 0x76d   :  { %v2420_v48 = vld [vmem:[#allocation11 + $0x1f0] sm:$0xff]  ;;  %v2735_v9 = vld [vmem:[#allocation13 + $0xe8] sm:$0xff] }
 0x76e   :  { %v5771_v35 = vpack.c.bf16 %v2420_v48, %v2416_v4  ;;  %v2743_v4 = vld [vmem:[#allocation13 + $0x128] sm:$0xff]  ;;  %v2741_v48 = vld [vmem:[#allocation13 + $0x118] sm:$0xff] }
 0x776   :  { %v6627_v46 = vpop.eup %6626 }
 0x777   :  { %v7624_v15 = vmul.f32 %v6627_v46, %v2107_v31  ;;  %v2399_v31 = vld [vmem:[#allocation11 + $0x148] sm:$0xff] }
 0x778   :  { %v2403_v46 = vld [vmem:[#allocation11 + $0x168] sm:$0xff] }
 0x779   :  { %2249 = vmatmul.mubr.f32.vlgmr.msra.gmra.mrb[14].mxu0 %v7624_v15  ;;  %2320 = vmatmul.mubr.f32.vlgmr.msra.gmra.mrb[14].mxu1 %v7624_v15  ;;  %v5729_v45 = vpack.c.bf16 %v2403_v46, %v2399_v31  ;;  %v2721_v46 = vld [vmem:[#allocation13 + $0x78] sm:$0xff] }
 0x77a   :  { %5712 = vmatpush1.bf16.msra.mxu0 %v5711_v56  ;;  %5744 = vmatpush1.bf16.msra.mxu1 %v5743_v37  ;;  %v2401_v56 = vld [vmem:[#allocation11 + $0x158] sm:$0xff] }
 0x77b   :  { %5714 = vmatprep.subr.bf16.mxu0 %v5713_v21  ;;  %5746 = vmatprep.subr.bf16.mxu1 %v5745_v17  ;;  %v2405_v37 = vld [vmem:[#allocation11 + $0x178] sm:$0xff]  ;;  %v2398_v21 = vld [vmem:[#allocation11 + $0x140] sm:$0xff] }
 0x77c   :  { %2508 = vmatprep.mubr.f32.mxu0 %v6919_v0  ;;  %2621 = vmatprep.mubr.f32.mxu1 %v6919_v0  ;;  %v2402_v17 = vld [vmem:[#allocation11 + $0x160] sm:$0xff]  ;;  %v5761_v42 = vpack.c.bf16 %v2405_v37, %v2401_v56 }
 0x77d   :  { %v5731_v54 = vpack.c.bf16 %v2402_v17, %v2398_v21  ;;  %v2714_v56 = vld [vmem:[#allocation13 + $0x40] sm:$0xff]  ;;  %v2716_v21 = vld [vmem:[#allocation13 + $0x50] sm:$0xff] }
 0x77e   :  { %5716 = vmatpush1.bf16.msra.mxu0 %v5715_v47  ;;  %5748 = vmatpush1.bf16.msra.mxu1 %v5747_v53  ;;  %v2409_v47 = vld [vmem:[#allocation11 + $0x198] sm:$0xff]  ;;  %v2718_v37 = vld [vmem:[#allocation13 + $0x60] sm:$0xff]  ;;  %v2720_v17 = vld [vmem:[#allocation13 + $0x70] sm:$0xff] }
 0x77f   :  { %5718 = vmatprep.subr.bf16.mxu0 %v5717_v16  ;;  %5750 = vmatprep.subr.bf16.mxu1 %v5749_v33  ;;  %v2413_v53 = vld [vmem:[#allocation11 + $0x1b8] sm:$0xff]  ;;  %v2406_v16 = vld [vmem:[#allocation11 + $0x180] sm:$0xff] }
 0x780   :  { %v2410_v33 = vld [vmem:[#allocation11 + $0x1a0] sm:$0xff]  ;;  %v5765_v50 = vpack.c.bf16 %v2413_v53, %v2409_v47 }
 0x781   :  { %v5735_v58 = vpack.c.bf16 %v2410_v33, %v2406_v16  ;;  %v2722_v47 = vld [vmem:[#allocation13 + $0x80] sm:$0xff]  ;;  %v2724_v16 = vld [vmem:[#allocation13 + $0x90] sm:$0xff] }
 0x782   :  { %5720 = vmatpush1.bf16.msra.mxu0 %v5719_v44  ;;  %5752 = vmatpush1.bf16.msra.mxu1 %v5751_v52  ;;  %v2417_v44 = vld [vmem:[#allocation11 + $0x1d8] sm:$0xff]  ;;  %v2726_v53 = vld [vmem:[#allocation13 + $0xa0] sm:$0xff]  ;;  %v2728_v33 = vld [vmem:[#allocation13 + $0xb0] sm:$0xff] }
 0x783   :  { %5722 = vmatprep.subr.bf16.mxu0 %v5721_v32  ;;  %5754 = vmatprep.subr.bf16.mxu1 %v5753_v59  ;;  %v2421_v52 = vld [vmem:[#allocation11 + $0x1f8] sm:$0xff]  ;;  %v2414_v32 = vld [vmem:[#allocation11 + $0x1c0] sm:$0xff]  ;;  %v5737_v59 = vpack.c.bf16 %v2419_v39, %v2415_v14 }
 0x784   :  { %v5769_v7 = vpack.c.bf16 %v2421_v52, %v2417_v44  ;;  %v5739_v61 = vpack.c.bf16 %v2418_v60, %v2414_v32  ;;  %v2737_v39 = vld [vmem:[#allocation13 + $0xf8] sm:$0xff]  ;;  %v2730_v44 = vld [vmem:[#allocation13 + $0xc0] sm:$0xff]  ;;  %v2732_v32 = vld [vmem:[#allocation13 + $0xd0] sm:$0xff] }
 0x785   :  { %v2734_v52 = vld [vmem:[#allocation13 + $0xe0] sm:$0xff]  ;;  %v2739_v60 = vld [vmem:[#allocation13 + $0x108] sm:$0xff] }
 0x786   :  { %5724 = vmatpush1.bf16.msra.mxu0 %v5723_v49  ;;  %5756 = vmatpush1.bf16.msra.mxu1 %v5755_v51  ;;  %v2706_v49 = vld [vmem:[#allocation13] sm:$0xff] }
 0x787   :  { %5726 = vmatprep.subr.bf16.mxu0 %v5725_v62  ;;  %5758 = vmatprep.subr.bf16.mxu1 %v5757_v41  ;;  %v2712_v62 = vld [vmem:[#allocation13 + $0x30] sm:$0xff]  ;;  %v2715_v41 = vld [vmem:[#allocation13 + $0x48] sm:$0xff] }
 0x788   :  { %v7670_v31 = vpack.c.bf16 %v2719_v20, %v2715_v41  ;;  %v2751_v41 = vld [vmem:[#allocation13 + $0x168] sm:$0xff]  ;;  %v2749_v20 = vld [vmem:[#allocation13 + $0x158] sm:$0xff] }
 0x78a   :  { %5728 = vmatpush1.bf16.msra.mxu0 %v5727_v6  ;;  %5760 = vmatpush1.bf16.msra.mxu1 %v5759_v2  ;;  %v7672_v6 = vpack.c.bf16 %v2721_v46, %v2717_v26  ;;  %v7674_v2 = vpack.c.bf16 %v2718_v37, %v2714_v56  ;;  %v2753_v26 = vld [vmem:[#allocation13 + $0x178] sm:$0xff]  ;;  %v2746_v37 = vld [vmem:[#allocation13 + $0x140] sm:$0xff] }
 0x78b   :  { %5730 = vmatprep.subr.bf16.mxu0 %v5729_v45  ;;  %5762 = vmatprep.subr.bf16.mxu1 %v5761_v42  ;;  %v7677_v45 = vpack.c.bf16 %v2720_v17, %v2716_v21  ;;  %v2723_v42 = vld [vmem:[#allocation13 + $0x88] sm:$0xff]  ;;  %v7719_v56 = vpack.c.bf16 %v2753_v26, %v2749_v20  ;;  %v2750_v21 = vld [vmem:[#allocation13 + $0x160] sm:$0xff]  ;;  %v2748_v17 = vld [vmem:[#allocation13 + $0x150] sm:$0xff] }
 0x78c   :  { %v7682_v25 = vpack.c.bf16 %v2727_v1, %v2723_v42  ;;  %v7722_v42 = vpack.c.bf16 %v2750_v21, %v2746_v37  ;;  %v2752_v1 = vld [vmem:[#allocation13 + $0x170] sm:$0xff] }
 0x78e   :  { %5732 = vmatpush1.bf16.msra.mxu0 %v5731_v54  ;;  %5764 = vmatpush1.bf16.msra.mxu1 %v5763_v3  ;;  %v7684_v54 = vpack.c.bf16 %v2729_v36, %v2725_v40  ;;  %v7686_v3 = vpack.c.bf16 %v2726_v53, %v2722_v47  ;;  %v2755_v40 = vld [vmem:[#allocation13 + $0x188] sm:$0xff]  ;;  %v7726_v47 = vpack.c.bf16 %v2752_v1, %v2748_v17 }
 0x78f   :  { %5734 = vmatprep.subr.bf16.mxu0 %v5733_v34  ;;  %5766 = vmatprep.subr.bf16.mxu1 %v5765_v50  ;;  %v7689_v34 = vpack.c.bf16 %v2728_v33, %v2724_v16  ;;  %v2731_v50 = vld [vmem:[#allocation13 + $0xc8] sm:$0xff]  ;;  %v2757_v16 = vld [vmem:[#allocation13 + $0x198] sm:$0xff] }
 0x790   :  { %v7694_v14 = vpack.c.bf16 %v2735_v9, %v2731_v50  ;;  %v2759_v36 = vld [vmem:[#allocation13 + $0x1a8] sm:$0xff]  ;;  %v2761_v33 = vld [vmem:[#allocation13 + $0x1b8] sm:$0xff]  ;;  %v2754_v50 = vld [vmem:[#allocation13 + $0x180] sm:$0xff] }
 0x791   :  { %v7728_v53 = vpack.c.bf16 %v2759_v36, %v2755_v40  ;;  %v7730_v9 = vpack.c.bf16 %v2761_v33, %v2757_v16 }
 0x792   :  { %5736 = vmatpush1.bf16.msra.mxu0 %v5735_v58  ;;  %5768 = vmatpush1.bf16.msra.mxu1 %v5767_v8  ;;  %v7696_v58 = vpack.c.bf16 %v2737_v39, %v2733_v5  ;;  %v7698_v8 = vpack.c.bf16 %v2734_v52, %v2730_v44  ;;  %v2758_v5 = vld [vmem:[#allocation13 + $0x1a0] sm:$0xff]  ;;  %v2756_v39 = vld [vmem:[#allocation13 + $0x190] sm:$0xff] }
 0x793   :  { %5738 = vmatprep.subr.bf16.mxu0 %v5737_v59  ;;  %5770 = vmatprep.subr.bf16.mxu1 %v5769_v7  ;;  %v2736_v59 = vld [vmem:[#allocation13 + $0xf0] sm:$0xff]  ;;  %v7733_v52 = vpack.c.bf16 %v2758_v5, %v2754_v50 }
 0x794   :  { %v7701_v7 = vpack.c.bf16 %v2736_v59, %v2732_v32  ;;  %v2760_v44 = vld [vmem:[#allocation13 + $0x1b0] sm:$0xff]  ;;  %v2763_v59 = vld [vmem:[#allocation13 + $0x1c8] sm:$0xff] }
 0x795   :  { %v7737_v32 = vpack.c.bf16 %v2760_v44, %v2756_v39 }
 0x796   :  { %5740 = vmatpush1.bf16.msra.mxu0 %v5739_v61  ;;  %5772 = vmatpush1.bf16.msra.mxu1 %v5771_v35  ;;  %v7706_v61 = vpack.c.bf16 %v2743_v4, %v2739_v60  ;;  %v2745_v35 = vld [vmem:[#allocation13 + $0x138] sm:$0xff]  ;;  %v2767_v60 = vld [vmem:[#allocation13 + $0x1e8] sm:$0xff] }
 0x797   :  { %v2765_v4 = vld [vmem:[#allocation13 + $0x1d8] sm:$0xff] }
 0x799   :  { %2509 = vmatmul.mubr.f32.vlgmr.msra.gmra.mrb[16].mxu0 %v7294_v22  ;;  %2622 = vmatmul.mubr.f32.vlgmr.msra.gmra.mrb[16].mxu1 %v7294_v22  ;;  %v2707_v22 = vld [vmem:[#allocation13 + $0x8] sm:$0xff] }
 0x79a   :  { %2514 = vmatprep.mubr.f32.mxu0 %v6919_v0  ;;  %2627 = vmatprep.mubr.f32.mxu1 %v6919_v0 }
 0x79d   :  { %2515 = vmatmul.mubr.f32.gmra.mrb[18].mxu0 %v7338_v11  ;;  %2628 = vmatmul.mubr.f32.gmra.mrb[18].mxu1 %v7338_v11  ;;  %v2711_v11 = vld [vmem:[#allocation13 + $0x28] sm:$0xff] }
 0x79e   :  { %2520 = vmatprep.mubr.f32.mxu0 %v6919_v0  ;;  %2633 = vmatprep.mubr.f32.mxu1 %v6919_v0 }
 0x7a1   :  { %2521 = vmatmul.mubr.f32.gmra.mrb[20].mxu0 %v7402_v63  ;;  %2634 = vmatmul.mubr.f32.gmra.mrb[20].mxu1 %v7402_v63  ;;  %v2709_v63 = vld [vmem:[#allocation13 + $0x18] sm:$0xff] }
 0x7a2   :  { %2526 = vmatprep.mubr.f32.mxu0 %v6919_v0  ;;  %2639 = vmatprep.mubr.f32.mxu1 %v6919_v0 }
 0x7a5   :  { %2527 = vmatmul.mubr.f32.gmra.mrb[22].mxu0 %v7496_v57  ;;  %2640 = vmatmul.mubr.f32.gmra.mrb[22].mxu1 %v7496_v57  ;;  %v7658_v57 = vpack.c.bf16 %v2711_v11, %v2707_v22  ;;  %v2738_v22 = vld [vmem:[#allocation13 + $0x100] sm:$0xff] }
 0x7a6   :  { %2532 = vmatprep.mubr.f32.mxu0 %v6919_v0  ;;  %2645 = vmatprep.mubr.f32.mxu1 %v6919_v0  ;;  %v2742_v11 = vld [vmem:[#allocation13 + $0x120] sm:$0xff] }
 0x7a7   :  { %5774 = vmatprep.subr.bf16.mxu0 %v7658_v57 }
 0x7a9   :  { %2533 = vmatmul.mubr.f32.gmra.mrb[24].mxu0 %v7542_v38  ;;  %2646 = vmatmul.mubr.f32.gmra.mrb[24].mxu1 %v7542_v38  ;;  %v2713_v38 = vld [vmem:[#allocation13 + $0x38] sm:$0xff] }
 0x7aa   :  { %2538 = vmatprep.mubr.f32.mxu0 %v6919_v0  ;;  %2651 = vmatprep.mubr.f32.mxu1 %v6919_v0  ;;  %v7660_v51 = vpack.c.bf16 %v2713_v38, %v2709_v63  ;;  %v7708_v63 = vpack.c.bf16 %v2745_v35, %v2741_v48  ;;  %v7710_v38 = vpack.c.bf16 %v2742_v11, %v2738_v22  ;;  %v2769_v35 = vld [vmem:[#allocation13 + $0x1f8] sm:$0xff]  ;;  %v2762_v22 = vld [vmem:[#allocation13 + $0x1c0] sm:$0xff] }
 0x7ab   :  { %v7742_v48 = vpack.c.bf16 %v2767_v60, %v2763_v59  ;;  %v2766_v11 = vld [vmem:[#allocation13 + $0x1e0] sm:$0xff] }
 0x7ac   :  { %5806 = vmatprep.subr.bf16.mxu1 %v7660_v51 }
 0x7ad   :  { %2539 = vmatmul.mubr.f32.gmra.mrb[26].mxu0 %v7586_v30  ;;  %2652 = vmatmul.mubr.f32.gmra.mrb[26].mxu1 %v7586_v30  ;;  %v2710_v30 = vld [vmem:[#allocation13 + $0x20] sm:$0xff] }
 0x7ae   :  { %2544 = vmatprep.mubr.f32.mxu0 %v6919_v0  ;;  %2657 = vmatprep.mubr.f32.mxu1 %v6919_v0  ;;  %v7662_v10 = vpack.c.bf16 %v2710_v30, %v2706_v49  ;;  %v2740_v49 = vld [vmem:[#allocation13 + $0x110] sm:$0xff] }
 0x7af   :  { %v2744_v30 = vld [vmem:[#allocation13 + $0x130] sm:$0xff] }
 0x7b0   :  { %5776 = vmatpush1.bf16.msra.mxu0 %v7662_v10 }
 0x7b1   :  { %2545 = vmatmul.mubr.f32.gmra.mrb[28].mxu0 %v7624_v15  ;;  %2658 = vmatmul.mubr.f32.gmra.mrb[28].mxu1 %v7624_v15  ;;  %v7665_v15 = vpack.c.bf16 %v2712_v62, %v2708_v28  ;;  %v2747_v28 = vld [vmem:[#allocation13 + $0x148] sm:$0xff]  ;;  %v7713_v62 = vpack.c.bf16 %v2744_v30, %v2740_v49  ;;  %v7744_v49 = vpack.c.bf16 %v2769_v35, %v2765_v4 }
 0x7b2   :  { %2550 = vmatprep.mubr.f32.mxu0 %v6919_v0  ;;  %2663 = vmatprep.mubr.f32.mxu1 %v6919_v0  ;;  %v7717_v46 = vpack.c.bf16 %v2751_v41, %v2747_v28  ;;  %v7746_v30 = vpack.c.bf16 %v2766_v11, %v2762_v22  ;;  %v2764_v28 = vld [vmem:[#allocation13 + $0x1d0] sm:$0xff] }
 0x7b3   :  { %5808 = vmatpush1.bf16.msra.mxu1 %v7665_v15  ;;  %5778 = vmatprep.subr.bf16.mxu0 %v7670_v31  ;;  %v2768_v41 = vld [vmem:[#allocation13 + $0x1f0] sm:$0xff] }
 0x7b4   :  { %5810 = vmatprep.subr.bf16.mxu1 %v7672_v6  ;;  %5780 = vmatpush1.bf16.msra.mxu0 %v7674_v2  ;;  %v7749_v20 = vpack.c.bf16 %v2768_v41, %v2764_v28 }
 0x7b5   :  { %5782 = vmatprep.subr.bf16.mxu0 %v7682_v25 }
 0x7b7   :  { %5812 = vmatpush1.bf16.msra.mxu1 %v7677_v45 }
 0x7b8   :  { %5814 = vmatprep.subr.bf16.mxu1 %v7684_v54  ;;  %5784 = vmatpush1.bf16.msra.mxu0 %v7686_v3 }
 0x7b9   :  { %5786 = vmatprep.subr.bf16.mxu0 %v7694_v14 }
 0x7bb   :  { %5816 = vmatpush1.bf16.msra.mxu1 %v7689_v34 }
 0x7bc   :  { %5818 = vmatprep.subr.bf16.mxu1 %v7696_v58  ;;  %5788 = vmatpush1.bf16.msra.mxu0 %v7698_v8 }
 0x7bd   :  { %5790 = vmatprep.subr.bf16.mxu0 %v7706_v61 }
 0x7bf   :  { %5820 = vmatpush1.bf16.msra.mxu1 %v7701_v7 }
 0x7c0   :  { %5822 = vmatprep.subr.bf16.mxu1 %v7708_v63  ;;  %5792 = vmatpush1.bf16.msra.mxu0 %v7710_v38 }
 0x7c1   :  { %5794 = vmatprep.subr.bf16.mxu0 %v7717_v46 }
 0x7c3   :  { %5824 = vmatpush1.bf16.msra.mxu1 %v7713_v62 }
 0x7c4   :  { %5826 = vmatprep.subr.bf16.mxu1 %v7719_v56  ;;  %5796 = vmatpush1.bf16.msra.mxu0 %v7722_v42 }
 0x7c5   :  { %5798 = vmatprep.subr.bf16.mxu0 %v7728_v53 }
 0x7c7   :  { %5828 = vmatpush1.bf16.msra.mxu1 %v7726_v47 }
 0x7c8   :  { %5830 = vmatprep.subr.bf16.mxu1 %v7730_v9  ;;  %5800 = vmatpush1.bf16.msra.mxu0 %v7733_v52 }
 0x7c9   :  { %5802 = vmatprep.subr.bf16.mxu0 %v7742_v48 }
 0x7cb   :  { %5832 = vmatpush1.bf16.msra.mxu1 %v7737_v32 }
 0x7cc   :  { %5834 = vmatprep.subr.bf16.mxu1 %v7744_v49  ;;  %5804 = vmatpush1.bf16.msra.mxu0 %v7746_v30 }
 0x7cd   :  { %5838 = vmatprep.subr.bf16.mxu0 %v7658_v57 }
 0x7cf   :  { %5836 = vmatpush1.bf16.msra.mxu1 %v7749_v20 }
 0x7d0   :  { %5870 = vmatprep.subr.bf16.mxu1 %v7660_v51 }
 0x84c   :  { %v2250_v26 = vpop.f32.mrb[14].mxu0  ;;  %v2321_v37 = vpop.f32.mrb[14].mxu1 }
 0x84d   :  { %v6427_v21 = vadd.f32 %v2250_v26, %v7271_v19  ;;  %v2252_v17 = vpop.f32.mrb[15].mxu0  ;;  %v2323_v1 = vpop.f32.mrb[15].mxu1  ;;  %v6443_v33 = vadd.f32 %v2321_v37, %v7281_v24 }
 0x84e   :  { %v6428_v40 = vadd.f32 %v2252_v17, %v7277_v27  ;;  %v6444_v50 = vadd.f32 %v2323_v1, %v7288_v43  ;;  %v2422_v43 = vld [vmem:[%s8266_s6] sm:$0xf] }
 0x84f   :  { %v2330_v36 = vmul.f32 0.5, %v6427_v21  ;;  %v7806_v21 = vrot.slane %v2422_v43, %v7268_v18 }
 0x850   :  { %v2334_v16 = vmul.f32 0.5, %v6428_v40  ;;  %v2339_v5 = vmul.f32 0.5, %v6444_v50 }
 0x851   :  { %6628 = vtanh.f32 %v2330_v36  ;;  %v7810_v36 = vrot.slane %v2422_v43, %v7274_v23 }
 0x852   :  { %6630 = vtanh.f32 %v2334_v16 }
 0x853   :  { %6632 = vtanh.f32 %v6443_v33 }
 0x854   :  { %6634 = vtanh.f32 %v2339_v5 }
 0x85b   :  { %v6629_v39 = vpop.eup %6628 }
 0x85c   :  { %v6631_v44 = vpop.eup %6630  ;;  %v2332_v59 = vmul.f32 0.5, %v6629_v39 }
 0x85d   :  { %v2336_v60 = vmul.f32 0.5, %v6631_v44  ;;  %v6633_v4 = vpop.eup %6632 }
 0x85e   :  { %v2333_v19 = vadd.f32 0.5, %v2332_v59  ;;  %v6635_v28 = vpop.eup %6634  ;;  %v7816_v59 = vrot.slane %v2422_v43, %v170_v29 }
 0x85f   :  { %v2337_v35 = vadd.f32 0.5, %v2336_v60  ;;  %v2341_v24 = vmul.f32 0.5, %v6635_v28 }
 0x860   :  { %v2344_v22 = vmul.f32 %v6633_v4, %v2333_v19 }
 0x861   :  { %v2343_v27 = vmul.f32 %v2337_v35, %v7621_v55  ;;  %v2342_v41 = vadd.f32 0.5, %v2341_v24  ;;  %v7803_v55 = vrot.slane %v2422_v43, %v7262_v13 }
 0x863   :  { %v2345_v11 = vadd.f32 %v2344_v22, %v2343_v27 }
 0x865   :  { %6636 = vtanh.f32 %v2345_v11 }
 0x86f   :  { %v6637_v26 = vpop.eup %6636 }
 0x870   :  { %v2347_v37 = vmul.f32 %v6637_v26, %v2342_v41 }
 0x872   :  { %2551 = vmatmul.mubr.f32.gmra.mrb[30].mxu0 %v2347_v37  ;;  %2664 = vmatmul.mubr.f32.gmra.mrb[30].mxu1 %v2347_v37 }
 0x873   :  { %2834 = vmatprep.mubr.f32.mxu0 %v6919_v0  ;;  %2905 = vmatprep.mubr.f32.mxu1 %v6919_v0 }
 0x876   :  { %2835 = vmatmul.mubr.f32.vlgmr.msra.gmra.mrb[16].mxu0 %v6919_v0  ;;  %2906 = vmatmul.mubr.f32.vlgmr.msra.gmra.mrb[16].mxu1 %v6919_v0 }
 0x877   :  { %5840 = vmatpush1.bf16.msra.mxu0 %v7662_v10  ;;  %5872 = vmatpush1.bf16.msra.mxu1 %v7665_v15 }
 0x878   :  { %5842 = vmatprep.subr.bf16.mxu0 %v7670_v31  ;;  %5874 = vmatprep.subr.bf16.mxu1 %v7672_v6 }
 0x879   :  { %3067 = vmatprep.mubr.f32.mxu0 %v6919_v0  ;;  %3138 = vmatprep.mubr.f32.mxu1 %v6919_v0 }
 0x87b   :  { %5844 = vmatpush1.bf16.msra.mxu0 %v7674_v2  ;;  %5876 = vmatpush1.bf16.msra.mxu1 %v7677_v45 }
 0x87c   :  { %5846 = vmatprep.subr.bf16.mxu0 %v7682_v25  ;;  %5878 = vmatprep.subr.bf16.mxu1 %v7684_v54 }
 0x87f   :  { %5848 = vmatpush1.bf16.msra.mxu0 %v7686_v3  ;;  %5880 = vmatpush1.bf16.msra.mxu1 %v7689_v34 }
 0x880   :  { %5850 = vmatprep.subr.bf16.mxu0 %v7694_v14  ;;  %5882 = vmatprep.subr.bf16.mxu1 %v7696_v58 }
 0x883   :  { %5852 = vmatpush1.bf16.msra.mxu0 %v7698_v8  ;;  %5884 = vmatpush1.bf16.msra.mxu1 %v7701_v7 }
 0x884   :  { %5854 = vmatprep.subr.bf16.mxu0 %v7706_v61  ;;  %5886 = vmatprep.subr.bf16.mxu1 %v7708_v63 }
 0x887   :  { %5856 = vmatpush1.bf16.msra.mxu0 %v7710_v38  ;;  %5888 = vmatpush1.bf16.msra.mxu1 %v7713_v62 }
 0x888   :  { %5858 = vmatprep.subr.bf16.mxu0 %v7717_v46  ;;  %5890 = vmatprep.subr.bf16.mxu1 %v7719_v56 }
 0x88b   :  { %5860 = vmatpush1.bf16.msra.mxu0 %v7722_v42  ;;  %5892 = vmatpush1.bf16.msra.mxu1 %v7726_v47 }
 0x88c   :  { %5862 = vmatprep.subr.bf16.mxu0 %v7728_v53  ;;  %5894 = vmatprep.subr.bf16.mxu1 %v7730_v9 }
 0x88f   :  { %5864 = vmatpush1.bf16.msra.mxu0 %v7733_v52  ;;  %5896 = vmatpush1.bf16.msra.mxu1 %v7737_v32 }
 0x890   :  { %5866 = vmatprep.subr.bf16.mxu0 %v7742_v48  ;;  %5898 = vmatprep.subr.bf16.mxu1 %v7744_v49 }
 0x893   :  { %5868 = vmatpush1.bf16.msra.mxu0 %v7746_v30  ;;  %5900 = vmatpush1.bf16.msra.mxu1 %v7749_v20 }
 0x894   :  { %5902 = vmatprep.subr.bf16.mxu0 %v7658_v57  ;;  %5934 = vmatprep.subr.bf16.mxu1 %v7660_v51 }
 0x949   :  { %v2836_v17 = vpop.f32.mrb[16].mxu0  ;;  %v2907_v1 = vpop.f32.mrb[16].mxu1 }
 0x94a   :  { %v6445_v40 = vadd.f32 %v2836_v17, %v7803_v55  ;;  %v2838_v16 = vpop.f32.mrb[17].mxu0  ;;  %v2909_v33 = vpop.f32.mrb[17].mxu1  ;;  %v6461_v44 = vadd.f32 %v2907_v1, %v7810_v36 }
 0x94b   :  { %v6446_v50 = vadd.f32 %v2838_v16, %v7806_v21  ;;  %v6462_v60 = vadd.f32 %v2909_v33, %v7816_v59 }
 0x94c   :  { %v2916_v5 = vmul.f32 0.5, %v6445_v40 }
 0x94d   :  { %v2920_v39 = vmul.f32 0.5, %v6446_v50  ;;  %v2925_v19 = vmul.f32 0.5, %v6462_v60 }
 0x94e   :  { %6638 = vtanh.f32 %v2916_v5 }
 0x94f   :  { %6640 = vtanh.f32 %v2920_v39 }
 0x950   :  { %6642 = vtanh.f32 %v6461_v44 }
 0x951   :  { %6644 = vtanh.f32 %v2925_v19 }
 0x958   :  { %v6639_v4 = vpop.eup %6638 }
 0x959   :  { %v6641_v35 = vpop.eup %6640  ;;  %v2918_v22 = vmul.f32 0.5, %v6639_v4 }
 0x95a   :  { %v2922_v27 = vmul.f32 0.5, %v6641_v35  ;;  %v6643_v28 = vpop.eup %6642 }
 0x95b   :  { %v2919_v11 = vadd.f32 0.5, %v2918_v22  ;;  %v6645_v12 = vpop.eup %6644 }
 0x95c   :  { %v2923_v24 = vadd.f32 0.5, %v2922_v27  ;;  %v2927_v29 = vmul.f32 0.5, %v6645_v12 }
 0x95d   :  { %v2930_v41 = vmul.f32 %v6643_v28, %v2919_v11 }
 0x95e   :  { %v2929_v26 = vmul.f32 0.0, %v2923_v24  ;;  %v2928_v43 = vadd.f32 0.5, %v2927_v29 }
 0x960   :  { %v7819_v37 = vadd.f32 %v2930_v41, %v2929_v26 }
 0x962   :  { %6646 = vtanh.f32 %v7819_v37 }
 0x96c   :  { %v6647_v17 = vpop.eup %6646 }
 0x96d   :  { %v7822_v1 = vmul.f32 %v6647_v17, %v2928_v43 }
 0x96f   :  { %3068 = vmatmul.mubr.f32.vlgmr.msra.gmra.mrb[18].mxu0 %v7822_v1  ;;  %3139 = vmatmul.mubr.f32.vlgmr.msra.gmra.mrb[18].mxu1 %v7822_v1 }
 0x970   :  { %5904 = vmatpush1.bf16.msra.mxu0 %v7662_v10  ;;  %5936 = vmatpush1.bf16.msra.mxu1 %v7665_v15 }
 0x971   :  { %5906 = vmatprep.subr.bf16.mxu0 %v7670_v31  ;;  %5938 = vmatprep.subr.bf16.mxu1 %v7672_v6 }
 0x972   :  { %3301 = vmatprep.mubr.f32.mxu0 %v6919_v0  ;;  %3372 = vmatprep.mubr.f32.mxu1 %v6919_v0 }
 0x974   :  { %5908 = vmatpush1.bf16.msra.mxu0 %v7674_v2  ;;  %5940 = vmatpush1.bf16.msra.mxu1 %v7677_v45 }
 0x975   :  { %5910 = vmatprep.subr.bf16.mxu0 %v7682_v25  ;;  %5942 = vmatprep.subr.bf16.mxu1 %v7684_v54 }
 0x978   :  { %5912 = vmatpush1.bf16.msra.mxu0 %v7686_v3  ;;  %5944 = vmatpush1.bf16.msra.mxu1 %v7689_v34 }
 0x979   :  { %5914 = vmatprep.subr.bf16.mxu0 %v7694_v14  ;;  %5946 = vmatprep.subr.bf16.mxu1 %v7696_v58 }
 0x97c   :  { %5916 = vmatpush1.bf16.msra.mxu0 %v7698_v8  ;;  %5948 = vmatpush1.bf16.msra.mxu1 %v7701_v7 }
 0x97d   :  { %5918 = vmatprep.subr.bf16.mxu0 %v7706_v61  ;;  %5950 = vmatprep.subr.bf16.mxu1 %v7708_v63 }
 0x980   :  { %5920 = vmatpush1.bf16.msra.mxu0 %v7710_v38  ;;  %5952 = vmatpush1.bf16.msra.mxu1 %v7713_v62 }
 0x981   :  { %5922 = vmatprep.subr.bf16.mxu0 %v7717_v46  ;;  %5954 = vmatprep.subr.bf16.mxu1 %v7719_v56 }
 0x984   :  { %5924 = vmatpush1.bf16.msra.mxu0 %v7722_v42  ;;  %5956 = vmatpush1.bf16.msra.mxu1 %v7726_v47 }
 0x985   :  { %5926 = vmatprep.subr.bf16.mxu0 %v7728_v53  ;;  %5958 = vmatprep.subr.bf16.mxu1 %v7730_v9 }
 0x988   :  { %5928 = vmatpush1.bf16.msra.mxu0 %v7733_v52  ;;  %5960 = vmatpush1.bf16.msra.mxu1 %v7737_v32 }
 0x989   :  { %5930 = vmatprep.subr.bf16.mxu0 %v7742_v48  ;;  %5962 = vmatprep.subr.bf16.mxu1 %v7744_v49 }
 0x98c   :  { %5932 = vmatpush1.bf16.msra.mxu0 %v7746_v30  ;;  %5964 = vmatpush1.bf16.msra.mxu1 %v7749_v20 }
 0x98d   :  { %5966 = vmatprep.subr.bf16.mxu0 %v7658_v57  ;;  %5998 = vmatprep.subr.bf16.mxu1 %v7660_v51 }
 0xa42   :  { %v3069_v40 = vpop.f32.mrb[18].mxu0  ;;  %v3140_v16 = vpop.f32.mrb[18].mxu1 }
 0xa43   :  { %v6447_v33 = vadd.f32 %v3069_v40, %v7803_v55  ;;  %v3071_v50 = vpop.f32.mrb[19].mxu0  ;;  %v3142_v5 = vpop.f32.mrb[19].mxu1  ;;  %v6463_v19 = vadd.f32 %v3140_v16, %v7810_v36 }
 0xa44   :  { %v6448_v39 = vadd.f32 %v3071_v50, %v7806_v21  ;;  %v6464_v4 = vadd.f32 %v3142_v5, %v7816_v59  ;;  %v3645_v50 = vld [vmem:[#allocation13 + $0x20] sm:$0xff] }
 0xa45   :  { %v3149_v44 = vmul.f32 0.5, %v6447_v33  ;;  %v3641_v33 = vld [vmem:[#allocation13] sm:$0xff] }
 0xa46   :  { %v3153_v60 = vmul.f32 0.5, %v6448_v39  ;;  %v3158_v57 = vmul.f32 0.5, %v6464_v4  ;;  %v7922_v39 = vpack.c.bf16 %v3645_v50, %v3641_v33  ;;  %v3650_v4 = vld [vmem:[#allocation13 + $0x48] sm:$0xff]  ;;  %v3675_v50 = vld [vmem:[#allocation13 + $0x110] sm:$0xff] }
 0xa47   :  { %6648 = vtanh.f32 %v3149_v44  ;;  %v3643_v44 = vld [vmem:[#allocation13 + $0x10] sm:$0xff] }
 0xa48   :  { %6650 = vtanh.f32 %v3153_v60  ;;  %v3647_v60 = vld [vmem:[#allocation13 + $0x30] sm:$0xff] }
 0xa49   :  { %6652 = vtanh.f32 %v6463_v19  ;;  %v7925_v19 = vpack.c.bf16 %v3647_v60, %v3643_v44  ;;  %v3679_v44 = vld [vmem:[#allocation13 + $0x130] sm:$0xff] }
 0xa4a   :  { %6654 = vtanh.f32 %v3158_v57  ;;  %v3654_v57 = vld [vmem:[#allocation13 + $0x68] sm:$0xff]  ;;  %v7973_v60 = vpack.c.bf16 %v3679_v44, %v3675_v50  ;;  %v3701_v50 = vld [vmem:[#allocation13 + $0x1e0] sm:$0xff] }
 0xa51   :  { %v6649_v35 = vpop.eup %6648 }
 0xa52   :  { %v6651_v51 = vpop.eup %6650  ;;  %v3151_v22 = vmul.f32 0.5, %v6649_v35  ;;  %v3652_v35 = vld [vmem:[#allocation13 + $0x58] sm:$0xff] }
 0xa53   :  { %v3155_v27 = vmul.f32 0.5, %v6651_v51  ;;  %v6653_v28 = vpop.eup %6652  ;;  %v7930_v51 = vpack.c.bf16 %v3654_v57, %v3650_v4  ;;  %v3682_v4 = vld [vmem:[#allocation13 + $0x148] sm:$0xff] }
 0xa54   :  { %v3152_v11 = vadd.f32 0.5, %v3151_v22  ;;  %v6655_v29 = vpop.eup %6654  ;;  %v3656_v22 = vld [vmem:[#allocation13 + $0x78] sm:$0xff]  ;;  %v3686_v57 = vld [vmem:[#allocation13 + $0x168] sm:$0xff] }
 0xa55   :  { %v3156_v24 = vadd.f32 0.5, %v3155_v27  ;;  %v3160_v43 = vmul.f32 0.5, %v6655_v29  ;;  %v3649_v27 = vld [vmem:[#allocation13 + $0x40] sm:$0xff]  ;;  %v3658_v29 = vld [vmem:[#allocation13 + $0x88] sm:$0xff] }
 0xa56   :  { %v3163_v41 = vmul.f32 %v6653_v28, %v3152_v11  ;;  %v3653_v11 = vld [vmem:[#allocation13 + $0x60] sm:$0xff]  ;;  %v7932_v28 = vpack.c.bf16 %v3656_v22, %v3652_v35  ;;  %v3684_v35 = vld [vmem:[#allocation13 + $0x158] sm:$0xff]  ;;  %v7978_v22 = vpack.c.bf16 %v3686_v57, %v3682_v4  ;;  %v3699_v57 = vld [vmem:[#allocation13 + $0x1d0] sm:$0xff] }
 0xa57   :  { %v3162_v26 = vmul.f32 %v3156_v24, %v7819_v37  ;;  %v3161_v17 = vadd.f32 0.5, %v3160_v43  ;;  %v3648_v37 = vld [vmem:[#allocation13 + $0x38] sm:$0xff]  ;;  %v7934_v24 = vpack.c.bf16 %v3653_v11, %v3649_v27  ;;  %v3662_v43 = vld [vmem:[#allocation13 + $0xa8] sm:$0xff]  ;;  %v3681_v11 = vld [vmem:[#allocation13 + $0x140] sm:$0xff] }
 0xa58   :  { %v3688_v27 = vld [vmem:[#allocation13 + $0x178] sm:$0xff] }
 0xa59   :  { %v7865_v12 = vadd.f32 %v3163_v41, %v3162_v26  ;;  %v3651_v41 = vld [vmem:[#allocation13 + $0x50] sm:$0xff] }
 0xa5a   :  { %v3655_v26 = vld [vmem:[#allocation13 + $0x70] sm:$0xff] }
 0xa5b   :  { %6656 = vtanh.f32 %v7865_v12 }
 0xa65   :  { %v6657_v40 = vpop.eup %6656 }
 0xa66   :  { %v7868_v16 = vmul.f32 %v6657_v40, %v3161_v17  ;;  %v3660_v17 = vld [vmem:[#allocation13 + $0x98] sm:$0xff]  ;;  %v7942_v40 = vpack.c.bf16 %v3662_v43, %v3658_v29  ;;  %v3683_v43 = vld [vmem:[#allocation13 + $0x150] sm:$0xff] }
 0xa68   :  { %3302 = vmatmul.mubr.f32.vlgmr.msra.gmra.mrb[20].mxu0 %v7868_v16  ;;  %3373 = vmatmul.mubr.f32.vlgmr.msra.gmra.mrb[20].mxu1 %v7868_v16 }
 0xa69   :  { %5968 = vmatpush1.bf16.msra.mxu0 %v7662_v10  ;;  %6000 = vmatpush1.bf16.msra.mxu1 %v7665_v15 }
 0xa6a   :  { %5970 = vmatprep.subr.bf16.mxu0 %v7670_v31  ;;  %6002 = vmatprep.subr.bf16.mxu1 %v7672_v6 }
 0xa6b   :  { %3535 = vmatprep.mubr.f32.mxu0 %v6919_v0  ;;  %3606 = vmatprep.mubr.f32.mxu1 %v6919_v0 }
 0xa6d   :  { %5972 = vmatpush1.bf16.msra.mxu0 %v7674_v2  ;;  %6004 = vmatpush1.bf16.msra.mxu1 %v7677_v45 }
 0xa6e   :  { %5974 = vmatprep.subr.bf16.mxu0 %v7682_v25  ;;  %6006 = vmatprep.subr.bf16.mxu1 %v7684_v54 }
 0xa71   :  { %5976 = vmatpush1.bf16.msra.mxu0 %v7686_v3  ;;  %6008 = vmatpush1.bf16.msra.mxu1 %v7689_v34 }
 0xa72   :  { %5978 = vmatprep.subr.bf16.mxu0 %v7694_v14  ;;  %6010 = vmatprep.subr.bf16.mxu1 %v7696_v58 }
 0xa75   :  { %5980 = vmatpush1.bf16.msra.mxu0 %v7698_v8  ;;  %6012 = vmatpush1.bf16.msra.mxu1 %v7701_v7 }
 0xa76   :  { %5982 = vmatprep.subr.bf16.mxu0 %v7706_v61  ;;  %6014 = vmatprep.subr.bf16.mxu1 %v7708_v63 }
 0xa79   :  { %5984 = vmatpush1.bf16.msra.mxu0 %v7710_v38  ;;  %6016 = vmatpush1.bf16.msra.mxu1 %v7713_v62 }
 0xa7a   :  { %5986 = vmatprep.subr.bf16.mxu0 %v7717_v46  ;;  %6018 = vmatprep.subr.bf16.mxu1 %v7719_v56 }
 0xa7d   :  { %5988 = vmatpush1.bf16.msra.mxu0 %v7722_v42  ;;  %6020 = vmatpush1.bf16.msra.mxu1 %v7726_v47 }
 0xa7e   :  { %5990 = vmatprep.subr.bf16.mxu0 %v7728_v53  ;;  %6022 = vmatprep.subr.bf16.mxu1 %v7730_v9 }
 0xa81   :  { %5992 = vmatpush1.bf16.msra.mxu0 %v7733_v52  ;;  %6024 = vmatpush1.bf16.msra.mxu1 %v7737_v32 }
 0xa82   :  { %5994 = vmatprep.subr.bf16.mxu0 %v7742_v48  ;;  %6026 = vmatprep.subr.bf16.mxu1 %v7744_v49  ;;  %v3642_v48 = vld [vmem:[#allocation13 + $0x8] sm:$0xff] }
 0xa83   :  { %v3646_v49 = vld [vmem:[#allocation13 + $0x28] sm:$0xff] }
 0xa85   :  { %5996 = vmatpush1.bf16.msra.mxu0 %v7746_v30  ;;  %6028 = vmatpush1.bf16.msra.mxu1 %v7749_v20  ;;  %v3644_v30 = vld [vmem:[#allocation13 + $0x18] sm:$0xff]  ;;  %v7918_v20 = vpack.c.bf16 %v3646_v49, %v3642_v48  ;;  %v3673_v49 = vld [vmem:[#allocation13 + $0x100] sm:$0xff] }
 0xa86   :  { %v7920_v5 = vpack.c.bf16 %v3648_v37, %v3644_v30  ;;  %v3680_v48 = vld [vmem:[#allocation13 + $0x138] sm:$0xff]  ;;  %v3677_v30 = vld [vmem:[#allocation13 + $0x120] sm:$0xff] }
 0xa87   :  { %6030 = vmatprep.subr.bf16.mxu0 %v7918_v20  ;;  %v7970_v33 = vpack.c.bf16 %v3677_v30, %v3673_v49  ;;  %v3704_v49 = vld [vmem:[#allocation13 + $0x1f8] sm:$0xff]  ;;  %v3697_v30 = vld [vmem:[#allocation13 + $0x1c0] sm:$0xff] }
 0xa88   :  { %6062 = vmatprep.subr.bf16.mxu1 %v7920_v5  ;;  %v8006_v4 = vpack.c.bf16 %v3701_v50, %v3697_v30 }
 0xb3b   :  { %v3303_v10 = vpop.f32.mrb[20].mxu0  ;;  %v3374_v15 = vpop.f32.mrb[20].mxu1 }
 0xb3c   :  { %v6449_v31 = vadd.f32 %v3303_v10, %v7803_v55  ;;  %v3305_v6 = vpop.f32.mrb[21].mxu0  ;;  %v3376_v2 = vpop.f32.mrb[21].mxu1  ;;  %v6465_v3 = vadd.f32 %v3374_v15, %v7810_v36  ;;  %v3664_v10 = vld [vmem:[#allocation13 + $0xb8] sm:$0xff]  ;;  %v3657_v15 = vld [vmem:[#allocation13 + $0x80] sm:$0xff] }
 0xb3d   :  { %v6450_v45 = vadd.f32 %v3305_v6, %v7806_v21  ;;  %v6466_v34 = vadd.f32 %v3376_v2, %v7816_v59  ;;  %v7944_v6 = vpack.c.bf16 %v3664_v10, %v3660_v17  ;;  %v3687_v17 = vld [vmem:[#allocation13 + $0x170] sm:$0xff] }
 0xb3e   :  { %v3383_v25 = vmul.f32 0.5, %v6449_v31  ;;  %v3661_v31 = vld [vmem:[#allocation13 + $0xa0] sm:$0xff]  ;;  %v7985_v10 = vpack.c.bf16 %v3687_v17, %v3683_v43 }
 0xb3f   :  { %v3387_v54 = vmul.f32 0.5, %v6450_v45  ;;  %v3392_v14 = vmul.f32 0.5, %v6466_v34  ;;  %v7946_v2 = vpack.c.bf16 %v3661_v31, %v3657_v15  ;;  %v3659_v45 = vld [vmem:[#allocation13 + $0x90] sm:$0xff]  ;;  %v3670_v34 = vld [vmem:[#allocation13 + $0xe8] sm:$0xff] }
 0xb40   :  { %6658 = vtanh.f32 %v3383_v25  ;;  %v3663_v25 = vld [vmem:[#allocation13 + $0xb0] sm:$0xff]  ;;  %v3690_v15 = vld [vmem:[#allocation13 + $0x188] sm:$0xff] }
 0xb41   :  { %6660 = vtanh.f32 %v3387_v54  ;;  %v7949_v54 = vpack.c.bf16 %v3663_v25, %v3659_v45  ;;  %v3694_v31 = vld [vmem:[#allocation13 + $0x1a8] sm:$0xff]  ;;  %v3692_v45 = vld [vmem:[#allocation13 + $0x198] sm:$0xff] }
 0xb42   :  { %6662 = vtanh.f32 %v6465_v3  ;;  %v3666_v3 = vld [vmem:[#allocation13 + $0xc8] sm:$0xff]  ;;  %v7990_v25 = vpack.c.bf16 %v3694_v31, %v3690_v15 }
 0xb43   :  { %6664 = vtanh.f32 %v3392_v14  ;;  %v3668_v14 = vld [vmem:[#allocation13 + $0xd8] sm:$0xff] }
 0xb4a   :  { %v6659_v58 = vpop.eup %6658 }
 0xb4b   :  { %v6661_v8 = vpop.eup %6660  ;;  %v3385_v7 = vmul.f32 0.5, %v6659_v58  ;;  %v7954_v58 = vpack.c.bf16 %v3670_v34, %v3666_v3  ;;  %v3696_v3 = vld [vmem:[#allocation13 + $0x1b8] sm:$0xff]  ;;  %v3689_v34 = vld [vmem:[#allocation13 + $0x180] sm:$0xff] }
 0xb4c   :  { %v3389_v61 = vmul.f32 0.5, %v6661_v8  ;;  %v6663_v38 = vpop.eup %6662  ;;  %v3672_v8 = vld [vmem:[#allocation13 + $0xf8] sm:$0xff] }
 0xb4d   :  { %v3386_v63 = vadd.f32 0.5, %v3385_v7  ;;  %v6665_v47 = vpop.eup %6664  ;;  %v3665_v7 = vld [vmem:[#allocation13 + $0xc0] sm:$0xff] }
 0xb4e   :  { %v3390_v62 = vadd.f32 0.5, %v3389_v61  ;;  %v3394_v53 = vmul.f32 0.5, %v6665_v47  ;;  %v3669_v61 = vld [vmem:[#allocation13 + $0xe0] sm:$0xff]  ;;  %v3674_v47 = vld [vmem:[#allocation13 + $0x108] sm:$0xff] }
 0xb4f   :  { %v3397_v46 = vmul.f32 %v6663_v38, %v3386_v63  ;;  %v7956_v63 = vpack.c.bf16 %v3672_v8, %v3668_v14  ;;  %v7958_v38 = vpack.c.bf16 %v3669_v61, %v3665_v7  ;;  %v3693_v14 = vld [vmem:[#allocation13 + $0x1a0] sm:$0xff]  ;;  %v7992_v8 = vpack.c.bf16 %v3696_v3, %v3692_v45  ;;  %v3691_v61 = vld [vmem:[#allocation13 + $0x190] sm:$0xff] }
 0xb50   :  { %v3396_v56 = vmul.f32 %v3390_v62, %v7865_v12  ;;  %v3395_v9 = vadd.f32 0.5, %v3394_v53  ;;  %v7937_v12 = vpack.c.bf16 %v3655_v26, %v3651_v41  ;;  %v3667_v62 = vld [vmem:[#allocation13 + $0xd0] sm:$0xff]  ;;  %v3678_v53 = vld [vmem:[#allocation13 + $0x128] sm:$0xff]  ;;  %v3685_v41 = vld [vmem:[#allocation13 + $0x160] sm:$0xff]  ;;  %v7980_v26 = vpack.c.bf16 %v3688_v27, %v3684_v35 }
 0xb51   :  { %v7982_v29 = vpack.c.bf16 %v3685_v41, %v3681_v11  ;;  %v7994_v7 = vpack.c.bf16 %v3693_v14, %v3689_v34  ;;  %v3703_v35 = vld [vmem:[#allocation13 + $0x1f0] sm:$0xff] }
 0xb52   :  { %v7909_v42 = vadd.f32 %v3397_v46, %v3396_v56  ;;  %v3671_v46 = vld [vmem:[#allocation13 + $0xf0] sm:$0xff]  ;;  %v8009_v27 = vpack.c.bf16 %v3703_v35, %v3699_v57 }
 0xb53   :  { %v7961_v56 = vpack.c.bf16 %v3671_v46, %v3667_v62  ;;  %v3695_v62 = vld [vmem:[#allocation13 + $0x1b0] sm:$0xff] }
 0xb54   :  { %6666 = vtanh.f32 %v7909_v42  ;;  %v7997_v46 = vpack.c.bf16 %v3695_v62, %v3691_v61 }
 0xb5e   :  { %v6667_v52 = vpop.eup %6666 }
 0xb5f   :  { %v7912_v32 = vmul.f32 %v6667_v52, %v3395_v9  ;;  %v3676_v9 = vld [vmem:[#allocation13 + $0x118] sm:$0xff]  ;;  %v7966_v52 = vpack.c.bf16 %v3678_v53, %v3674_v47  ;;  %v3698_v47 = vld [vmem:[#allocation13 + $0x1c8] sm:$0xff] }
 0xb60   :  { %v7968_v37 = vpack.c.bf16 %v3680_v48, %v3676_v9  ;;  %v3702_v53 = vld [vmem:[#allocation13 + $0x1e8] sm:$0xff]  ;;  %v3700_v9 = vld [vmem:[#allocation13 + $0x1d8] sm:$0xff] }
 0xb61   :  { %3536 = vmatmul.mubr.f32.vlgmr.msra.gmra.mrb[22].mxu0 %v7912_v32  ;;  %3607 = vmatmul.mubr.f32.vlgmr.msra.gmra.mrb[22].mxu1 %v7912_v32  ;;  %v8002_v48 = vpack.c.bf16 %v3702_v53, %v3698_v47  ;;  %v8004_v44 = vpack.c.bf16 %v3704_v49, %v3700_v9 }
 0xb62   :  { %3769 = vmatprep.mubr.f32.mxu0 %v6919_v0  ;;  %3840 = vmatprep.mubr.f32.mxu1 %v6919_v0 }
 0xb63   :  { %6032 = vmatpush1.bf16.msra.mxu0 %v7922_v39  ;;  %6064 = vmatpush1.bf16.msra.mxu1 %v7925_v19 }
 0xb64   :  { %6034 = vmatprep.subr.bf16.mxu0 %v7930_v51  ;;  %6066 = vmatprep.subr.bf16.mxu1 %v7932_v28 }
 0xb67   :  { %6036 = vmatpush1.bf16.msra.mxu0 %v7934_v24  ;;  %6068 = vmatpush1.bf16.msra.mxu1 %v7937_v12 }
 0xb68   :  { %6038 = vmatprep.subr.bf16.mxu0 %v7942_v40  ;;  %6070 = vmatprep.subr.bf16.mxu1 %v7944_v6 }
 0xb6b   :  { %6040 = vmatpush1.bf16.msra.mxu0 %v7946_v2  ;;  %6072 = vmatpush1.bf16.msra.mxu1 %v7949_v54 }
 0xb6c   :  { %6042 = vmatprep.subr.bf16.mxu0 %v7954_v58  ;;  %6074 = vmatprep.subr.bf16.mxu1 %v7956_v63 }
 0xb6f   :  { %6044 = vmatpush1.bf16.msra.mxu0 %v7958_v38  ;;  %6076 = vmatpush1.bf16.msra.mxu1 %v7961_v56 }
 0xb70   :  { %6046 = vmatprep.subr.bf16.mxu0 %v7966_v52  ;;  %6078 = vmatprep.subr.bf16.mxu1 %v7968_v37 }
 0xb73   :  { %6048 = vmatpush1.bf16.msra.mxu0 %v7970_v33  ;;  %6080 = vmatpush1.bf16.msra.mxu1 %v7973_v60 }
 0xb74   :  { %6050 = vmatprep.subr.bf16.mxu0 %v7978_v22  ;;  %6082 = vmatprep.subr.bf16.mxu1 %v7980_v26 }
 0xb77   :  { %6052 = vmatpush1.bf16.msra.mxu0 %v7982_v29  ;;  %6084 = vmatpush1.bf16.msra.mxu1 %v7985_v10 }
 0xb78   :  { %6054 = vmatprep.subr.bf16.mxu0 %v7990_v25  ;;  %6086 = vmatprep.subr.bf16.mxu1 %v7992_v8 }
 0xb7b   :  { %6056 = vmatpush1.bf16.msra.mxu0 %v7994_v7  ;;  %6088 = vmatpush1.bf16.msra.mxu1 %v7997_v46 }
 0xb7c   :  { %6058 = vmatprep.subr.bf16.mxu0 %v8002_v48  ;;  %6090 = vmatprep.subr.bf16.mxu1 %v8004_v44 }
 0xb7f   :  { %6060 = vmatpush1.bf16.msra.mxu0 %v8006_v4  ;;  %6092 = vmatpush1.bf16.msra.mxu1 %v8009_v27 }
 0xb80   :  { %6094 = vmatprep.subr.bf16.mxu0 %v7918_v20  ;;  %6126 = vmatprep.subr.bf16.mxu1 %v7920_v5 }
 0xc34   :  { %v3537_v11 = vpop.f32.mrb[22].mxu0  ;;  %v3608_v41 = vpop.f32.mrb[22].mxu1 }
 0xc35   :  { %v6451_v43 = vadd.f32 %v3537_v11, %v7803_v55  ;;  %v3539_v17 = vpop.f32.mrb[23].mxu0  ;;  %v3610_v15 = vpop.f32.mrb[23].mxu1  ;;  %v6467_v34 = vadd.f32 %v3608_v41, %v7810_v36 }
 0xc36   :  { %v6452_v31 = vadd.f32 %v3539_v17, %v7806_v21  ;;  %v6468_v14 = vadd.f32 %v3610_v15, %v7816_v59 }
 0xc37   :  { %v3617_v45 = vmul.f32 0.5, %v6451_v43 }
 0xc38   :  { %v3621_v3 = vmul.f32 0.5, %v6452_v31  ;;  %v3626_v61 = vmul.f32 0.5, %v6468_v14 }
 0xc39   :  { %6668 = vtanh.f32 %v3617_v45 }
 0xc3a   :  { %6670 = vtanh.f32 %v3621_v3 }
 0xc3b   :  { %6672 = vtanh.f32 %v6467_v34 }
 0xc3c   :  { %6674 = vtanh.f32 %v3626_v61 }
 0xc43   :  { %v6669_v62 = vpop.eup %6668 }
 0xc44   :  { %v6671_v47 = vpop.eup %6670  ;;  %v3619_v53 = vmul.f32 0.5, %v6669_v62 }
 0xc45   :  { %v3623_v9 = vmul.f32 0.5, %v6671_v47  ;;  %v6673_v30 = vpop.eup %6672 }
 0xc46   :  { %v3620_v49 = vadd.f32 0.5, %v3619_v53  ;;  %v6675_v41 = vpop.eup %6674 }
 0xc47   :  { %v3624_v50 = vadd.f32 0.5, %v3623_v9  ;;  %v3628_v43 = vmul.f32 0.5, %v6675_v41 }
 0xc48   :  { %v3631_v57 = vmul.f32 %v6673_v30, %v3620_v49 }
 0xc49   :  { %v3630_v35 = vmul.f32 %v3624_v50, %v7909_v42  ;;  %v3629_v17 = vadd.f32 0.5, %v3628_v43 }
 0xc4b   :  { %v8021_v11 = vadd.f32 %v3631_v57, %v3630_v35 }
 0xc4d   :  { %6676 = vtanh.f32 %v8021_v11 }
 0xc57   :  { %v6677_v15 = vpop.eup %6676 }
 0xc58   :  { %v8024_v31 = vmul.f32 %v6677_v15, %v3629_v17 }
 0xc5a   :  { %3770 = vmatmul.mubr.f32.vlgmr.msra.gmra.mrb[24].mxu0 %v8024_v31  ;;  %3841 = vmatmul.mubr.f32.vlgmr.msra.gmra.mrb[24].mxu1 %v8024_v31 }
 0xc5b   :  { %6096 = vmatpush1.bf16.msra.mxu0 %v7922_v39  ;;  %6128 = vmatpush1.bf16.msra.mxu1 %v7925_v19 }
 0xc5c   :  { %6098 = vmatprep.subr.bf16.mxu0 %v7930_v51  ;;  %6130 = vmatprep.subr.bf16.mxu1 %v7932_v28 }
 0xc5d   :  { %4003 = vmatprep.mubr.f32.mxu0 %v6919_v0  ;;  %4074 = vmatprep.mubr.f32.mxu1 %v6919_v0 }
 0xc5f   :  { %6100 = vmatpush1.bf16.msra.mxu0 %v7934_v24  ;;  %6132 = vmatpush1.bf16.msra.mxu1 %v7937_v12 }
 0xc60   :  { %6102 = vmatprep.subr.bf16.mxu0 %v7942_v40  ;;  %6134 = vmatprep.subr.bf16.mxu1 %v7944_v6 }
 0xc63   :  { %6104 = vmatpush1.bf16.msra.mxu0 %v7946_v2  ;;  %6136 = vmatpush1.bf16.msra.mxu1 %v7949_v54 }
 0xc64   :  { %6106 = vmatprep.subr.bf16.mxu0 %v7954_v58  ;;  %6138 = vmatprep.subr.bf16.mxu1 %v7956_v63 }
 0xc67   :  { %6108 = vmatpush1.bf16.msra.mxu0 %v7958_v38  ;;  %6140 = vmatpush1.bf16.msra.mxu1 %v7961_v56 }
 0xc68   :  { %6110 = vmatprep.subr.bf16.mxu0 %v7966_v52  ;;  %6142 = vmatprep.subr.bf16.mxu1 %v7968_v37 }
 0xc6b   :  { %6112 = vmatpush1.bf16.msra.mxu0 %v7970_v33  ;;  %6144 = vmatpush1.bf16.msra.mxu1 %v7973_v60 }
 0xc6c   :  { %6114 = vmatprep.subr.bf16.mxu0 %v7978_v22  ;;  %6146 = vmatprep.subr.bf16.mxu1 %v7980_v26 }
 0xc6f   :  { %6116 = vmatpush1.bf16.msra.mxu0 %v7982_v29  ;;  %6148 = vmatpush1.bf16.msra.mxu1 %v7985_v10 }
 0xc70   :  { %6118 = vmatprep.subr.bf16.mxu0 %v7990_v25  ;;  %6150 = vmatprep.subr.bf16.mxu1 %v7992_v8 }
 0xc73   :  { %6120 = vmatpush1.bf16.msra.mxu0 %v7994_v7  ;;  %6152 = vmatpush1.bf16.msra.mxu1 %v7997_v46 }
 0xc74   :  { %6122 = vmatprep.subr.bf16.mxu0 %v8002_v48  ;;  %6154 = vmatprep.subr.bf16.mxu1 %v8004_v44 }
 0xc77   :  { %6124 = vmatpush1.bf16.msra.mxu0 %v8006_v4  ;;  %6156 = vmatpush1.bf16.msra.mxu1 %v8009_v27 }
 0xc78   :  { %6158 = vmatprep.subr.bf16.mxu0 %v7918_v20  ;;  %6190 = vmatprep.subr.bf16.mxu1 %v7920_v5 }
 0xd2d   :  { %v3771_v42 = vpop.f32.mrb[24].mxu0  ;;  %v3842_v45 = vpop.f32.mrb[24].mxu1 }
 0xd2e   :  { %v6453_v3 = vadd.f32 %v3771_v42, %v7803_v55  ;;  %v3773_v34 = vpop.f32.mrb[25].mxu0  ;;  %v3844_v14 = vpop.f32.mrb[25].mxu1  ;;  %v6469_v53 = vadd.f32 %v3842_v45, %v7810_v36 }
 0xd2f   :  { %v6454_v61 = vadd.f32 %v3773_v34, %v7806_v21  ;;  %v6470_v9 = vadd.f32 %v3844_v14, %v7816_v59 }
 0xd30   :  { %v3851_v62 = vmul.f32 0.5, %v6453_v3 }
 0xd31   :  { %v3855_v47 = vmul.f32 0.5, %v6454_v61  ;;  %v3860_v49 = vmul.f32 0.5, %v6470_v9 }
 0xd32   :  { %6678 = vtanh.f32 %v3851_v62 }
 0xd33   :  { %6680 = vtanh.f32 %v3855_v47 }
 0xd34   :  { %6682 = vtanh.f32 %v6469_v53 }
 0xd35   :  { %6684 = vtanh.f32 %v3860_v49 }
 0xd3c   :  { %v6679_v30 = vpop.eup %6678 }
 0xd3d   :  { %v6681_v50 = vpop.eup %6680  ;;  %v3853_v57 = vmul.f32 0.5, %v6679_v30 }
 0xd3e   :  { %v3857_v35 = vmul.f32 0.5, %v6681_v50  ;;  %v6683_v43 = vpop.eup %6682 }
 0xd3f   :  { %v3854_v41 = vadd.f32 0.5, %v3853_v57  ;;  %v6685_v45 = vpop.eup %6684 }
 0xd40   :  { %v3858_v17 = vadd.f32 0.5, %v3857_v35  ;;  %v3862_v34 = vmul.f32 0.5, %v6685_v45 }
 0xd41   :  { %v3865_v15 = vmul.f32 %v6683_v43, %v3854_v41 }
 0xd42   :  { %v3864_v42 = vmul.f32 %v3858_v17, %v8021_v11  ;;  %v3863_v61 = vadd.f32 0.5, %v3862_v34 }
 0xd44   :  { %v8067_v3 = vadd.f32 %v3865_v15, %v3864_v42 }
 0xd46   :  { %6686 = vtanh.f32 %v8067_v3 }
 0xd50   :  { %v6687_v14 = vpop.eup %6686 }
 0xd51   :  { %v8070_v62 = vmul.f32 %v6687_v14, %v3863_v61 }
 0xd53   :  { %4004 = vmatmul.mubr.f32.vlgmr.msra.gmra.mrb[26].mxu0 %v8070_v62  ;;  %4075 = vmatmul.mubr.f32.vlgmr.msra.gmra.mrb[26].mxu1 %v8070_v62 }
 0xd54   :  { %6160 = vmatpush1.bf16.msra.mxu0 %v7922_v39  ;;  %6192 = vmatpush1.bf16.msra.mxu1 %v7925_v19 }
 0xd55   :  { %6162 = vmatprep.subr.bf16.mxu0 %v7930_v51  ;;  %6194 = vmatprep.subr.bf16.mxu1 %v7932_v28 }
 0xd56   :  { %4237 = vmatprep.mubr.f32.mxu0 %v6919_v0  ;;  %4308 = vmatprep.mubr.f32.mxu1 %v6919_v0 }
 0xd58   :  { %6164 = vmatpush1.bf16.msra.mxu0 %v7934_v24  ;;  %6196 = vmatpush1.bf16.msra.mxu1 %v7937_v12 }
 0xd59   :  { %6166 = vmatprep.subr.bf16.mxu0 %v7942_v40  ;;  %6198 = vmatprep.subr.bf16.mxu1 %v7944_v6 }
 0xd5c   :  { %6168 = vmatpush1.bf16.msra.mxu0 %v7946_v2  ;;  %6200 = vmatpush1.bf16.msra.mxu1 %v7949_v54 }
 0xd5d   :  { %6170 = vmatprep.subr.bf16.mxu0 %v7954_v58  ;;  %6202 = vmatprep.subr.bf16.mxu1 %v7956_v63 }
 0xd60   :  { %6172 = vmatpush1.bf16.msra.mxu0 %v7958_v38  ;;  %6204 = vmatpush1.bf16.msra.mxu1 %v7961_v56 }
 0xd61   :  { %6174 = vmatprep.subr.bf16.mxu0 %v7966_v52  ;;  %6206 = vmatprep.subr.bf16.mxu1 %v7968_v37 }
 0xd64   :  { %6176 = vmatpush1.bf16.msra.mxu0 %v7970_v33  ;;  %6208 = vmatpush1.bf16.msra.mxu1 %v7973_v60 }
 0xd65   :  { %6178 = vmatprep.subr.bf16.mxu0 %v7978_v22  ;;  %6210 = vmatprep.subr.bf16.mxu1 %v7980_v26 }
 0xd68   :  { %6180 = vmatpush1.bf16.msra.mxu0 %v7982_v29  ;;  %6212 = vmatpush1.bf16.msra.mxu1 %v7985_v10 }
 0xd69   :  { %6182 = vmatprep.subr.bf16.mxu0 %v7990_v25  ;;  %6214 = vmatprep.subr.bf16.mxu1 %v7992_v8 }
 0xd6c   :  { %6184 = vmatpush1.bf16.msra.mxu0 %v7994_v7  ;;  %6216 = vmatpush1.bf16.msra.mxu1 %v7997_v46 }
 0xd6d   :  { %6186 = vmatprep.subr.bf16.mxu0 %v8002_v48  ;;  %6218 = vmatprep.subr.bf16.mxu1 %v8004_v44 }
 0xd70   :  { %6188 = vmatpush1.bf16.msra.mxu0 %v8006_v4  ;;  %6220 = vmatpush1.bf16.msra.mxu1 %v8009_v27 }
 0xd71   :  { %6222 = vmatprep.subr.bf16.mxu0 %v7918_v20  ;;  %6254 = vmatprep.subr.bf16.mxu1 %v7920_v5 }
 0xe26   :  { %v4005_v11 = vpop.f32.mrb[26].mxu0  ;;  %v4076_v47 = vpop.f32.mrb[26].mxu1 }
 0xe27   :  { %v6455_v53 = vadd.f32 %v4005_v11, %v7803_v55  ;;  %v4007_v9 = vpop.f32.mrb[27].mxu0  ;;  %v4078_v49 = vpop.f32.mrb[27].mxu1  ;;  %v6471_v35 = vadd.f32 %v4076_v47, %v7810_v36 }
 0xe28   :  { %v6456_v30 = vadd.f32 %v4007_v9, %v7806_v21  ;;  %v6472_v41 = vadd.f32 %v4078_v49, %v7816_v59 }
 0xe29   :  { %v4085_v50 = vmul.f32 0.5, %v6455_v53 }
 0xe2a   :  { %v4089_v57 = vmul.f32 0.5, %v6456_v30  ;;  %v4094_v20 = vmul.f32 0.5, %v6472_v41  ;;  %v4741_v41 = vld [vmem:[#allocation16 + $0x18] sm:$0xff] }
 0xe2b   :  { %6688 = vtanh.f32 %v4085_v50  ;;  %v4586_v50 = vld [vmem:[#allocation14 + $0x28] sm:$0xff] }
 0xe2c   :  { %6690 = vtanh.f32 %v4089_v57  ;;  %v4588_v57 = vld [vmem:[#allocation14 + $0x38] sm:$0xff] }
 0xe2d   :  { %6692 = vtanh.f32 %v6471_v35  ;;  %v4738_v35 = vld [vmem:[#allocation16] sm:$0xff] }
 0xe2e   :  { %6694 = vtanh.f32 %v4094_v20 }
 0xe35   :  { %v6689_v43 = vpop.eup %6688 }
 0xe36   :  { %v6691_v5 = vpop.eup %6690  ;;  %v4087_v17 = vmul.f32 0.5, %v6689_v43  ;;  %v4745_v43 = vld [vmem:[#allocation16 + $0x38] sm:$0xff] }
 0xe37   :  { %v4091_v15 = vmul.f32 0.5, %v6691_v5  ;;  %v6693_v45 = vpop.eup %6692  ;;  %v4748_v5 = vld [vmem:[#allocation16 + $0x50] sm:$0xff] }
 0xe38   :  { %v4088_v42 = vadd.f32 0.5, %v4087_v17  ;;  %v6695_v47 = vpop.eup %6694 }
 0xe39   :  { %v4092_v34 = vadd.f32 0.5, %v4091_v15  ;;  %v4096_v53 = vmul.f32 0.5, %v6695_v47  ;;  %v4592_v47 = vld [vmem:[#allocation14 + $0x58] sm:$0xff] }
 0xe3a   :  { %v4099_v61 = vmul.f32 %v6693_v45, %v4088_v42  ;;  %v6289_v45 = vpack.c.bf16 %v4588_v57, %v4586_v50  ;;  %v4602_v50 = vld [vmem:[#allocation14 + $0xa8] sm:$0xff] }
 0xe3b   :  { %v4098_v14 = vmul.f32 %v4092_v34, %v8067_v3  ;;  %v4097_v9 = vadd.f32 0.5, %v4096_v53  ;;  %v4583_v3 = vld [vmem:[#allocation14 + $0x10] sm:$0xff]  ;;  %v4585_v34 = vld [vmem:[#allocation14 + $0x20] sm:$0xff]  ;;  %v6321_v53 = vpack.c.bf16 %v4748_v5, %v4745_v43  ;;  %v4765_v43 = vld [vmem:[#allocation16 + $0xd8] sm:$0xff] }
 0xe3c   :  { %v4769_v5 = vld [vmem:[#allocation16 + $0xf8] sm:$0xff] }
 0xe3d   :  { %v8113_v11 = vadd.f32 %v4099_v61, %v4098_v14  ;;  %v4587_v61 = vld [vmem:[#allocation14 + $0x30] sm:$0xff]  ;;  %v4590_v14 = vld [vmem:[#allocation14 + $0x48] sm:$0xff] }
 0xe3f   :  { %6696 = vtanh.f32 %v8113_v11 }
 0xe49   :  { %v6697_v49 = vpop.eup %6696 }
 0xe4a   :  { %v8116_v30 = vmul.f32 %v6697_v49, %v4097_v9  ;;  %v4744_v9 = vld [vmem:[#allocation16 + $0x30] sm:$0xff]  ;;  %v4747_v49 = vld [vmem:[#allocation16 + $0x48] sm:$0xff] }
 0xe4c   :  { %4238 = vmatmul.mubr.f32.vlgmr.msra.gmra.mrb[28].mxu0 %v8116_v30  ;;  %4309 = vmatmul.mubr.f32.vlgmr.msra.gmra.mrb[28].mxu1 %v8116_v30 }
 0xe4d   :  { %6224 = vmatpush1.bf16.msra.mxu0 %v7922_v39  ;;  %6256 = vmatpush1.bf16.msra.mxu1 %v7925_v19  ;;  %v4582_v39 = vld [vmem:[#allocation14 + $0x8] sm:$0xff]  ;;  %v4584_v19 = vld [vmem:[#allocation14 + $0x18] sm:$0xff] }
 0xe4e   :  { %6226 = vmatprep.subr.bf16.mxu0 %v7930_v51  ;;  %6258 = vmatprep.subr.bf16.mxu1 %v7932_v28  ;;  %v6285_v51 = vpack.c.bf16 %v4584_v19, %v4582_v39  ;;  %v4739_v28 = vld [vmem:[#allocation16 + $0x8] sm:$0xff]  ;;  %v4754_v19 = vld [vmem:[#allocation16 + $0x80] sm:$0xff] }
 0xe4f   :  { %4471 = vmatprep.mubr.f32.mxu0 %v6919_v0  ;;  %4542 = vmatprep.mubr.f32.mxu1 %v6919_v0  ;;  %v4751_v39 = vld [vmem:[#allocation16 + $0x68] sm:$0xff] }
 0xe51   :  { %6228 = vmatpush1.bf16.msra.mxu0 %v7934_v24  ;;  %6260 = vmatpush1.bf16.msra.mxu1 %v7937_v12  ;;  %v4742_v24 = vld [vmem:[#allocation16 + $0x20] sm:$0xff] }
 0xe52   :  { %6230 = vmatprep.subr.bf16.mxu0 %v7942_v40  ;;  %6262 = vmatprep.subr.bf16.mxu1 %v7944_v6  ;;  %v6317_v12 = vpack.c.bf16 %v4742_v24, %v4739_v28  ;;  %v6293_v28 = vpack.c.bf16 %v4592_v47, %v4590_v14  ;;  %v4589_v24 = vld [vmem:[#allocation14 + $0x40] sm:$0xff]  ;;  %v4606_v14 = vld [vmem:[#allocation14 + $0xc8] sm:$0xff]  ;;  %v4608_v47 = vld [vmem:[#allocation14 + $0xd8] sm:$0xff] }
 0xe55   :  { %6232 = vmatpush1.bf16.msra.mxu0 %v7946_v2  ;;  %6264 = vmatpush1.bf16.msra.mxu1 %v7949_v54 }
 0xe56   :  { %6234 = vmatprep.subr.bf16.mxu0 %v7954_v58  ;;  %6266 = vmatprep.subr.bf16.mxu1 %v7956_v63 }
 0xe59   :  { %6236 = vmatpush1.bf16.msra.mxu0 %v7958_v38  ;;  %6268 = vmatpush1.bf16.msra.mxu1 %v7961_v56 }
 0xe5a   :  { %6238 = vmatprep.subr.bf16.mxu0 %v7966_v52  ;;  %6270 = vmatprep.subr.bf16.mxu1 %v7968_v37 }
 0xe5d   :  { %6240 = vmatpush1.bf16.msra.mxu0 %v7970_v33  ;;  %6272 = vmatpush1.bf16.msra.mxu1 %v7973_v60 }
 0xe5e   :  { %6242 = vmatprep.subr.bf16.mxu0 %v7978_v22  ;;  %6274 = vmatprep.subr.bf16.mxu1 %v7980_v26 }
 0xe61   :  { %6244 = vmatpush1.bf16.msra.mxu0 %v7982_v29  ;;  %6276 = vmatpush1.bf16.msra.mxu1 %v7985_v10 }
 0xe62   :  { %6246 = vmatprep.subr.bf16.mxu0 %v7990_v25  ;;  %6278 = vmatprep.subr.bf16.mxu1 %v7992_v8 }
 0xe65   :  { %6248 = vmatpush1.bf16.msra.mxu0 %v7994_v7  ;;  %6280 = vmatpush1.bf16.msra.mxu1 %v7997_v46 }
 0xe66   :  { %6250 = vmatprep.subr.bf16.mxu0 %v8002_v48  ;;  %6282 = vmatprep.subr.bf16.mxu1 %v8004_v44 }
 0xe69   :  { %6252 = vmatpush1.bf16.msra.mxu0 %v8006_v4  ;;  %6284 = vmatpush1.bf16.msra.mxu1 %v8009_v27  ;;  %v4581_v27 = vld [vmem:[#allocation14] sm:$0xff] }
 0xe6a   :  { %6286 = vmatprep.subr.bf16.mxu0 %v6285_v51  ;;  %6318 = vmatprep.subr.bf16.mxu1 %v6317_v12  ;;  %v6287_v15 = vpack.c.bf16 %v4583_v3, %v4581_v27  ;;  %v6291_v51 = vpack.c.bf16 %v4587_v61, %v4585_v34  ;;  %v4591_v12 = vld [vmem:[#allocation14 + $0x50] sm:$0xff]  ;;  %v4597_v27 = vld [vmem:[#allocation14 + $0x80] sm:$0xff] }
 0xe6b   :  { %v4599_v3 = vld [vmem:[#allocation14 + $0x90] sm:$0xff]  ;;  %v4601_v34 = vld [vmem:[#allocation14 + $0xa0] sm:$0xff] }
 0xe6c   :  { %v4603_v61 = vld [vmem:[#allocation14 + $0xb0] sm:$0xff] }
 0xf1f   :  { %v4239_v40 = vpop.f32.mrb[28].mxu0  ;;  %v4310_v6 = vpop.f32.mrb[28].mxu1 }
 0xf20   :  { %v6457_v2 = vadd.f32 %v4239_v40, %v7803_v55  ;;  %v4241_v54 = vpop.f32.mrb[29].mxu0  ;;  %v4312_v58 = vpop.f32.mrb[29].mxu1  ;;  %v6473_v52 = vadd.f32 %v4310_v6, %v7810_v36  ;;  %v4594_v40 = vld [vmem:[#allocation14 + $0x68] sm:$0xff]  ;;  %v6323_v6 = vpack.c.bf16 %v4747_v49, %v4744_v9  ;;  %v4768_v9 = vld [vmem:[#allocation16 + $0xf0] sm:$0xff] }
 0xf21   :  { %v6458_v63 = vadd.f32 %v4241_v54, %v7806_v21  ;;  %v6474_v37 = vadd.f32 %v4312_v58, %v7816_v59  ;;  %v6325_v54 = vpack.c.bf16 %v4754_v19, %v4751_v39  ;;  %v4750_v58 = vld [vmem:[#allocation16 + $0x60] sm:$0xff]  ;;  %v4771_v49 = vld [vmem:[#allocation16 + $0x108] sm:$0xff] }
 0xf22   :  { %v4319_v38 = vmul.f32 0.5, %v6457_v2  ;;  %v4596_v2 = vld [vmem:[#allocation14 + $0x78] sm:$0xff]  ;;  %v4775_v39 = vld [vmem:[#allocation16 + $0x128] sm:$0xff]  ;;  %v4778_v19 = vld [vmem:[#allocation16 + $0x140] sm:$0xff] }
 0xf23   :  { %v4323_v56 = vmul.f32 0.5, %v6458_v63  ;;  %v4328_v33 = vmul.f32 0.5, %v6474_v37  ;;  %v4753_v63 = vld [vmem:[#allocation16 + $0x78] sm:$0xff]  ;;  %v6297_v37 = vpack.c.bf16 %v4596_v2, %v4594_v40  ;;  %v4610_v40 = vld [vmem:[#allocation14 + $0xe8] sm:$0xff] }
 0xf24   :  { %6698 = vtanh.f32 %v4319_v38  ;;  %v4757_v38 = vld [vmem:[#allocation16 + $0x98] sm:$0xff] }
 0xf25   :  { %6700 = vtanh.f32 %v4323_v56  ;;  %v4760_v56 = vld [vmem:[#allocation16 + $0xb0] sm:$0xff]  ;;  %v4612_v2 = vld [vmem:[#allocation14 + $0xf8] sm:$0xff] }
 0xf26   :  { %6702 = vtanh.f32 %v6473_v52  ;;  %v6295_v52 = vpack.c.bf16 %v4591_v12, %v4589_v24  ;;  %v4605_v24 = vld [vmem:[#allocation14 + $0xc0] sm:$0xff]  ;;  %v4607_v12 = vld [vmem:[#allocation14 + $0xd0] sm:$0xff] }
 0xf27   :  { %6704 = vtanh.f32 %v4328_v33  ;;  %v4593_v33 = vld [vmem:[#allocation14 + $0x60] sm:$0xff] }
 0xf2e   :  { %v6699_v60 = vpop.eup %6698 }
 0xf2f   :  { %v6701_v22 = vpop.eup %6700  ;;  %v4321_v26 = vmul.f32 0.5, %v6699_v60  ;;  %v4595_v60 = vld [vmem:[#allocation14 + $0x70] sm:$0xff] }
 0xf30   :  { %v4325_v29 = vmul.f32 0.5, %v6701_v22  ;;  %v6703_v25 = vpop.eup %6702  ;;  %v4598_v22 = vld [vmem:[#allocation14 + $0x88] sm:$0xff] }
 0xf31   :  { %v4322_v10 = vadd.f32 0.5, %v4321_v26  ;;  %v6705_v44 = vpop.eup %6704  ;;  %v6327_v26 = vpack.c.bf16 %v4753_v63, %v4750_v58  ;;  %v4774_v58 = vld [vmem:[#allocation16 + $0x120] sm:$0xff]  ;;  %v4777_v63 = vld [vmem:[#allocation16 + $0x138] sm:$0xff] }
 0xf32   :  { %v4326_v8 = vadd.f32 0.5, %v4325_v29  ;;  %v4330_v4 = vmul.f32 0.5, %v6705_v44  ;;  %v4600_v29 = vld [vmem:[#allocation14 + $0x98] sm:$0xff]  ;;  %v6299_v44 = vpack.c.bf16 %v4595_v60, %v4593_v33  ;;  %v6343_v33 = vpack.c.bf16 %v4777_v63, %v4774_v58  ;;  %v4811_v58 = vld [vmem:[#allocation16 + $0x248] sm:$0xff]  ;;  %v4814_v63 = vld [vmem:[#allocation16 + $0x260] sm:$0xff] }
 0xf33   :  { %v4333_v7 = vmul.f32 %v6703_v25, %v4322_v10  ;;  %v6329_v10 = vpack.c.bf16 %v4760_v56, %v4757_v38  ;;  %v4756_v25 = vld [vmem:[#allocation16 + $0x90] sm:$0xff]  ;;  %v6311_v38 = vpack.c.bf16 %v4607_v12, %v4605_v24  ;;  %v6313_v56 = vpack.c.bf16 %v4612_v2, %v4610_v40  ;;  %v4803_v12 = vld [vmem:[#allocation16 + $0x208] sm:$0xff] }
 0xf34   :  { %v4332_v46 = vmul.f32 %v4326_v8, %v8113_v11  ;;  %v4331_v20 = vadd.f32 0.5, %v4330_v4  ;;  %v6319_v11 = vpack.c.bf16 %v4741_v41, %v4738_v35  ;;  %v4759_v8 = vld [vmem:[#allocation16 + $0xa8] sm:$0xff]  ;;  %v6301_v4 = vpack.c.bf16 %v4600_v29, %v4598_v22  ;;  %v4604_v35 = vld [vmem:[#allocation14 + $0xb8] sm:$0xff]  ;;  %v4780_v22 = vld [vmem:[#allocation16 + $0x150] sm:$0xff] }
 0xf35   :  { %v6331_v57 = vpack.c.bf16 %v4759_v8, %v4756_v25  ;;  %v4787_v29 = vld [vmem:[#allocation16 + $0x188] sm:$0xff]  ;;  %v4786_v25 = vld [vmem:[#allocation16 + $0x180] sm:$0xff]  ;;  %v4789_v8 = vld [vmem:[#allocation16 + $0x198] sm:$0xff] }
 0xf36   :  { %v8157_v48 = vadd.f32 %v4333_v7, %v4332_v46  ;;  %v4763_v7 = vld [vmem:[#allocation16 + $0xc8] sm:$0xff]  ;;  %v4766_v46 = vld [vmem:[#allocation16 + $0xe0] sm:$0xff]  ;;  %v4800_v24 = vld [vmem:[#allocation16 + $0x1f0] sm:$0xff] }
 0xf37   :  { %v6333_v41 = vpack.c.bf16 %v4766_v46, %v4763_v7  ;;  %v4793_v7 = vld [vmem:[#allocation16 + $0x1b8] sm:$0xff]  ;;  %v6389_v40 = vpack.c.bf16 %v4803_v12, %v4800_v24  ;;  %v4755_v2 = vld [vmem:[#allocation16 + $0x88] sm:$0xff]  ;;  %v4782_v12 = vld [vmem:[#allocation16 + $0x160] sm:$0xff] }
 0xf38   :  { %6706 = vtanh.f32 %v8157_v48 }
 0xf42   :  { %v6707_v17 = vpop.eup %6706 }
 0xf43   :  { %v8160_v42 = vmul.f32 %v6707_v17, %v4331_v20  ;;  %v4762_v20 = vld [vmem:[#allocation16 + $0xc0] sm:$0xff]  ;;  %v4772_v17 = vld [vmem:[#allocation16 + $0x110] sm:$0xff] }
 0xf45   :  { %4472 = vmatmul.mubr.f32.vlgmr.msra.gmra.mrb[30].mxu0 %v8160_v42  ;;  %4543 = vmatmul.mubr.f32.vlgmr.msra.gmra.mrb[30].mxu1 %v8160_v42 }
 0xf46   :  { %6288 = vmatpush1.bf16.msra.mxu0 %v6287_v15  ;;  %4689 = vmatprep.mubr.f32.mxu0 %v6919_v0  ;;  %v6303_v15 = vpack.c.bf16 %v4599_v3, %v4597_v27  ;;  %v4788_v27 = vld [vmem:[#allocation16 + $0x190] sm:$0xff]  ;;  %v4791_v3 = vld [vmem:[#allocation16 + $0x1a8] sm:$0xff] }
 0xf47   :  { %6290 = vmatprep.subr.bf16.mxu0 %v6289_v45  ;;  %6320 = vmatpush1.bf16.msra.mxu1 %v6319_v11  ;;  %v6305_v45 = vpack.c.bf16 %v4604_v35, %v4602_v50  ;;  %v6335_v11 = vpack.c.bf16 %v4765_v43, %v4762_v20  ;;  %v6381_v50 = vpack.c.bf16 %v4791_v3, %v4788_v27  ;;  %v4743_v35 = vld [vmem:[#allocation16 + $0x28] sm:$0xff]  ;;  %v4802_v43 = vld [vmem:[#allocation16 + $0x200] sm:$0xff]  ;;  %v4825_v3 = vld [vmem:[#allocation16 + $0x2b8] sm:$0xff] }
 0xf48   :  { %6322 = vmatprep.subr.bf16.mxu1 %v6321_v53  ;;  %v6337_v53 = vpack.c.bf16 %v4772_v17, %v4769_v5  ;;  %v4799_v20 = vld [vmem:[#allocation16 + $0x1e8] sm:$0xff]  ;;  %v4798_v17 = vld [vmem:[#allocation16 + $0x1e0] sm:$0xff] }
 0xf49   :  { %v6357_v5 = vpack.c.bf16 %v4802_v43, %v4799_v20  ;;  %v4822_v27 = vld [vmem:[#allocation16 + $0x2a0] sm:$0xff] }
 0xf4a   :  { %6292 = vmatpush1.bf16.msra.mxu0 %v6291_v51  ;;  %v6307_v51 = vpack.c.bf16 %v4603_v61, %v4601_v34  ;;  %v4794_v34 = vld [vmem:[#allocation16 + $0x1c0] sm:$0xff]  ;;  %v4797_v61 = vld [vmem:[#allocation16 + $0x1d8] sm:$0xff] }
 0xf4b   :  { %6294 = vmatprep.subr.bf16.mxu0 %v6293_v28  ;;  %6324 = vmatpush1.bf16.msra.mxu1 %v6323_v6  ;;  %v6309_v28 = vpack.c.bf16 %v4608_v47, %v4606_v14  ;;  %v6339_v6 = vpack.c.bf16 %v4771_v49, %v4768_v9  ;;  %v6385_v14 = vpack.c.bf16 %v4797_v61, %v4794_v34  ;;  %v4749_v47 = vld [vmem:[#allocation16 + $0x58] sm:$0xff]  ;;  %v4808_v49 = vld [vmem:[#allocation16 + $0x230] sm:$0xff]  ;;  %v4770_v43 = vld [vmem:[#allocation16 + $0x100] sm:$0xff] }
 0xf4c   :  { %6326 = vmatprep.subr.bf16.mxu1 %v6325_v54  ;;  %v6341_v54 = vpack.c.bf16 %v4778_v19, %v4775_v39  ;;  %v4805_v9 = vld [vmem:[#allocation16 + $0x218] sm:$0xff]  ;;  %v4804_v19 = vld [vmem:[#allocation16 + $0x210] sm:$0xff] }
 0xf4d   :  { %v6361_v39 = vpack.c.bf16 %v4808_v49, %v4805_v9  ;;  %v4828_v61 = vld [vmem:[#allocation16 + $0x2d0] sm:$0xff] }
 0xf4e   :  { %6296 = vmatpush1.bf16.msra.mxu0 %v6295_v52  ;;  %v4609_v52 = vld [vmem:[#allocation14 + $0xe0] sm:$0xff]  ;;  %v4776_v49 = vld [vmem:[#allocation16 + $0x130] sm:$0xff] }
 0xf4f   :  { %6298 = vmatprep.subr.bf16.mxu0 %v6297_v37  ;;  %6328 = vmatpush1.bf16.msra.mxu1 %v6327_v26  ;;  %v4611_v37 = vld [vmem:[#allocation14 + $0xf0] sm:$0xff]  ;;  %v4783_v26 = vld [vmem:[#allocation16 + $0x168] sm:$0xff] }
 0xf50   :  { %6330 = vmatprep.subr.bf16.mxu1 %v6329_v10  ;;  %v6315_v60 = vpack.c.bf16 %v4611_v37, %v4609_v52  ;;  %v4813_v52 = vld [vmem:[#allocation16 + $0x258] sm:$0xff] }
 0xf52   :  { %6300 = vmatpush1.bf16.msra.mxu0 %v6299_v44  ;;  %v4795_v44 = vld [vmem:[#allocation16 + $0x1c8] sm:$0xff] }
 0xf53   :  { %6302 = vmatprep.subr.bf16.mxu0 %v6301_v4  ;;  %6332 = vmatpush1.bf16.msra.mxu1 %v6331_v57  ;;  %v4740_v57 = vld [vmem:[#allocation16 + $0x10] sm:$0xff] }
 0xf54   :  { %6334 = vmatprep.subr.bf16.mxu1 %v6333_v41  ;;  %v6383_v41 = vpack.c.bf16 %v4743_v35, %v4740_v57  ;;  %v6375_v57 = vpack.c.bf16 %v4825_v3, %v4822_v27  ;;  %v4818_v35 = vld [vmem:[#allocation16 + $0x280] sm:$0xff] }
 0xf56   :  { %6304 = vmatpush1.bf16.msra.mxu0 %v6303_v15  ;;  %v4801_v15 = vld [vmem:[#allocation16 + $0x1f8] sm:$0xff] }
 0xf57   :  { %6306 = vmatprep.subr.bf16.mxu0 %v6305_v45  ;;  %6336 = vmatpush1.bf16.msra.mxu1 %v6335_v11  ;;  %v6359_v45 = vpack.c.bf16 %v4801_v15, %v4798_v17  ;;  %v4746_v11 = vld [vmem:[#allocation16 + $0x40] sm:$0xff]  ;;  %v4829_v15 = vld [vmem:[#allocation16 + $0x2d8] sm:$0xff] }
 0xf58   :  { %6338 = vmatprep.subr.bf16.mxu1 %v6337_v53  ;;  %v6387_v53 = vpack.c.bf16 %v4749_v47, %v4746_v11  ;;  %v4824_v47 = vld [vmem:[#allocation16 + $0x2b0] sm:$0xff] }
 0xf5a   :  { %6308 = vmatpush1.bf16.msra.mxu0 %v6307_v51  ;;  %v4807_v51 = vld [vmem:[#allocation16 + $0x228] sm:$0xff] }
 0xf5b   :  { %6310 = vmatprep.subr.bf16.mxu0 %v6309_v28  ;;  %6340 = vmatpush1.bf16.msra.mxu1 %v6339_v6  ;;  %v6363_v28 = vpack.c.bf16 %v4807_v51, %v4804_v19  ;;  %v4752_v6 = vld [vmem:[#allocation16 + $0x70] sm:$0xff]  ;;  %v4830_v51 = vld [vmem:[#allocation16 + $0x2e0] sm:$0xff] }
 0xf5c   :  { %6342 = vmatprep.subr.bf16.mxu1 %v6341_v54  ;;  %v6391_v54 = vpack.c.bf16 %v4755_v2, %v4752_v6 }
 0xf5e   :  { %6312 = vmatpush1.bf16.msra.mxu0 %v6311_v38  ;;  %v6365_v38 = vpack.c.bf16 %v4814_v63, %v4811_v58 }
 0xf5f   :  { %6314 = vmatprep.subr.bf16.mxu0 %v6313_v56  ;;  %6344 = vmatpush1.bf16.msra.mxu1 %v6343_v33  ;;  %v4810_v56 = vld [vmem:[#allocation16 + $0x240] sm:$0xff] }
 0xf60   :  { %v6367_v37 = vpack.c.bf16 %v4813_v52, %v4810_v56  ;;  %v4806_v33 = vld [vmem:[#allocation16 + $0x220] sm:$0xff] }
 0xf62   :  { %6316 = vmatpush1.bf16.msra.mxu0 %v6315_v60  ;;  %v4809_v60 = vld [vmem:[#allocation16 + $0x238] sm:$0xff] }
 0xf63   :  { %6382 = vmatprep.subr.bf16.mxu0 %v6381_v50 }
 0xf65   :  { %4690 = vmatmul.mubr.f32.vlgmr.msra.gmra.mrb[32].mxu0 %v7822_v1  ;;  %v4781_v1 = vld [vmem:[#allocation16 + $0x158] sm:$0xff] }
 0xf66   :  { %4695 = vmatprep.mubr.f32.mxu0 %v6919_v0  ;;  %6384 = vmatpush3.bf16.msra.mxu0 %v6383_v41  ;;  %v4821_v41 = vld [vmem:[#allocation16 + $0x298] sm:$0xff] }
 0xf67   :  { %6386 = vmatprep.subr.bf16.mxu0 %v6385_v14  ;;  %v6401_v20 = vpack.c.bf16 %v4821_v41, %v4818_v35  ;;  %v4831_v14 = vld [vmem:[#allocation16 + $0x2e8] sm:$0xff] }
 0xf68   :  { %v6379_v11 = vpack.c.bf16 %v4831_v14, %v4828_v61 }
 0xf69   :  { %4696 = vmatmul.mubr.f32.gmra.mrb[34].mxu0 %v7868_v16  ;;  %v4784_v16 = vld [vmem:[#allocation16 + $0x170] sm:$0xff] }
 0xf6a   :  { %4701 = vmatprep.mubr.f32.mxu0 %v6919_v0  ;;  %6388 = vmatpush3.bf16.msra.mxu0 %v6387_v53  ;;  %v4827_v53 = vld [vmem:[#allocation16 + $0x2c8] sm:$0xff] }
 0xf6b   :  { %6390 = vmatprep.subr.bf16.mxu0 %v6389_v40  ;;  %v6405_v9 = vpack.c.bf16 %v4827_v53, %v4824_v47  ;;  %v4785_v40 = vld [vmem:[#allocation16 + $0x178] sm:$0xff] }
 0xf6c   :  { %v6411_v6 = vpack.c.bf16 %v4785_v40, %v4782_v12 }
 0xf6d   :  { %4702 = vmatmul.mubr.f32.gmra.mrb[36].mxu0 %v7912_v32  ;;  %v6345_v32 = vpack.c.bf16 %v4784_v16, %v4781_v1  ;;  %v6393_v1 = vpack.c.bf16 %v4809_v60, %v4806_v33  ;;  %v4758_v16 = vld [vmem:[#allocation16 + $0xa0] sm:$0xff] }
 0xf6e   :  { %4707 = vmatprep.mubr.f32.mxu0 %v6919_v0  ;;  %6392 = vmatpush3.bf16.msra.mxu0 %v6391_v54 }
 0xf6f   :  { %6346 = vmatprep.subr.bf16.mxu1 %v6345_v32  ;;  %v4761_v32 = vld [vmem:[#allocation16 + $0xb8] sm:$0xff]  ;;  %6394 = vmatprep.subr.bf16.mxu0 %v6393_v1 }
 0xf71   :  { %4708 = vmatmul.mubr.f32.gmra.mrb[38].mxu0 %v8024_v31  ;;  %v6347_v31 = vpack.c.bf16 %v4783_v26, %v4780_v22  ;;  %v6395_v22 = vpack.c.bf16 %v4761_v32, %v4758_v16  ;;  %v4817_v26 = vld [vmem:[#allocation16 + $0x278] sm:$0xff] }
 0xf72   :  { %4713 = vmatprep.mubr.f32.mxu0 %v6919_v0 }
 0xf73   :  { %6348 = vmatpush1.bf16.msra.mxu1 %v6347_v31  ;;  %v4820_v31 = vld [vmem:[#allocation16 + $0x290] sm:$0xff]  ;;  %6396 = vmatpush3.bf16.msra.mxu0 %v6395_v22 }
 0xf75   :  { %4714 = vmatmul.mubr.f32.gmra.mrb[40].mxu0 %v8070_v62  ;;  %v4790_v62 = vld [vmem:[#allocation16 + $0x1a0] sm:$0xff] }
 0xf76   :  { %4719 = vmatprep.mubr.f32.mxu0 %v6919_v0  ;;  %v6349_v10 = vpack.c.bf16 %v4790_v62, %v4787_v29  ;;  %v6369_v29 = vpack.c.bf16 %v4820_v31, %v4817_v26  ;;  %v4816_v62 = vld [vmem:[#allocation16 + $0x270] sm:$0xff] }
 0xf78   :  { %6350 = vmatprep.subr.bf16.mxu1 %v6349_v10  ;;  %v4819_v10 = vld [vmem:[#allocation16 + $0x288] sm:$0xff] }
 0xf79   :  { %4720 = vmatmul.mubr.f32.gmra.mrb[42].mxu0 %v8116_v30  ;;  %v6351_v30 = vpack.c.bf16 %v4789_v8, %v4786_v25  ;;  %v6371_v25 = vpack.c.bf16 %v4819_v10, %v4816_v62  ;;  %v4812_v8 = vld [vmem:[#allocation16 + $0x250] sm:$0xff] }
 0xf7a   :  { %4725 = vmatprep.mubr.f32.mxu0 %v6919_v0 }
 0xf7b   :  { %6352 = vmatpush1.bf16.msra.mxu1 %v6351_v30  ;;  %v4815_v30 = vld [vmem:[#allocation16 + $0x268] sm:$0xff] }
 0xf7d   :  { %4726 = vmatmul.mubr.f32.gmra.mrb[44].mxu0 %v8160_v42  ;;  %v4796_v42 = vld [vmem:[#allocation16 + $0x1d0] sm:$0xff] }
 0xf7e   :  { %4731 = vmatprep.mubr.f32.mxu0 %v6919_v0  ;;  %v6353_v46 = vpack.c.bf16 %v4796_v42, %v4793_v7  ;;  %v4792_v0 = vld [vmem:[#allocation16 + $0x1b0] sm:$0xff]  ;;  %v6397_v7 = vpack.c.bf16 %v4815_v30, %v4812_v8 }
 0xf7f   :  { %v6355_v4 = vpack.c.bf16 %v4795_v44, %v4792_v0  ;;  %v4764_v42 = vld [vmem:[#allocation16 + $0xd0] sm:$0xff]  ;;  %v4823_v0 = vld [vmem:[#allocation16 + $0x2a8] sm:$0xff] }
 0xf80   :  { %6354 = vmatprep.subr.bf16.mxu1 %v6353_v46  ;;  %v4767_v46 = vld [vmem:[#allocation16 + $0xe8] sm:$0xff]  ;;  %6398 = vmatprep.subr.bf16.mxu0 %v6397_v7 }
 0xf81   :  { %6356 = vmatpush1.bf16.msra.mxu1 %v6355_v4  ;;  %v6399_v44 = vpack.c.bf16 %v4767_v46, %v4764_v42  ;;  %v4826_v4 = vld [vmem:[#allocation16 + $0x2c0] sm:$0xff] }
 0xf82   :  { %6358 = vmatprep.subr.bf16.mxu1 %v6357_v5  ;;  %v6373_v50 = vpack.c.bf16 %v4826_v4, %v4823_v0  ;;  %v4773_v5 = vld [vmem:[#allocation16 + $0x118] sm:$0xff] }
 0xf83   :  { %6400 = vmatpush3.bf16.msra.mxu0 %v6399_v44  ;;  %v6403_v17 = vpack.c.bf16 %v4773_v5, %v4770_v43 }
 0xf84   :  { %6402 = vmatprep.subr.bf16.mxu0 %v6401_v20 }
 0xf85   :  { %6360 = vmatpush1.bf16.msra.mxu1 %v6359_v45  ;;  %v4832_v45 = vld [vmem:[#allocation16 + $0x2f0] sm:$0xff] }
 0xf86   :  { %6362 = vmatprep.subr.bf16.mxu1 %v6361_v39  ;;  %v6377_v34 = vpack.c.bf16 %v4832_v45, %v4829_v15  ;;  %v4779_v39 = vld [vmem:[#allocation16 + $0x148] sm:$0xff] }
 0xf87   :  { %6404 = vmatpush3.bf16.msra.mxu0 %v6403_v17  ;;  %v6407_v19 = vpack.c.bf16 %v4779_v39, %v4776_v49 }
 0xf88   :  { %6406 = vmatprep.subr.bf16.mxu0 %v6405_v9 }
 0xf89   :  { %6364 = vmatpush1.bf16.msra.mxu1 %v6363_v28  ;;  %v4833_v28 = vld [vmem:[#allocation16 + $0x2f8] sm:$0xff] }
 0xf8a   :  { %6366 = vmatprep.subr.bf16.mxu1 %v6365_v38  ;;  %v6409_v24 = vpack.c.bf16 %v4833_v28, %v4830_v51 }
 0xf8b   :  { %6408 = vmatpush3.bf16.msra.mxu0 %v6407_v19 }
 0xf8c   :  { %6410 = vmatprep.subr.bf16.mxu0 %v6409_v24  ;;  %v4834_v24 = vld [vmem:[%s8270_s10] sm:$0x7]  ;;  %s6920_s10 = smov [#allocation17]  }
 0xf8d   :  { %6368 = vmatpush1.bf16.msra.mxu1 %v6367_v37  ;;  %v8211_v12 = vrot.slane %v4834_v24, %v7262_v13  ;;  %v8214_v40 = vrot.slane %v4834_v24, %v7268_v18  ;;  %s5098_s7 = sshll.u32 %s6920_s10, 4  ;;  %s5099_s7 = int_to_ptr.vmem [resolvable:$true] %s5098_s7 }
 0xf8e   :  { %6370 = vmatprep.subr.bf16.mxu1 %v6369_v29  ;;  %s6872_s15 = scalar_lea.vmem %s5099_s7, 3072  ;;  %p6877_p1 = scmp.lt.s32.totalorder %s5099_s7, %s5099_s7 }
 0xf8f   :  { %6412 = vmatpush3.bf16.msra.mxu0 %v6411_v6  ;;  %p6873_p0 = scmp.ne.s32.totalorder %s5099_s7, %s6872_s15  ;;  %p6878_p2 = scmp.lt.s32.totalorder %s6872_s15, %s6872_s15 }
 0xf91   :  { %6372 = vmatpush1.bf16.msra.mxu1 %v6371_v25  ;;  %p6879_p3 = por %p6878_p2, %p6877_p1 }
 0xf92   :  { %6374 = vmatprep.subr.bf16.mxu1 %v6373_v50 }
 0xf93   :  { %p6880_p4 = pnand %p6879_p3, %p6873_p0 }
 0xf95   :  { %6376 = vmatpush1.bf16.msra.mxu1 %v6375_v57 }
 0xf96   :  { %6378 = vmatprep.subr.bf16.mxu1 %v6377_v34 }
 0xf99   :  { %6380 = vmatpush1.bf16.msra.mxu1 %v6379_v11 }
0x1018   :  { %v4473_v2 = vpop.f32.mrb[30].mxu0  ;;  %v4544_v54 = vpop.f32.mrb[30].mxu1 }
0x1019   :  { %v6459_v58 = vadd.f32 %v4473_v2, %v7803_v55  ;;  %v4475_v63 = vpop.f32.mrb[31].mxu0  ;;  %v4546_v38 = vpop.f32.mrb[31].mxu1  ;;  %v6475_v33 = vadd.f32 %v4544_v54, %v7810_v36  ;;  %v4613_v36 = vld [vmem:[%s8268_s8] sm:$0x3] }
0x101a   :  { %v6460_v56 = vadd.f32 %v4475_v63, %v7806_v21  ;;  %v6476_v60 = vadd.f32 %v4546_v38, %v7816_v59  ;;  %v8188_v8 = vrot.slane %v4613_v36, %v7268_v18  ;;  %v8191_v30 = vrot.slane %v4613_v36, %v7262_v13 }
0x101b   :  { %v4553_v52 = vmul.f32 0.5, %v6459_v58 }
0x101c   :  { %v4557_v37 = vmul.f32 0.5, %v6460_v56  ;;  %v4562_v1 = vmul.f32 0.5, %v6476_v60  ;;  %v8222_v60 = vrot.slane %v4834_v24, %v7274_v23 }
0x101d   :  { %6708 = vtanh.f32 %v4553_v52 }
0x101e   :  { %6710 = vtanh.f32 %v4557_v37 }
0x101f   :  { %6712 = vtanh.f32 %v6475_v33 }
0x1020   :  { %6714 = vtanh.f32 %v4562_v1 }
0x1027   :  { %v6709_v16 = vpop.eup %6708 }
0x1028   :  { %v6711_v32 = vpop.eup %6710  ;;  %v4555_v22 = vmul.f32 0.5, %v6709_v16 }
0x1029   :  { %v4559_v26 = vmul.f32 0.5, %v6711_v32  ;;  %v6713_v31 = vpop.eup %6712 }
0x102a   :  { %v4556_v55 = vadd.f32 0.5, %v4555_v22  ;;  %v6715_v25 = vpop.eup %6714 }
0x102b   :  { %v4560_v29 = vadd.f32 0.5, %v4559_v26  ;;  %v4564_v59 = vmul.f32 0.5, %v6715_v25 }
0x102c   :  { %v4567_v62 = vmul.f32 %v6713_v31, %v4556_v55 }
0x102d   :  { %v4566_v21 = vmul.f32 %v4560_v29, %v8157_v48  ;;  %v4565_v46 = vadd.f32 0.5, %v4564_v59 }
0x102f   :  { %v4568_v10 = vadd.f32 %v4567_v62, %v4566_v21 }
0x1031   :  { %6716 = vtanh.f32 %v4568_v10 }
0x1038   :  { %v4691_v7 = vpop.f32.mrb[32].mxu0 }
0x1039   :  { %v4693_v42 = vpop.f32.mrb[33].mxu0  ;;  %v4692_v44 = vadd.f32 %v4691_v7, %v8191_v30 }
0x103a   :  { %v4694_v0 = vadd.f32 %v4693_v42, %v8188_v8 }
0x103b   :  { %v6717_v48 = vpop.eup %6716 }
0x103c   :  { %v4697_v4 = vpop.f32.mrb[34].mxu0  ;;  %4915 = vmatprep.mubr.f32.mxu1 %v4694_v0  ;;  %v4570_v27 = vmul.f32 %v6717_v48, %v4565_v46 }
0x103d   :  { %v4699_v3 = vpop.f32.mrb[35].mxu0  ;;  %4916 = vmatmul.mubr.f32.vlgmr.msra.gmra.mrb[32].mxu1 %v4692_v44  ;;  %v4698_v57 = vadd.f32 %v4697_v4, %v8191_v30 }
0x103e   :  { %v4700_v50 = vadd.f32 %v4699_v3, %v8188_v8  ;;  %4732 = vmatmul.mubr.f32.gmra.mrb[46].mxu0 %v4570_v27 }
0x103f   :  { %5028 = vmatprep.mubr.f32.mxu0 %v4694_v0 }
0x1040   :  { %v4703_v35 = vpop.f32.mrb[36].mxu0  ;;  %4921 = vmatprep.mubr.f32.mxu1 %v4700_v50 }
0x1041   :  { %v4705_v41 = vpop.f32.mrb[37].mxu0  ;;  %4922 = vmatmul.mubr.f32.gmra.mrb[34].mxu1 %v4698_v57  ;;  %v4704_v43 = vadd.f32 %v4703_v35, %v8191_v30 }
0x1042   :  { %v4706_v20 = vadd.f32 %v4705_v41, %v8188_v8  ;;  %5029 = vmatmul.mubr.f32.vlgmr.msra.gmra.mrb[48].mxu0 %v4692_v44 }
0x1043   :  { %5033 = vmatprep.mubr.f32.mxu0 %v4700_v50 }
0x1044   :  { %v4709_v5 = vpop.f32.mrb[38].mxu0  ;;  %4927 = vmatprep.mubr.f32.mxu1 %v4706_v20 }
0x1045   :  { %v4711_v17 = vpop.f32.mrb[39].mxu0  ;;  %4928 = vmatmul.mubr.f32.gmra.mrb[36].mxu1 %v4704_v43  ;;  %v4710_v45 = vadd.f32 %v4709_v5, %v8191_v30 }
0x1046   :  { %v4712_v15 = vadd.f32 %v4711_v17, %v8188_v8  ;;  %5034 = vmatmul.mubr.f32.gmra.mrb[50].mxu0 %v4698_v57 }
0x1047   :  { %5038 = vmatprep.mubr.f32.mxu0 %v4706_v20 }
0x1048   :  { %v4715_v34 = vpop.f32.mrb[40].mxu0  ;;  %4933 = vmatprep.mubr.f32.mxu1 %v4712_v15 }
0x1049   :  { %v4717_v61 = vpop.f32.mrb[41].mxu0  ;;  %4934 = vmatmul.mubr.f32.gmra.mrb[38].mxu1 %v4710_v45  ;;  %v4716_v11 = vadd.f32 %v4715_v34, %v8191_v30 }
0x104a   :  { %v4718_v14 = vadd.f32 %v4717_v61, %v8188_v8  ;;  %5039 = vmatmul.mubr.f32.gmra.mrb[52].mxu0 %v4704_v43 }
0x104b   :  { %5043 = vmatprep.mubr.f32.mxu0 %v4712_v15 }
0x104c   :  { %v4721_v47 = vpop.f32.mrb[42].mxu0  ;;  %4939 = vmatprep.mubr.f32.mxu1 %v4718_v14 }
0x104d   :  { %v4723_v53 = vpop.f32.mrb[43].mxu0  ;;  %4940 = vmatmul.mubr.f32.gmra.mrb[40].mxu1 %v4716_v11  ;;  %v4722_v49 = vadd.f32 %v4721_v47, %v8191_v30 }
0x104e   :  { %v4724_v9 = vadd.f32 %v4723_v53, %v8188_v8  ;;  %5044 = vmatmul.mubr.f32.gmra.mrb[54].mxu0 %v4710_v45 }
0x104f   :  { %5048 = vmatprep.mubr.f32.mxu0 %v4718_v14 }
0x1050   :  { %v4727_v39 = vpop.f32.mrb[44].mxu0  ;;  %4945 = vmatprep.mubr.f32.mxu1 %v4724_v9 }
0x1051   :  { %v4729_v19 = vpop.f32.mrb[45].mxu0  ;;  %4946 = vmatmul.mubr.f32.gmra.mrb[42].mxu1 %v4722_v49  ;;  %v4728_v28 = vadd.f32 %v4727_v39, %v8191_v30 }
0x1052   :  { %v4730_v51 = vadd.f32 %v4729_v19, %v8188_v8  ;;  %5049 = vmatmul.mubr.f32.gmra.mrb[56].mxu0 %v4716_v11 }
0x1053   :  { %5053 = vmatprep.mubr.f32.mxu0 %v4724_v9 }
0x1054   :  { %4951 = vmatprep.mubr.f32.mxu1 %v4730_v51 }
0x1055   :  { %4952 = vmatmul.mubr.f32.gmra.mrb[44].mxu1 %v4728_v28 }
0x1056   :  { %5054 = vmatmul.mubr.f32.gmra.mrb[58].mxu0 %v4722_v49 }
0x1057   :  { %5058 = vmatprep.mubr.f32.mxu0 %v4730_v51 }
0x105a   :  { %5059 = vmatmul.mubr.f32.gmra.mrb[60].mxu0 %v4728_v28 }
0x1110   :  { %v4917_v6 = vpop.f32.mrb[32].mxu1 }
0x1111   :  { %v4918_v2 = vadd.f32 %v4917_v6, %v8211_v12  ;;  %v4919_v54 = vpop.f32.mrb[33].mxu1  ;;  %v4733_v58 = vpop.f32.mrb[46].mxu0 }
0x1112   :  { %v4920_v63 = vadd.f32 %v4919_v54, %v8214_v40  ;;  %v4735_v38 = vpop.f32.mrb[47].mxu0  ;;  %v4734_v52 = vadd.f32 %v4733_v58, %v8191_v30 }
0x1113   :  { %5069 = vst [vmem:[#allocation17] sm:$0xff] %v4918_v2  ;;  %v4736_v56 = vadd.f32 %v4735_v38, %v8188_v8 }
0x1114   :  { %5070 = vst [vmem:[#allocation17 + $0x8] sm:$0xff] %v4920_v63  ;;  %v4923_v37 = vpop.f32.mrb[34].mxu1 }
0x1115   :  { %v4924_v13 = vadd.f32 %v4923_v37, %v8211_v12  ;;  %v4925_v33 = vpop.f32.mrb[35].mxu1  ;;  %4957 = vmatprep.mubr.f32.mxu1 %v4736_v56  ;;  %v5165_v18 = vpop.f32.mrb[48].mxu0  ;;  %5063 = vmatprep.mubr.f32.mxu0 %v4736_v56 }
0x1116   :  { %v4926_v1 = vadd.f32 %v4925_v33, %v8214_v40  ;;  %4958 = vmatmul.mubr.f32.gmra.mrb[46].mxu1 %v4734_v52  ;;  %v5166_v16 = vpop.f32.mrb[49].mxu0  ;;  %5064 = vmatmul.mubr.f32.gmra.mrb[62].mxu0 %v4734_v52 }
0x1117   :  { %5072 = vst [vmem:[#allocation17 + $0x18] sm:$0xff] %v4924_v13  ;;  %v5167_v32 = vadd.f32 %v5166_v16, %v5165_v18 }
0x1118   :  { %5073 = vst [vmem:[#allocation17 + $0x20] sm:$0xff] %v4926_v1  ;;  %v4929_v22 = vpop.f32.mrb[36].mxu1 }
0x1119   :  { %v5031_v26 = vadd.f32 %v5167_v32, %v8222_v60  ;;  %v4930_v55 = vadd.f32 %v4929_v22, %v8211_v12  ;;  %v4931_v31 = vpop.f32.mrb[37].mxu1  ;;  %v5168_v29 = vpop.f32.mrb[50].mxu0 }
0x111a   :  { %v4932_v62 = vadd.f32 %v4931_v31, %v8214_v40  ;;  %v5169_v21 = vpop.f32.mrb[51].mxu0 }
0x111b   :  { %5071 = vst [vmem:[#allocation17 + $0x10] sm:$0xff] %v5031_v26  ;;  %5075 = vst [vmem:[#allocation17 + $0x30] sm:$0xff] %v4930_v55  ;;  %v5170_v23 = vadd.f32 %v5169_v21, %v5168_v29 }
0x111c   :  { %5076 = vst [vmem:[#allocation17 + $0x38] sm:$0xff] %v4932_v62  ;;  %v4935_v10 = vpop.f32.mrb[38].mxu1 }
0x111d   :  { %v5036_v25 = vadd.f32 %v5170_v23, %v8222_v60  ;;  %v4936_v36 = vadd.f32 %v4935_v10, %v8211_v12  ;;  %v4937_v59 = vpop.f32.mrb[39].mxu1  ;;  %v5171_v8 = vpop.f32.mrb[52].mxu0 }
0x111e   :  { %v4938_v30 = vadd.f32 %v4937_v59, %v8214_v40  ;;  %v5172_v7 = vpop.f32.mrb[53].mxu0 }
0x111f   :  { %5074 = vst [vmem:[#allocation17 + $0x28] sm:$0xff] %v5036_v25  ;;  %5078 = vst [vmem:[#allocation17 + $0x48] sm:$0xff] %v4936_v36  ;;  %v5173_v42 = vadd.f32 %v5172_v7, %v5171_v8 }
0x1120   :  { %5079 = vst [vmem:[#allocation17 + $0x50] sm:$0xff] %v4938_v30  ;;  %v4941_v46 = vpop.f32.mrb[40].mxu1 }
0x1121   :  { %v5041_v0 = vadd.f32 %v5173_v42, %v8222_v60  ;;  %v4942_v48 = vadd.f32 %v4941_v46, %v8211_v12  ;;  %v4943_v44 = vpop.f32.mrb[41].mxu1  ;;  %v5174_v4 = vpop.f32.mrb[54].mxu0 }
0x1122   :  { %v4944_v27 = vadd.f32 %v4943_v44, %v8214_v40  ;;  %v5175_v3 = vpop.f32.mrb[55].mxu0 }
0x1123   :  { %5077 = vst [vmem:[#allocation17 + $0x40] sm:$0xff] %v5041_v0  ;;  %5081 = vst [vmem:[#allocation17 + $0x60] sm:$0xff] %v4942_v48  ;;  %v5176_v50 = vadd.f32 %v5175_v3, %v5174_v4 }
0x1124   :  { %5082 = vst [vmem:[#allocation17 + $0x68] sm:$0xff] %v4944_v27  ;;  %v4947_v57 = vpop.f32.mrb[42].mxu1 }
0x1125   :  { %v5046_v35 = vadd.f32 %v5176_v50, %v8222_v60  ;;  %v4948_v41 = vadd.f32 %v4947_v57, %v8211_v12  ;;  %v4949_v20 = vpop.f32.mrb[43].mxu1  ;;  %v5177_v43 = vpop.f32.mrb[56].mxu0 }
0x1126   :  { %v4950_v5 = vadd.f32 %v4949_v20, %v8214_v40  ;;  %v5178_v17 = vpop.f32.mrb[57].mxu0 }
0x1127   :  { %5080 = vst [vmem:[#allocation17 + $0x58] sm:$0xff] %v5046_v35  ;;  %5084 = vst [vmem:[#allocation17 + $0x78] sm:$0xff] %v4948_v41  ;;  %v5179_v15 = vadd.f32 %v5178_v17, %v5177_v43 }
0x1128   :  { %5085 = vst [vmem:[#allocation17 + $0x80] sm:$0xff] %v4950_v5  ;;  %v4953_v45 = vpop.f32.mrb[44].mxu1 }
0x1129   :  { %v5051_v34 = vadd.f32 %v5179_v15, %v8222_v60  ;;  %v4954_v61 = vadd.f32 %v4953_v45, %v8211_v12  ;;  %v4955_v14 = vpop.f32.mrb[45].mxu1  ;;  %v5180_v11 = vpop.f32.mrb[58].mxu0 }
0x112a   :  { %v4956_v47 = vadd.f32 %v4955_v14, %v8214_v40  ;;  %v5181_v53 = vpop.f32.mrb[59].mxu0 }
0x112b   :  { %5083 = vst [vmem:[#allocation17 + $0x70] sm:$0xff] %v5051_v34  ;;  %5087 = vst [vmem:[#allocation17 + $0x90] sm:$0xff] %v4954_v61  ;;  %v5182_v9 = vadd.f32 %v5181_v53, %v5180_v11 }
0x112c   :  { %5088 = vst [vmem:[#allocation17 + $0x98] sm:$0xff] %v4956_v47 }
0x112d   :  { %v5056_v49 = vadd.f32 %v5182_v9, %v8222_v60  ;;  %v5183_v39 = vpop.f32.mrb[60].mxu0 }
0x112e   :  { %v5184_v19 = vpop.f32.mrb[61].mxu0 }
0x112f   :  { %5086 = vst [vmem:[#allocation17 + $0x88] sm:$0xff] %v5056_v49  ;;  %v5185_v51 = vadd.f32 %v5184_v19, %v5183_v39 }
0x1131   :  { %v5061_v28 = vadd.f32 %v5185_v51, %v8222_v60 }
0x1133   :  { %5089 = vst [vmem:[#allocation17 + $0xa0] sm:$0xff] %v5061_v28 }
0x11e9   :  { %v4959_v24 = vpop.f32.mrb[46].mxu1  ;;  %v5186_v6 = vpop.f32.mrb[62].mxu0 }
0x11ea   :  { %v4960_v2 = vadd.f32 %v4959_v24, %v8211_v12  ;;  %v4961_v54 = vpop.f32.mrb[47].mxu1  ;;  %v5187_v58 = vpop.f32.mrb[63].mxu0 }
0x11eb   :  { %v4962_v63 = vadd.f32 %v4961_v54, %v8214_v40  ;;  %v5188_v38 = vadd.f32 %v5187_v58, %v5186_v6 }
0x11ec   :  { %5090 = vst [vmem:[#allocation17 + $0xa8] sm:$0xff] %v4960_v2 }
0x11ed   :  { %5091 = vst [vmem:[#allocation17 + $0xb0] sm:$0xff] %v4962_v63  ;;  %v5066_v56 = vadd.f32 %v5188_v38, %v8222_v60 }
0x11ef   :  { %5092 = vst [vmem:[#allocation17 + $0xb8] sm:$0xff] %v5066_v56 }
0x11f0   :  { %6883 = shalt.err (!%p6880_p4)
}
0x11f1   :  { %s6884_s16 = scalar_lea.hbm %s8271_s11, 3072 }
0x11f2   :  { %p6885_p5 = scmp.ne.s32.totalorder %s8271_s11, %s6884_s16  ;;  %p6888_p6 = scmp.lt.u32.totalorder %s6884_s16, %s8271_s11 }
0x11f4   :  { %p6890_p7 = pnand %p6888_p6, %p6885_p5 }
0x11f6   :  { %6893 = shalt.err (!%p6890_p7)
}
0x11f7   :  { %5104 = dma.vmem_to_hbm [thread:$0]  %s5099_s7, 3072, %s8271_s11, [#allocation7], %s6917_s5, %s6917_s5, %s6918_s27  }
0x11f8   :  { %6902 = dma.done.wait [#allocation7], 3072  }
0x11f9   :  { %6903 = vsyncadd [#allocation7], 4294964224 }
0x11fa   :  { %5108 = vsyncpa [#allocation6], 1 }
0x11fb   :  { %5109 = vsyncpa [#allocation9], 1 }
0x11fc   :  { %5110 = vsyncpa [#allocation12], 1 }
0x11fd   :  { %5111 = vsyncpa [#allocation15], 1 }
0x11fe   :  { %5112 = vsyncpa [#allocation7], 1 }

</bundles_post_ra>
